<compile_context>
chip_gen: v7x
topology: tpu7x:2x2x1
jax: 0.10.0
libtpu: 0.0.40
codegen_flags: <defaults>
</compile_context>

<pallas_src>
import jax
import jax.numpy as jnp
from jax.experimental import pallas as pl
from jax.experimental.pallas import tpu as pltpu


# ----------------------------------------------------------------------------
# Model configuration (feature dims match the PyTorch module exactly).
# ----------------------------------------------------------------------------
VISION_DIM = 2048        # resnet50 with fc = Identity
TEXT_DIM = 768           # distilbert hidden size
FUSE_OUT = 512           # nn.Linear(2048 + 768, 512)

PATCH = 4
IN_K = 3 * PATCH * PATCH         # 48, kept unpadded (MXU pads internally)
V_HIDDEN = 256
VOCAB = 1000
SEQ_LEN = 8
V_CHUNK = 512                    # VISION_DIM streaming chunk (vhw cols / fc_wi rows)


def _default_out_splits():
    """2 output-column blocks on v7x (2 TensorCores/chip), else 1."""
    try:
        kind = jax.devices()[0].device_kind.lower()
    except Exception:  # pragma: no cover
        return 1
    return 2 if "v7" in kind else 1


# ----------------------------------------------------------------------------
# Fused kernel: vision branch + text branch (CLS only) + fusion Linear.
# Grid: (out_splits [parallel], VISION_DIM // V_CHUNK [arbitrary]).
# ----------------------------------------------------------------------------
def _make_kernel(B, P):
    def kernel(x_ref,                  # (B*P, 48)      bf16  image patches
               vpw_ref, vpb_ref,       # (48, 256) bf16 / (1, 256) f32
               vhw_ref, vhb_ref,       # (256, V_CHUNK) bf16 / (1, V_CHUNK) f32
               cls_ref,                # (B, 768)       bf16  gathered CLS rows
               tdw_ref, tdb_ref,       # (768, 768) bf16 / (1, 768) f32
               wi_ref, wt_ref, fcb_ref,  # (V_CHUNK, NOUT)/(768, NOUT) bf16 / (1, NOUT) f32
               o_ref,                  # (B, NOUT) f32
               pooled_sc,              # scratch VMEM (B, 256) f32
               acc_sc):                # scratch VMEM (B, NOUT) f32
        k = pl.program_id(1)

        # ---- once per output block: stem + pool + text branch + acc init ----
        @pl.when(k == 0)
        def _preamble():
            # vision stem: patch dense + ReLU   (f32 epilogue, v5e-safe)
            h = jnp.dot(x_ref[...], vpw_ref[...],
                        preferred_element_type=jnp.float32)
            h = jnp.maximum(h + vpb_ref[...], 0.0)           # (B*P, 256) f32
            # global mean-pool over patches: reshape + sublane reduce (XLU)
            pooled_sc[...] = jnp.mean(h.reshape(B, P, V_HIDDEN), axis=1)

            # text branch (CLS token only): dense + tanh
            txt = jnp.dot(cls_ref[...], tdw_ref[...],
                          preferred_element_type=jnp.float32)
            txt = jnp.tanh(txt + tdb_ref[...])               # (B, 768) f32

            # init fusion accumulator with the text contribution + bias
            acc_sc[...] = jnp.dot(txt.astype(jnp.bfloat16), wt_ref[...],
                                  preferred_element_type=jnp.float32) + fcb_ref[...]

        # ---- every chunk: vision head slice + fused-Linear partial sum ------
        img = jnp.dot(pooled_sc[...].astype(jnp.bfloat16), vhw_ref[...],
                      preferred_element_type=jnp.float32)
        img = jnp.maximum(img + vhb_ref[...], 0.0)           # (B, V_CHUNK) f32
        acc_sc[...] = acc_sc[...] + jnp.dot(img.astype(jnp.bfloat16), wi_ref[...],
                                            preferred_element_type=jnp.float32)

        # ---- last chunk: store the (lane-dense) output block ----------------
        @pl.when(k == pl.num_programs(1) - 1)
        def _finalize():
            o_ref[...] = acc_sc[...].astype(o_ref.dtype)

    return kernel


# ----------------------------------------------------------------------------
# Parameters.
# ----------------------------------------------------------------------------
def init_params(key):
    ks = jax.random.split(key, 5)
    s = 0.02
    return {
        # simplified vision encoder (patchify-conv stem + head)
        "v_patch_w": s * jax.random.normal(ks[0], (IN_K, V_HIDDEN), jnp.float32),
        "v_patch_b": jnp.zeros((V_HIDDEN,), jnp.float32),
        "v_head_w": s * jax.random.normal(ks[1], (V_HIDDEN, VISION_DIM), jnp.float32),
        "v_head_b": jnp.zeros((VISION_DIM,), jnp.float32),
        # simplified text encoder (embedding table + one dense layer)
        "t_embed": s * jax.random.normal(ks[2], (VOCAB, TEXT_DIM), jnp.float32),
        "t_dense_w": s * jax.random.normal(ks[3], (TEXT_DIM, TEXT_DIM), jnp.float32),
        "t_dense_b": jnp.zeros((TEXT_DIM,), jnp.float32),
        # fusion layer: nn.Linear(2048 + 768, 512)  (weight stored as (in, out))
        "fc_w": s * jax.random.normal(ks[4], (VISION_DIM + TEXT_DIM, FUSE_OUT), jnp.float32),
        "fc_b": jnp.zeros((FUSE_OUT,), jnp.float32),
    }


def prepare_params(p):
    """One-time weight prep: cast MXU operands (and the embedding table) to
    bf16, split fc_w for the exact concat+Linear fusion. Biases stay f32."""
    return {
        "v_patch_w": p["v_patch_w"].astype(jnp.bfloat16),
        "v_patch_b": p["v_patch_b"].reshape(1, -1),
        "v_head_w": p["v_head_w"].astype(jnp.bfloat16),
        "v_head_b": p["v_head_b"].reshape(1, -1),
        "t_embed": p["t_embed"].astype(jnp.bfloat16),    # bf16 table (half the gather bytes)
        "t_dense_w": p["t_dense_w"].astype(jnp.bfloat16),
        "t_dense_b": p["t_dense_b"].reshape(1, -1),
        "fc_wi": p["fc_w"][:VISION_DIM].astype(jnp.bfloat16),
        "fc_wt": p["fc_w"][VISION_DIM:].astype(jnp.bfloat16),
        "fc_b": p["fc_b"].reshape(1, -1),
    }


# ----------------------------------------------------------------------------
# Forward pass (single pallas_call with a small streaming grid).
# ----------------------------------------------------------------------------
def multimodal_vlm_forward(prep, image_nchw, token_ids, *, out_splits=None):
    """image_nchw: (B, 3, H, W) float32,  token_ids: (B, S) int32."""
    B, C, H, W = image_nchw.shape
    assert C == 3 and H % PATCH == 0 and W % PATCH == 0
    hp, wp = H // PATCH, W // PATCH
    P = hp * wp

    # TODO(synk): full pretrained ResNet50 backbone not reproducible; simplified
    # to patchify-conv stem + ReLU + global-average-pool + 2048-d projection.
    # Layout plumbing (tiny, constant-shaped): NCHW -> patch rows, bf16, K=48.
    x = jnp.transpose(image_nchw, (0, 2, 3, 1))                       # NHWC
    x = x.reshape(B, hp, PATCH, wp, PATCH, C)
    x = jnp.transpose(x, (0, 1, 3, 2, 4, 5)).reshape(B * P, IN_K)
    x = x.astype(jnp.bfloat16)                                        # (B*P, 48) bf16

    # TODO(synk): HF tokenizer + pretrained DistilBERT not reproducible; simplified
    # to embedding lookup + one dense+tanh layer; only the CLS token is computed.
    cls_emb = jnp.take(prep["t_embed"], token_ids[:, 0].astype(jnp.int32),
                       axis=0)                                        # (B, 768) bf16

    ns = out_splits if out_splits is not None else _default_out_splits()
    assert FUSE_OUT % ns == 0
    nout = FUSE_OUT // ns
    kc = VISION_DIM // V_CHUNK

    const2d = lambda shape: pl.BlockSpec(shape, lambda p, k: (0, 0))

    grid_spec = pltpu.PrefetchScalarGridSpec(
        num_scalar_prefetch=0,
        grid=(ns, kc),
        in_specs=[
            const2d((B * P, IN_K)),                                   # x
            const2d((IN_K, V_HIDDEN)),                                # v_patch_w
            const2d((1, V_HIDDEN)),                                   # v_patch_b
            pl.BlockSpec((V_HIDDEN, V_CHUNK), lambda p, k: (0, k)),   # v_head_w (streamed)
            pl.BlockSpec((1, V_CHUNK), lambda p, k: (0, k)),          # v_head_b (streamed)
            const2d((B, TEXT_DIM)),                                   # cls_emb
            const2d((TEXT_DIM, TEXT_DIM)),                            # t_dense_w
            const2d((1, TEXT_DIM)),                                   # t_dense_b
            pl.BlockSpec((V_CHUNK, nout), lambda p, k: (k, p)),       # fc_wi (streamed)
            pl.BlockSpec((TEXT_DIM, nout), lambda p, k: (0, p)),      # fc_wt
            pl.BlockSpec((1, nout), lambda p, k: (0, p)),             # fc_b
        ],
        out_specs=pl.BlockSpec((B, nout), lambda p, k: (0, p)),
        scratch_shapes=[
            pltpu.VMEM((B, V_HIDDEN), jnp.float32),                   # pooled features
            pltpu.VMEM((B, nout), jnp.float32),                       # fusion accumulator
        ],
    )

    return pl.pallas_call(
        _make_kernel(B, P),
        out_shape=jax.ShapeDtypeStruct((B, FUSE_OUT), jnp.float32),
        grid_spec=grid_spec,
        compiler_params=pltpu.CompilerParams(
            dimension_semantics=("parallel", "arbitrary"),
            vmem_limit_bytes=32 * 1024 * 1024),
    )(x,
      prep["v_patch_w"], prep["v_patch_b"],
      prep["v_head_w"], prep["v_head_b"],
      cls_emb,
      prep["t_dense_w"], prep["t_dense_b"],
      prep["fc_wi"], prep["fc_wt"], prep["fc_b"])


if __name__ == "__main__":
    key = jax.random.PRNGKey(0)
    k_param, k_img, k_tok = jax.random.split(key, 3)

    raw = init_params(k_param)
    prep = prepare_params(raw)

    B, C, H, W = 2, 3, 16, 16
    image = jax.random.normal(k_img, (B, C, H, W), jnp.float32)       # NCHW like PyTorch
    token_ids = jax.random.randint(k_tok, (B, SEQ_LEN), 0, VOCAB, jnp.int32)

    out = jax.jit(multimodal_vlm_forward)(prep, image, token_ids)
    out = jax.block_until_ready(out)
    assert out.shape == (B, FUSE_OUT) and out.dtype == jnp.float32

    # Pure-JAX f32 reference of the same forward semantics (bf16 MXU operands in
    # the kernel => compare with a modest tolerance).
    hp, wp = H // PATCH, W // PATCH
    P = hp * wp
    xr = jnp.transpose(image, (0, 2, 3, 1)).reshape(B, hp, PATCH, wp, PATCH, C)
    xr = jnp.transpose(xr, (0, 1, 3, 2, 4, 5)).reshape(B * P, IN_K)
    h_ref = jnp.maximum(xr @ raw["v_patch_w"] + raw["v_patch_b"], 0.0)
    pooled_ref = h_ref.reshape(B, P, V_HIDDEN).mean(axis=1)
    img_ref = jnp.maximum(pooled_ref @ raw["v_head_w"] + raw["v_head_b"], 0.0)
    cls_ref = raw["t_embed"][token_ids[:, 0]]
    txt_ref = jnp.tanh(cls_ref @ raw["t_dense_w"] + raw["t_dense_b"])
    ref = jnp.concatenate([img_ref, txt_ref], axis=1) @ raw["fc_w"] + raw["fc_b"]

    assert jnp.allclose(out, ref, atol=5e-3, rtol=5e-2), float(jnp.max(jnp.abs(out - ref)))

    print("KERNEL_OK")
</pallas_src>

<mosaic_0001>
module attributes {stable_mosaic.version = 11 : i64} {
  func.func @kernel(%arg0: i32, %arg1: i32, %arg2: memref<32x48xbf16, #tpu.memory_space<vmem>>, %arg3: memref<48x256xbf16, #tpu.memory_space<vmem>>, %arg4: memref<1x256xf32, #tpu.memory_space<vmem>>, %arg5: memref<256x512xbf16, #tpu.memory_space<vmem>>, %arg6: memref<1x512xf32, #tpu.memory_space<vmem>>, %arg7: memref<2x768xbf16, #tpu.memory_space<vmem>>, %arg8: memref<768x768xbf16, #tpu.memory_space<vmem>>, %arg9: memref<1x768xf32, #tpu.memory_space<vmem>>, %arg10: memref<512x512xbf16, #tpu.memory_space<vmem>>, %arg11: memref<768x512xbf16, #tpu.memory_space<vmem>>, %arg12: memref<1x512xf32, #tpu.memory_space<vmem>>, %arg13: memref<2x512xf32, #tpu.memory_space<vmem>>, %arg14: memref<2x256xf32, #tpu.memory_space<vmem>>, %arg15: memref<2x512xf32, #tpu.memory_space<vmem>>) attributes {dimension_semantics = [#tpu.dimension_semantics<parallel>, #tpu.dimension_semantics<arbitrary>], iteration_bounds = array<i64: 1, 4>, scalar_prefetch = 0 : i64, scratch_operands = 2 : i64, tpu.core_type = #tpu.core_type<tc>, window_params = [{pipeline_mode = #tpu.pipeline_mode<synchronous>, transform_indices = @transform_0, window_bounds = array<i64: 32, 48>}, {pipeline_mode = #tpu.pipeline_mode<synchronous>, transform_indices = @transform_1, window_bounds = array<i64: 48, 256>}, {pipeline_mode = #tpu.pipeline_mode<synchronous>, transform_indices = @transform_2, window_bounds = array<i64: 1, 256>}, {transform_indices = @transform_3, window_bounds = array<i64: 256, 512>}, {transform_indices = @transform_4, window_bounds = array<i64: 1, 512>}, {pipeline_mode = #tpu.pipeline_mode<synchronous>, transform_indices = @transform_5, window_bounds = array<i64: 2, 768>}, {pipeline_mode = #tpu.pipeline_mode<synchronous>, transform_indices = @transform_6, window_bounds = array<i64: 768, 768>}, {pipeline_mode = #tpu.pipeline_mode<synchronous>, transform_indices = @transform_7, window_bounds = array<i64: 1, 768>}, {transform_indices = @transform_8, window_bounds = array<i64: 512, 512>}, {transform_indices = @transform_9, window_bounds = array<i64: 768, 512>}, {transform_indices = @transform_10, window_bounds = array<i64: 1, 512>}, {transform_indices = @transform_11, window_bounds = array<i64: 2, 512>}]} {
    %c0_i32 = arith.constant 0 : i32
    %0 = arith.cmpi eq, %arg1, %c0_i32 : i32
    %1 = arith.extui %0 : i1 to i32
    %c0_i32_0 = arith.constant 0 : i32
    %2 = arith.cmpi ne, %1, %c0_i32_0 : i32
    scf.if %2 {
      %c0_15 = arith.constant 0 : index
      %c0_16 = arith.constant 0 : index
      %21 = vector.load %arg2[%c0_15, %c0_16] : memref<32x48xbf16, #tpu.memory_space<vmem>>, vector<32x48xbf16>
      %c0_17 = arith.constant 0 : index
      %c0_18 = arith.constant 0 : index
      %22 = vector.load %arg3[%c0_17, %c0_18] : memref<48x256xbf16, #tpu.memory_space<vmem>>, vector<48x256xbf16>
      %cst_19 = arith.constant dense<0.000000e+00> : vector<32x256xf32>
      %23 = tpu.matmul %21, %22, %cst_19 {dimension_numbers = #tpu.dot_dimension_numbers<[1], [0], [0], [1], [0, 0, 1, 1], [], []>} : vector<32x48xbf16>, vector<48x256xbf16>, vector<32x256xf32> -> vector<32x256xf32>
      %c0_20 = arith.constant 0 : index
      %c0_21 = arith.constant 0 : index
      %24 = vector.load %arg4[%c0_20, %c0_21] : memref<1x256xf32, #tpu.memory_space<vmem>>, vector<1x256xf32>
      %25 = vector.broadcast %24 : vector<1x256xf32> to vector<32x256xf32>
      %26 = arith.addf %23, %25 : vector<32x256xf32>
      %cst_22 = arith.constant 0.000000e+00 : f32
      %27 = vector.broadcast %cst_22 : f32 to vector<32x256xf32>
      %28 = arith.maximumf %26, %27 : vector<32x256xf32>
      %29 = vector.shape_cast %28 : vector<32x256xf32> to vector<2x16x256xf32>
      %cst_23 = arith.constant dense<0.000000e+00> : vector<2x256xf32>
      %30 = vector.multi_reduction <add>, %29, %cst_23 [1] : vector<2x16x256xf32> to vector<2x256xf32>
      %cst_24 = arith.constant 1.600000e+01 : f32
      %31 = vector.broadcast %cst_24 : f32 to vector<2x256xf32>
      %32 = arith.divf %30, %31 : vector<2x256xf32>
      %c0_25 = arith.constant 0 : index
      %c0_26 = arith.constant 0 : index
      %33 = vector.load %arg14[%c0_25, %c0_26] : memref<2x256xf32, #tpu.memory_space<vmem>>, vector<2x256xf32>
      tpu.vector_store %arg14[%c0_25, %c0_26], %32 {strides = array<i32>} : memref<2x256xf32, #tpu.memory_space<vmem>>, vector<2x256xf32>,
      %c0_27 = arith.constant 0 : index
      %c0_28 = arith.constant 0 : index
      %34 = vector.load %arg7[%c0_27, %c0_28] : memref<2x768xbf16, #tpu.memory_space<vmem>>, vector<2x768xbf16>
      %c0_29 = arith.constant 0 : index
      %c0_30 = arith.constant 0 : index
      %35 = vector.load %arg8[%c0_29, %c0_30] : memref<768x768xbf16, #tpu.memory_space<vmem>>, vector<768x768xbf16>
      %cst_31 = arith.constant dense<0.000000e+00> : vector<2x768xf32>
      %36 = tpu.matmul %34, %35, %cst_31 {dimension_numbers = #tpu.dot_dimension_numbers<[1], [0], [0], [1], [0, 0, 1, 1], [], []>} : vector<2x768xbf16>, vector<768x768xbf16>, vector<2x768xf32> -> vector<2x768xf32>
      %c0_32 = arith.constant 0 : index
      %c0_33 = arith.constant 0 : index
      %37 = vector.load %arg9[%c0_32, %c0_33] : memref<1x768xf32, #tpu.memory_space<vmem>>, vector<1x768xf32>
      %38 = vector.broadcast %37 : vector<1x768xf32> to vector<2x768xf32>
      %39 = arith.addf %36, %38 : vector<2x768xf32>
      %40 = math.tanh %39 : vector<2x768xf32>
      %41 = arith.truncf %40 : vector<2x768xf32> to vector<2x768xbf16>
      %c0_34 = arith.constant 0 : index
      %c0_35 = arith.constant 0 : index
      %42 = vector.load %arg11[%c0_34, %c0_35] : memref<768x512xbf16, #tpu.memory_space<vmem>>, vector<768x512xbf16>
      %cst_36 = arith.constant dense<0.000000e+00> : vector<2x512xf32>
      %43 = tpu.matmul %41, %42, %cst_36 {dimension_numbers = #tpu.dot_dimension_numbers<[1], [0], [0], [1], [0, 0, 1, 1], [], []>} : vector<2x768xbf16>, vector<768x512xbf16>, vector<2x512xf32> -> vector<2x512xf32>
      %c0_37 = arith.constant 0 : index
      %c0_38 = arith.constant 0 : index
      %44 = vector.load %arg12[%c0_37, %c0_38] : memref<1x512xf32, #tpu.memory_space<vmem>>, vector<1x512xf32>
      %45 = vector.broadcast %44 : vector<1x512xf32> to vector<2x512xf32>
      %46 = arith.addf %43, %45 : vector<2x512xf32>
      %c0_39 = arith.constant 0 : index
      %c0_40 = arith.constant 0 : index
      %47 = vector.load %arg15[%c0_39, %c0_40] : memref<2x512xf32, #tpu.memory_space<vmem>>, vector<2x512xf32>
      tpu.vector_store %arg15[%c0_39, %c0_40], %46 {strides = array<i32>} : memref<2x512xf32, #tpu.memory_space<vmem>>, vector<2x512xf32>,
    } else {
    }
    %c0 = arith.constant 0 : index
    %c0_1 = arith.constant 0 : index
    %3 = vector.load %arg14[%c0, %c0_1] : memref<2x256xf32, #tpu.memory_space<vmem>>, vector<2x256xf32>
    %4 = arith.truncf %3 : vector<2x256xf32> to vector<2x256xbf16>
    %c0_2 = arith.constant 0 : index
    %c0_3 = arith.constant 0 : index
    %5 = vector.load %arg5[%c0_2, %c0_3] : memref<256x512xbf16, #tpu.memory_space<vmem>>, vector<256x512xbf16>
    %cst = arith.constant dense<0.000000e+00> : vector<2x512xf32>
    %6 = tpu.matmul %4, %5, %cst {dimension_numbers = #tpu.dot_dimension_numbers<[1], [0], [0], [1], [0, 0, 1, 1], [], []>} : vector<2x256xbf16>, vector<256x512xbf16>, vector<2x512xf32> -> vector<2x512xf32>
    %c0_4 = arith.constant 0 : index
    %c0_5 = arith.constant 0 : index
    %7 = vector.load %arg6[%c0_4, %c0_5] : memref<1x512xf32, #tpu.memory_space<vmem>>, vector<1x512xf32>
    %8 = vector.broadcast %7 : vector<1x512xf32> to vector<2x512xf32>
    %9 = arith.addf %6, %8 : vector<2x512xf32>
    %cst_6 = arith.constant 0.000000e+00 : f32
    %10 = vector.broadcast %cst_6 : f32 to vector<2x512xf32>
    %11 = arith.maximumf %9, %10 : vector<2x512xf32>
    %c0_7 = arith.constant 0 : index
    %c0_8 = arith.constant 0 : index
    %12 = vector.load %arg15[%c0_7, %c0_8] : memref<2x512xf32, #tpu.memory_space<vmem>>, vector<2x512xf32>
    %13 = arith.truncf %11 : vector<2x512xf32> to vector<2x512xbf16>
    %c0_9 = arith.constant 0 : index
    %c0_10 = arith.constant 0 : index
    %14 = vector.load %arg10[%c0_9, %c0_10] : memref<512x512xbf16, #tpu.memory_space<vmem>>, vector<512x512xbf16>
    %cst_11 = arith.constant dense<0.000000e+00> : vector<2x512xf32>
    %15 = tpu.matmul %13, %14, %cst_11 {dimension_numbers = #tpu.dot_dimension_numbers<[1], [0], [0], [1], [0, 0, 1, 1], [], []>} : vector<2x512xbf16>, vector<512x512xbf16>, vector<2x512xf32> -> vector<2x512xf32>
    %16 = arith.addf %12, %15 : vector<2x512xf32>
    %c0_12 = arith.constant 0 : index
    %c0_13 = arith.constant 0 : index
    %17 = vector.load %arg15[%c0_12, %c0_13] : memref<2x512xf32, #tpu.memory_space<vmem>>, vector<2x512xf32>
    tpu.vector_store %arg15[%c0_12, %c0_13], %16 {strides = array<i32>} : memref<2x512xf32, #tpu.memory_space<vmem>>, vector<2x512xf32>,
    %c3_i32 = arith.constant 3 : i32
    %18 = arith.cmpi eq, %arg1, %c3_i32 : i32
    %19 = arith.extui %18 : i1 to i32
    %c0_i32_14 = arith.constant 0 : i32
    %20 = arith.cmpi ne, %19, %c0_i32_14 : i32
    scf.if %20 {
      %c0_15 = arith.constant 0 : index
      %c0_16 = arith.constant 0 : index
      %21 = vector.load %arg15[%c0_15, %c0_16] : memref<2x512xf32, #tpu.memory_space<vmem>>, vector<2x512xf32>
      %c0_17 = arith.constant 0 : index
      %c0_18 = arith.constant 0 : index
      %22 = vector.load %arg13[%c0_17, %c0_18] : memref<2x512xf32, #tpu.memory_space<vmem>>, vector<2x512xf32>
      tpu.vector_store %arg13[%c0_17, %c0_18], %21 {strides = array<i32>} : memref<2x512xf32, #tpu.memory_space<vmem>>, vector<2x512xf32>,
    } else {
    }
    return
  }
  func.func @transform_0(%arg0: i32, %arg1: i32) -> (i32, i32) {
    %c0_i32 = arith.constant 0 : i32
    %c0_i32_0 = arith.constant 0 : i32
    %c0_i32_1 = arith.constant 0 : i32
    return %c0_i32, %c0_i32_0 : i32, i32
  }
  func.func @transform_1(%arg0: i32, %arg1: i32) -> (i32, i32) {
    %c0_i32 = arith.constant 0 : i32
    %c0_i32_0 = arith.constant 0 : i32
    %c0_i32_1 = arith.constant 0 : i32
    return %c0_i32, %c0_i32_0 : i32, i32
  }
  func.func @transform_2(%arg0: i32, %arg1: i32) -> (i32, i32) {
    %c0_i32 = arith.constant 0 : i32
    %c0_i32_0 = arith.constant 0 : i32
    %c0_i32_1 = arith.constant 0 : i32
    return %c0_i32, %c0_i32_0 : i32, i32
  }
  func.func @transform_3(%arg0: i32, %arg1: i32) -> (i32, i32) {
    %c0_i32 = arith.constant 0 : i32
    %c0_i32_0 = arith.constant 0 : i32
    return %c0_i32, %arg1 : i32, i32
  }
  func.func @transform_4(%arg0: i32, %arg1: i32) -> (i32, i32) {
    %c0_i32 = arith.constant 0 : i32
    %c0_i32_0 = arith.constant 0 : i32
    return %c0_i32, %arg1 : i32, i32
  }
  func.func @transform_5(%arg0: i32, %arg1: i32) -> (i32, i32) {
    %c0_i32 = arith.constant 0 : i32
    %c0_i32_0 = arith.constant 0 : i32
    %c0_i32_1 = arith.constant 0 : i32
    return %c0_i32, %c0_i32_0 : i32, i32
  }
  func.func @transform_6(%arg0: i32, %arg1: i32) -> (i32, i32) {
    %c0_i32 = arith.constant 0 : i32
    %c0_i32_0 = arith.constant 0 : i32
    %c0_i32_1 = arith.constant 0 : i32
    return %c0_i32, %c0_i32_0 : i32, i32
  }
  func.func @transform_7(%arg0: i32, %arg1: i32) -> (i32, i32) {
    %c0_i32 = arith.constant 0 : i32
    %c0_i32_0 = arith.constant 0 : i32
    %c0_i32_1 = arith.constant 0 : i32
    return %c0_i32, %c0_i32_0 : i32, i32
  }
  func.func @transform_8(%arg0: i32, %arg1: i32) -> (i32, i32) {
    %c0_i32 = arith.constant 0 : i32
    return %arg1, %arg0 : i32, i32
  }
  func.func @transform_9(%arg0: i32, %arg1: i32) -> (i32, i32) {
    %c0_i32 = arith.constant 0 : i32
    %c0_i32_0 = arith.constant 0 : i32
    return %c0_i32, %arg0 : i32, i32
  }
  func.func @transform_10(%arg0: i32, %arg1: i32) -> (i32, i32) {
    %c0_i32 = arith.constant 0 : i32
    %c0_i32_0 = arith.constant 0 : i32
    return %c0_i32, %arg0 : i32, i32
  }
  func.func @transform_11(%arg0: i32, %arg1: i32) -> (i32, i32) {
    %c0_i32 = arith.constant 0 : i32
    %c0_i32_0 = arith.constant 0 : i32
    return %c0_i32, %arg0 : i32, i32
  }
}

</mosaic_0001>

<bundles_post_ra>
// kernel: multimodal_vlm_forward.1
= control target key start
LH: loop header
LB: loop body
LE: loop exit
PB: predicated region body
PF: predicated region fallthrough
CT: control target
= control target key end

     0   :  { %s9180_s0 = inlined_call_operand.vmem [shape: bf16[32,48], index: 0, kind: input, shape index: {}]   ;;  %s9181_s1 = inlined_call_operand.hbm [shape: bf16[48,256], index: 1, kind: input, shape index: {}]   ;;  %s9182_s2 = inlined_call_operand.hbm [shape: f32[1,256], index: 2, kind: input, shape index: {}]   ;;  %s9183_s3 = inlined_call_operand.hbm [shape: bf16[256,2048], index: 3, kind: input, shape index: {}]   ;;  %s9184_s4 = inlined_call_operand.hbm [shape: f32[1,2048], index: 4, kind: input, shape index: {}]   ;;  %s9185_s5 = inlined_call_operand.vmem [shape: bf16[2,768], index: 5, kind: input, shape index: {}]   ;;  %s9186_s6 = inlined_call_operand.hbm [shape: bf16[768,768], index: 6, kind: input, shape index: {}]   ;;  %s9187_s7 = inlined_call_operand.hbm [shape: f32[1,768], index: 7, kind: input, shape index: {}]   ;;  %s9188_s8 = inlined_call_operand.hbm [shape: bf16[2048,512], index: 8, kind: input, shape index: {}]   ;;  %s9189_s9 = inlined_call_operand.hbm [shape: bf16[768,512], index: 9, kind: input, shape index: {}]   ;;  %s9190_s10 = inlined_call_operand.hbm [shape: f32[1,512], index: 10, kind: input, shape index: {}]   ;;  %s9191_s11 = inlined_call_operand.hbm [shape: f32[2,512], index: 11, kind: output, shape index: {}]  }
   0x1   :  { %9218 = sst [smem:[#allocation34_spill]] %s9180_s0 }
   0x2   :  { %9219 = sst [smem:[#allocation35_spill]] %s9181_s1 }
   0x3   :  { %9220 = sst [smem:[#allocation36_spill]] %s9182_s2 }
   0x4   :  { %9221 = sst [smem:[#allocation37_spill]] %s9183_s3 }
   0x5   :  { %9222 = sst [smem:[#allocation38_spill]] %s9185_s5 }
   0x6   :  { %9223 = sst [smem:[#allocation39_spill]] %s9191_s11 }
   0x7   :  { %16 = vsyncpa [#allocation5], 0 }
   0x8   :  { %17 = vsyncpa [#allocation8], 0 }
   0x9   :  { %18 = vsyncpa [#allocation13], 0 }
   0xa   :  { %19 = vsyncpa [#allocation6], 0  ;;  %s8480_s17 = smov 0   ;;  %s8482_s18 = smov 0  }
   0xb   :  { %s8484_s19 = smov 0   ;;  %s8486_s20 = smov 0  }
   0xc   :  { %s8488_s21 = smov 0   ;;  %s8490_s22 = smov 0  }
   0xd LB: > { %9224 = sst [smem:[#allocation27_spill]] %s8381_s18  ;;  %s8511_s23 = sadd.s32 4294967295, %s8397_s22   ;;  %s8397_s22 = sphi %s8490_s22, %s25_s22   ;;  %s8393_s21 = sphi %s8488_s21, %s9281_s21   ;;  %s8389_s20 = sphi %s8486_s20, %s9280_s20   ;;  %s8385_s19 = sphi %s8484_s19, %s9278_s19   ;;  %s8381_s18 = sphi %s8482_s18, %s9277_s18   ;;  %s8377_s17 = sphi %s8480_s17, %s9276_s17  }
   0xe   : > { %9225 = sst [smem:[#allocation28_spill]] %s8385_s19  ;;  %p6078_p0 = scmp.ge.s32.totalorder %s8397_s22, 1 }
   0xf   : > { %9226 = sst [smem:[#allocation29_spill]] %s8389_s20  ;;  %p9192_p1 = scmp.eq.s32.totalorder %s8511_s23, 0 }
  0x10   : > { %9227 = sst [smem:[#allocation30_spill]] %s8397_s22  ;;  %p326_p2 = scmp.lt.s32.totalorder %s8397_s22, 5 }
  0x11   : > { %s8399_s25 = smov [#allocation4]   ;;  %s8400_s28 = smov [#allocation7]  }
  0x12   : > { %p8516_p3 = pnand %p6078_p0, %p326_p2  ;;  %s341_s26 = sshll.u32 %s8399_s25, 4  ;;  %s342_s26 = int_to_ptr.vmem [resolvable:$true] %s341_s26 }
  0x13   : > { %s355_s29 = sshll.u32 %s8400_s28, 4  ;;  %s9230_s1 = sld [smem:[#allocation35_spill]]  ;;  %s8528_s29 = int_to_ptr.vmem [resolvable:$true] %s355_s29 }
  0x14   : > { %s9228_s24 = scalar_select %p8516_p3, 1, 0 }
  0x15   : > { %p6889_p4 = pneg %p8516_p3 }
  0x17   : > { %p8524_p5 = pnand %p6889_p4, %p9192_p1 }
  0x19   : > { %s9229_s27 = scalar_select %p8524_p5, 1, 0 }
  0x1a   : > { %s8031_s13 = scalar_lea.hbm %s9230_s1, 768  ;;  %p8538_p7 = pneg %p8524_p5 }
  0x1b   : > { %p8032_p6 = scmp.ne.s32.totalorder %s9230_s1, %s8031_s13  ;;  %p8038_p10 = scmp.lt.u32.totalorder %s8031_s13, %s9230_s1 }
  0x1c   : > { %s9231_s16 = scalar_select %p8538_p7, 1, 0 }
  0x1d   : > { %p8034_p8 = pnand %p8538_p7, %p8032_p6 }
  0x1f   : > { %p8035_p9 = pneg %p8034_p8 }
  0x21   : > { %p8040_p11 = pnand %p8038_p10, %p8035_p9 }
  0x23   : > { %8043 = shalt.err (!%p8040_p11)
}
  0x24   : > { %s8044_s30 = scalar_lea.vmem %s342_s26, 768  ;;  %p8052_p2 = scmp.lt.s32.totalorder %s342_s26, %s342_s26 }
  0x25   : > { %p8045_p12 = scmp.ne.s32.totalorder %s342_s26, %s8044_s30  ;;  %p8053_p4 = scmp.lt.s32.totalorder %s8044_s30, %s8044_s30 }
  0x27   : > { %p8047_p13 = pnand %p8045_p12, %p8538_p7  ;;  %p8054_p1 = por %p8053_p4, %p8052_p2 }
  0x29   : > { %p8048_p0 = pneg %p8047_p13 }
  0x2b   : > { %p8055_p3 = pnand %p8054_p1, %p8048_p0 }
  0x2d   : > { %8058 = shalt.err (!%p8055_p3)
}
  0x2e   : > { %s8401_s12 = smov 128   ;;  %s8402_s14 = smov 8  }
  0x2f   : > { %6892 = dma.hbm_to_vmem [thread:$0]  (!%p8524_p5), %s9230_s1, 768, %s342_s26, [#allocation5], %s8401_s12, %s8401_s12, %s8402_s14  }
  0x30   : > { %s9232_s2 = sld [smem:[#allocation36_spill]] }
  0x36   : > { %s8059_s11 = scalar_lea.hbm %s9232_s2, 32 }
  0x37   : > { %p8060_p6 = scmp.ne.s32.totalorder %s9232_s2, %s8059_s11  ;;  %p8066_p8 = scmp.lt.u32.totalorder %s8059_s11, %s9232_s2 }
  0x39   : > { %p8062_p1 = pnand %p8060_p6, %p8538_p7 }
  0x3b   : > { %p8063_p3 = pneg %p8062_p1 }
  0x3d   : > { %p8068_p9 = pnand %p8066_p8, %p8063_p3 }
  0x3f   : > { %8071 = shalt.err (!%p8068_p9)
}
  0x40   : > { %s8072_s26 = scalar_lea.vmem %s8528_s29, 32  ;;  %p8080_p13 = scmp.lt.s32.totalorder %s8528_s29, %s8528_s29 }
  0x41   : > { %p8073_p10 = scmp.ne.s32.totalorder %s8528_s29, %s8072_s26  ;;  %p8081_p0 = scmp.lt.s32.totalorder %s8072_s26, %s8072_s26 }
  0x43   : > { %p8075_p11 = pnand %p8073_p10, %p8538_p7  ;;  %p8082_p2 = por %p8081_p0, %p8080_p13 }
  0x45   : > { %p8076_p12 = pneg %p8075_p11 }
  0x47   : > { %p8083_p4 = pnand %p8082_p2, %p8076_p12 }
  0x49   : > { %8086 = shalt.err (!%p8083_p4)
}
  0x4a   : > { %6895 = dma.hbm_to_vmem [thread:$0]  (!%p8524_p5), %s9232_s2, 32, %s8528_s29, [#allocation8]  }
  0x4b   : > { %s34_s11 = sadd.s32 1, %s8393_s21  ;;  %s107_s20 = sadd.s32 1, %s8385_s19 }
  0x4c   : > { %p35_p6 = scmp.ge.s32.totalorder %s34_s11, 4  ;;  %p114_p1 = scmp.ne.s32.totalorder %s8385_s19, %s8381_s18 }
  0x4d   : > { %p115_p3 = scmp.eq.s32.totalorder %s8397_s22, 0  ;;  %p120_p8 = scmp.ne.s32.totalorder %s8381_s18, %s8377_s17 }
  0x4e   : > { %s9283_s11 = smov (%p35_p6, %s34_s11), 0  ;;  %p9235_p10 = scmp.eq.s32.totalorder %s8511_s23, 0 }
  0x4f   : > { %9233 = sst [smem:[#allocation31_spill]] %s9283_s11  ;;  %p8586_p9 = por %p115_p3, %p114_p1 }
  0x50   : > { %p8592_p11 = por %p9235_p10, %p120_p8  ;;  %s104_s29 = ssub.s32 %s8393_s21, %s9283_s11 }
  0x51   : > { %p105_p12 = scmp.eq.s32.totalorder %s104_s29, 0  ;;  %p6924_p13 = scmp.lt.s32.totalorder %s8397_s22, 4 }
  0x52   : > { %s9236_s14 = scalar_select %p8592_p11, 1, 0 }
  0x53   : > { %s423_s15 = sand.u32 1, %s8397_s22   ;;  %s8604_s17 = sand.u32 1, %s8385_s19  }
  0x54   : > { %9237 = sst [smem:[#allocation32_spill]] %s9236_s14  ;;  %s6086_s25 = sshll.u32 %s8604_s17, 9 }
  0x55   : > { %s8601_s13 = scalar_select %p105_p12, %s8385_s19, %s107_s20  }
  0x56   : > { %s6795_s28 = sshll.u32 %s8393_s21, 8  ;;  %s9239_s3 = sld [smem:[#allocation37_spill]] }
  0x57   : > { %9238 = sst [smem:[#allocation33_spill]] %s8601_s13  ;;  %s427_s5 = scalar_lea.vmem [#allocation9], %s6086_s25 }
  0x58   : > { %s434_s29 = sshll.u32 %s427_s5, 4  ;;  %p8615_p0 = pnand %p6924_p13, %p8586_p9  ;;  %s8619_s29 = int_to_ptr.vmem [resolvable:$true] %s434_s29 }
  0x59   : > { %s8621_s1 = scalar_lea.sflag [#allocation5], %s423_s15 }
  0x5a   : > { %s9240_s20 = scalar_select %p8615_p0, 1, 0 }
  0x5b   : > { %p8627_p4 = pneg %p8615_p0 }
  0x5c   : > { %s8611_s0 = scalar_lea.hbm %s9239_s3, %s6795_s28  ;;  %s8092_s30 = scalar_lea.hbm %s9239_s3, 32768 }
  0x5d   : > { %s8087_s2 = scalar_lea.hbm %s8611_s0, 8192  ;;  %p8093_p3 = scmp.lt.u32.totalorder %s8611_s0, %s9239_s3 }
  0x5e   : > { %p8088_p2 = scmp.ne.s32.totalorder %s8611_s0, %s8087_s2  ;;  %p8094_p8 = scmp.lt.u32.totalorder %s8092_s30, %s8087_s2 }
  0x5f   : > { %s9241_s28 = scalar_select %p8627_p4, 1, 0 }
  0x60   : > { %p8090_p6 = pnand %p8627_p4, %p8088_p2  ;;  %p8095_p9 = por %p8094_p8, %p8093_p3 }
  0x61   : > { %p8096_p10 = scmp.lt.u32.totalorder %s8087_s2, %s8611_s0 }
  0x62   : > { %p8091_p1 = pneg %p8090_p6 }
  0x63   : > { %p8097_p12 = por %p8096_p10, %p8095_p9 }
  0x65   : > { %p8098_p13 = pnand %p8097_p12, %p8091_p1 }
  0x67   : > { %8101 = shalt.err (!%p8098_p13)
}
  0x68   : > { %s8102_s15 = scalar_lea.vmem %s8619_s29, 8192  ;;  %s8403_s12 = smov [#allocation9]  }
  0x69   : > { %p8103_p2 = scmp.ne.s32.totalorder %s8619_s29, %s8102_s15  ;;  %s8107_s25 = sshll.u32 %s8403_s12, 4  ;;  %s8108_s25 = int_to_ptr.vmem [resolvable:$false] %s8107_s25 }
  0x6a   : > { %s8109_s26 = scalar_lea.vmem %s8108_s25, 16384  ;;  %p8110_p5 = scmp.lt.s32.totalorder %s8619_s29, %s8108_s25 }
  0x6b   : > { %p8105_p6 = pnand %p8103_p2, %p8627_p4  ;;  %p8111_p7 = scmp.lt.s32.totalorder %s8109_s26, %s8102_s15 }
  0x6d   : > { %p8106_p11 = pneg %p8105_p6  ;;  %p8112_p3 = por %p8111_p7, %p8110_p5 }
  0x6f   : > { %p8113_p8 = pnand %p8112_p3, %p8106_p11 }
  0x71   : > { %8116 = shalt.err (!%p8113_p8)
}
  0x72   : > { %s8404_s2 = smov 1024   ;;  %s9206_s30 = smov 256  }
  0x73   : > { %s9208_s5 = smov 16   ;;  %s8407_s12 = smov [#allocation11]  }
  0x74   : > { %6911 = dma.hbm_to_vmem [thread:$0]  (!%p8615_p0), %s8611_s0, 8192, %s8619_s29, %s8621_s1, %s8404_s2, %s9206_s30, %s9208_s5  }
  0x75   : > { %s368_s3 = sshll.u32 %s8407_s12, 4  ;;  %s8117_s26 = scalar_lea.hbm %s9186_s6, 36864  ;;  %s369_s3 = int_to_ptr.vmem [resolvable:$true] %s368_s3 }
  0x76   : > { %p8118_p5 = scmp.ne.s32.totalorder %s9186_s6, %s8117_s26  ;;  %p9242_p7 = scmp.ne.s32.totalorder %s9231_s16, 0 }
  0x77   : > { %p8124_p9 = scmp.lt.u32.totalorder %s8117_s26, %s9186_s6 }
  0x78   : > { %p8120_p11 = pnand %p8118_p5, %p9242_p7 }
  0x7a   : > { %p8121_p1 = pneg %p8120_p11 }
  0x7c   : > { %p8126_p10 = pnand %p8124_p9, %p8121_p1 }
  0x7e   : > { %8129 = shalt.err (!%p8126_p10)
}
  0x7f   : > { %s8130_s0 = scalar_lea.vmem %s369_s3, 36864  ;;  %p8138_p6 = scmp.lt.s32.totalorder %s369_s3, %s369_s3 }
  0x80   : > { %p8131_p12 = scmp.ne.s32.totalorder %s369_s3, %s8130_s0  ;;  %p8139_p3 = scmp.lt.s32.totalorder %s8130_s0, %s8130_s0 }
  0x82   : > { %p8133_p13 = pnand %p8131_p12, %p9242_p7  ;;  %p8140_p8 = por %p8139_p3, %p8138_p6 }
  0x84   : > { %p8134_p2 = pneg %p8133_p13 }
  0x86   : > { %p8141_p0 = pnand %p8140_p8, %p8134_p2 }
  0x88   : > { %8144 = shalt.err (!%p8141_p0)
}
  0x89   : > { %s8408_s11 = smov 384   ;;  %s8409_s19 = smov 24  }
  0x8a   : > { %p9243_p5 = scmp.ne.s32.totalorder %s9229_s27, 0  ;;  %s6089_s29 = sshll.u32 %s8604_s17, 2 }
  0x8b   : > { %s8410_s2 = smov [#allocation12]   ;;  %s6796_s25 = sshll.u32 %s8393_s21, 6 }
  0x8c   : > { %6898 = dma.hbm_to_vmem [thread:$0]  (!%p9243_p5), %s9186_s6, 36864, %s369_s3, [#allocation8], %s8408_s11, %s8408_s11, %s8409_s19  }
  0x8d   : > { %s382_s12 = sshll.u32 %s8410_s2, 4  ;;  %s8145_s0 = scalar_lea.hbm %s9187_s7, 96  ;;  %s383_s12 = int_to_ptr.vmem [resolvable:$true] %s382_s12 }
  0x8e   : > { %p8146_p0 = scmp.ne.s32.totalorder %s9187_s7, %s8145_s0  ;;  %p8152_p9 = scmp.lt.u32.totalorder %s8145_s0, %s9187_s7 }
  0x90   : > { %p8148_p11 = pnand %p8146_p0, %p9242_p7 }
  0x92   : > { %p8149_p1 = pneg %p8148_p11 }
  0x94   : > { %p8154_p10 = pnand %p8152_p9, %p8149_p1 }
  0x96   : > { %8157 = shalt.err (!%p8154_p10)
}
  0x97   : > { %s8158_s3 = scalar_lea.vmem %s383_s12, 96  ;;  %p8166_p6 = scmp.lt.s32.totalorder %s383_s12, %s383_s12 }
  0x98   : > { %p8159_p12 = scmp.ne.s32.totalorder %s383_s12, %s8158_s3  ;;  %p8167_p3 = scmp.lt.s32.totalorder %s8158_s3, %s8158_s3 }
  0x9a   : > { %p8161_p13 = pnand %p8159_p12, %p9242_p7  ;;  %p8168_p8 = por %p8167_p3, %p8166_p6 }
  0x9c   : > { %p8162_p2 = pneg %p8161_p13 }
  0x9e   : > { %p8169_p4 = pnand %p8168_p8, %p8162_p2 }
  0xa0   : > { %8172 = shalt.err (!%p8169_p4)
}
  0xa1   : > { %6901 = dma.hbm_to_vmem [thread:$0]  (!%p9243_p5), %s9187_s7, 96, %s383_s12, [#allocation13]  }
  0xa2   : > { %s8694_s11 = scalar_lea.hbm %s9184_s4, %s6796_s25  ;;  %s448_s19 = scalar_lea.vmem [#allocation10], %s6089_s29 }
  0xa3   : > { %s456_s22 = sshll.u32 %s448_s19, 4  ;;  %s8173_s13 = scalar_lea.hbm %s8694_s11, 64  ;;  %s457_s22 = int_to_ptr.vmem [resolvable:$true] %s456_s22 }
  0xa4   : > { %p8174_p4 = scmp.ne.s32.totalorder %s8694_s11, %s8173_s13  ;;  %p9244_p0 = scmp.ne.s32.totalorder %s9241_s28, 0 }
  0xa5   : > { %s8178_s12 = scalar_lea.hbm %s9184_s4, 256  ;;  %p8179_p9 = scmp.lt.u32.totalorder %s8694_s11, %s9184_s4 }
  0xa6   : > { %p8176_p11 = pnand %p8174_p4, %p9244_p0  ;;  %p8180_p10 = scmp.lt.u32.totalorder %s8178_s12, %s8173_s13 }
  0xa7   : > { %p8182_p13 = scmp.lt.u32.totalorder %s8173_s13, %s8694_s11 }
  0xa8   : > { %p8177_p1 = pneg %p8176_p11  ;;  %p8181_p12 = por %p8180_p10, %p8179_p9 }
  0xaa   : > { %p8183_p2 = por %p8182_p13, %p8181_p12 }
  0xac   : > { %p8184_p6 = pnand %p8183_p2, %p8177_p1 }
  0xae   : > { %8187 = shalt.err (!%p8184_p6)
}
  0xaf   : > { %s8188_s29 = scalar_lea.vmem %s457_s22, 64  ;;  %s8411_s25 = smov [#allocation10]  }
  0xb0   : > { %p8189_p3 = scmp.ne.s32.totalorder %s457_s22, %s8188_s29  ;;  %s8193_s3 = sshll.u32 %s8411_s25, 4  ;;  %s8194_s3 = int_to_ptr.vmem [resolvable:$false] %s8193_s3 }
  0xb1   : > { %s8195_s30 = scalar_lea.vmem %s8194_s3, 128  ;;  %p8196_p11 = scmp.lt.s32.totalorder %s457_s22, %s8194_s3 }
  0xb2   : > { %p8191_p8 = pnand %p8189_p3, %p9244_p0  ;;  %p8197_p5 = scmp.lt.s32.totalorder %s8195_s30, %s8188_s29 }
  0xb4   : > { %p8192_p4 = pneg %p8191_p8  ;;  %p8198_p7 = por %p8197_p5, %p8196_p11 }
  0xb6   : > { %p8199_p9 = pnand %p8198_p7, %p8192_p4 }
  0xb8   : > { %8202 = shalt.err (!%p8199_p9)
}
  0xb9   : > { %p9245_p10 = scmp.ne.s32.totalorder %s9240_s20, 0  ;;  %s8412_s5 = smov [#allocation15]  }
  0xba   : > { %s395_s18 = sshll.u32 %s8412_s5, 4  ;;  %s8413_s14 = smov [#allocation16]   ;;  %s396_s18 = int_to_ptr.vmem [resolvable:$true] %s395_s18 }
  0xbb   : > { %6914 = dma.hbm_to_vmem [thread:$0]  (!%p9245_p10), %s8694_s11, 64, %s457_s22, %s8621_s1  }
  0xbc   : > { %s412_s19 = sshll.u32 %s8413_s14, 4  ;;  %s8203_s15 = scalar_lea.hbm %s9189_s9, 24576  ;;  %s413_s19 = int_to_ptr.vmem [resolvable:$true] %s412_s19 }
  0xbd   : > { %p8204_p7 = scmp.ne.s32.totalorder %s9189_s9, %s8203_s15  ;;  %p9246_p5 = scmp.ne.s32.totalorder %s9231_s16, 0 }
  0xbe   : > { %p8210_p13 = scmp.lt.u32.totalorder %s8203_s15, %s9189_s9 }
  0xbf   : > { %p8206_p1 = pnand %p8204_p7, %p9246_p5 }
  0xc1   : > { %p8207_p12 = pneg %p8206_p1 }
  0xc3   : > { %p8212_p2 = pnand %p8210_p13, %p8207_p12 }
  0xc5   : > { %8215 = shalt.err (!%p8212_p2)
}
  0xc6   : > { %s8216_s11 = scalar_lea.vmem %s396_s18, 24576  ;;  %p8224_p4 = scmp.lt.s32.totalorder %s396_s18, %s396_s18 }
  0xc7   : > { %p8217_p6 = scmp.ne.s32.totalorder %s396_s18, %s8216_s11  ;;  %p8225_p11 = scmp.lt.s32.totalorder %s8216_s11, %s8216_s11 }
  0xc9   : > { %p8219_p3 = pnand %p8217_p6, %p9246_p5  ;;  %p8226_p9 = por %p8225_p11, %p8224_p4 }
  0xcb   : > { %p8220_p8 = pneg %p8219_p3 }
  0xcd   : > { %p8227_p10 = pnand %p8226_p9, %p8220_p8 }
  0xcf   : > { %8230 = shalt.err (!%p8227_p10)
}
  0xd0   : > { %p9247_p7 = scmp.ne.s32.totalorder %s9229_s27, 0  ;;  %s9248_s22 = smov 16  }
  0xd1   : > { %s9249_s25 = smov 256   ;;  %s6092_s5 = sshll.u32 %s8604_s17, 10 }
  0xd2   : > { %6904 = dma.hbm_to_vmem [thread:$0]  (!%p9247_p7), %s9189_s9, 24576, %s396_s18, [#allocation8], %s9249_s25, %s9249_s25, %s9248_s22  }
  0xd3   : > { %s8231_s2 = scalar_lea.hbm %s9190_s10, 64 }
  0xd4   : > { %p8232_p10 = scmp.ne.s32.totalorder %s9190_s10, %s8231_s2  ;;  %p8238_p13 = scmp.lt.u32.totalorder %s8231_s2, %s9190_s10 }
  0xd6   : > { %p8234_p1 = pnand %p8232_p10, %p9246_p5 }
  0xd8   : > { %p8235_p12 = pneg %p8234_p1 }
  0xda   : > { %p8240_p2 = pnand %p8238_p13, %p8235_p12 }
  0xdc   : > { %8243 = shalt.err (!%p8240_p2)
}
  0xdd   : > { %s8244_s18 = scalar_lea.vmem %s413_s19, 64  ;;  %p8252_p4 = scmp.lt.s32.totalorder %s413_s19, %s413_s19 }
  0xde   : > { %p8245_p6 = scmp.ne.s32.totalorder %s413_s19, %s8244_s18  ;;  %p8253_p11 = scmp.lt.s32.totalorder %s8244_s18, %s8244_s18 }
  0xe0   : > { %p8247_p3 = pnand %p8245_p6, %p9246_p5  ;;  %p8254_p9 = por %p8253_p11, %p8252_p4 }
  0xe2   : > { %p8248_p8 = pneg %p8247_p3 }
  0xe4   : > { %p8255_p0 = pnand %p8254_p9, %p8248_p8 }
  0xe6   : > { %8258 = shalt.err (!%p8255_p0)
}
  0xe7   : > { %6907 = dma.hbm_to_vmem [thread:$0]  (!%p9247_p7), %s9190_s10, 64, %s413_s19, [#allocation13]  }
  0xe8   : > { %s6798_s11 = sshll.u32 %s8393_s21, 14  ;;  %s467_s14 = scalar_lea.vmem [#allocation14], %s6092_s5 }
  0xe9   : > { %s8758_s16 = scalar_lea.hbm %s9188_s8, %s6798_s11  ;;  %s477_s13 = sshll.u32 %s467_s14, 4  ;;  %s8760_s13 = int_to_ptr.vmem [resolvable:$true] %s477_s13 }
  0xea   : > { %s8259_s27 = scalar_lea.hbm %s8758_s16, 16384  ;;  %p9250_p5 = scmp.ne.s32.totalorder %s9241_s28, 0 }
  0xeb   : > { %p8260_p0 = scmp.ne.s32.totalorder %s8758_s16, %s8259_s27  ;;  %s8264_s15 = scalar_lea.hbm %s9188_s8, 65536 }
  0xec   : > { %p8265_p7 = scmp.lt.u32.totalorder %s8758_s16, %s9188_s8  ;;  %p8266_p12 = scmp.lt.u32.totalorder %s8264_s15, %s8259_s27 }
  0xed   : > { %p8262_p10 = pnand %p8260_p0, %p9250_p5  ;;  %p8268_p2 = scmp.lt.u32.totalorder %s8259_s27, %s8758_s16 }
  0xee   : > { %p8267_p13 = por %p8266_p12, %p8265_p7 }
  0xef   : > { %p8263_p1 = pneg %p8262_p10 }
  0xf0   : > { %p8269_p6 = por %p8268_p2, %p8267_p13 }
  0xf2   : > { %p8270_p3 = pnand %p8269_p6, %p8263_p1 }
  0xf4   : > { %8273 = shalt.err (!%p8270_p3)
}
  0xf5   : > { %s8274_s5 = scalar_lea.vmem %s8760_s13, 16384  ;;  %s8414_s0 = smov [#allocation14]  }
  0xf6   : > { %p8275_p8 = scmp.ne.s32.totalorder %s8760_s13, %s8274_s5  ;;  %s8279_s18 = sshll.u32 %s8414_s0, 4  ;;  %s8280_s18 = int_to_ptr.vmem [resolvable:$false] %s8279_s18 }
  0xf7   : > { %s8281_s17 = scalar_lea.vmem %s8280_s18, 32768  ;;  %p8282_p9 = scmp.lt.s32.totalorder %s8760_s13, %s8280_s18 }
  0xf8   : > { %p8277_p4 = pnand %p8275_p8, %p9250_p5  ;;  %p8283_p0 = scmp.lt.s32.totalorder %s8281_s17, %s8274_s5 }
  0xfa   : > { %p8278_p11 = pneg %p8277_p4  ;;  %p8284_p10 = por %p8283_p0, %p8282_p9 }
  0xfc   : > { %p8285_p7 = pnand %p8284_p10, %p8278_p11 }
  0xfe   : > { %8288 = shalt.err (!%p8285_p7)
}
  0xff   : > { %p9251_p1 = scmp.ne.s32.totalorder %s9240_s20, 0  ;;  %p9252_p5 = scmp.ne.s32.totalorder %s9228_s24, 0 }
 0x100   : > { %p9253_p12 = scmp.eq.s32.totalorder (!%p9252_p5), %s8511_s23, 0 }
 0x101   : > { %6917 = dma.hbm_to_vmem [thread:$0]  (!%p9251_p1), %s8758_s16, 16384, %s8760_s13, %s8621_s1, %s9249_s25, %s9249_s25, %s9248_s22  }
 0x102   : > { %489 = sbr.rel (%p9252_p5) target bundleno = 1695 (0x69f), region = 64 }
 0x109   : > { %8340 = dma.done.wait (%p9253_p12), [#allocation5], 768   ;;  %p9254_p13 = pmov %p9253_p12 }
 0x10a   : > { %p9255_p2 = pmov %p9253_p12 }
 0x10b   : > { %8342 = vsyncadd (%p9254_p13), [#allocation5], 4294966528 }
 0x10c   : > { %8344 = dma.done.wait (%p9255_p2), [#allocation8], 32   ;;  %p9256_p6 = pmov %p9255_p2 }
 0x10d   : > { %s9257_s20 = sld [smem:[#allocation27_spill]]  ;;  %s9258_s28 = sld [smem:[#allocation32_spill]] }
 0x10e   : > { %8346 = vsyncadd (%p9256_p6), [#allocation8], 4294967264  ;;  %s499_s29 = sand.u32 1, %s8511_s23  }
 0x10f   : > { %s500_s24 = scalar_lea.sflag [#allocation5], %s499_s29 }
 0x113   : > { %s501_s1 = sand.u32 1, %s9257_s20   ;;  %p9259_p3 = scmp.ne.s32.totalorder %s9258_s28, 0 }
 0x114   : > { %s6099_s22 = sshll.u32 %s501_s1, 9 }
 0x115   : > { %s8799_s25 = scalar_lea.vmem [#allocation9], %s6099_s22 }
 0x116   : > { %8348 = dma.done.wait (%p9259_p3), %s500_s24, 8256  }
 0x117   : > { %8350 = vsyncadd (%p9259_p3), %s500_s24, 4294959040  ;;  %s6100_s11 = sshll.u32 %s501_s1, 2  ;;  %p9260_p8 = pmov %p9255_p2 }
 0x118   : > { %s8805_s3 = scalar_lea.vmem [#allocation10], %s6100_s11 }
 0x119   : > { %8352 = dma.done.wait (%p9260_p8), [#allocation8], 36864   ;;  %p9261_p4 = pmov %p9255_p2 }
 0x11a   : > { %p9262_p11 = pmov %p9255_p2 }
 0x11b   : > { %8354 = vsyncadd (%p9261_p4), [#allocation8], 4294930432 }
 0x11c   : > { %8356 = dma.done.wait (%p9262_p11), [#allocation13], 96   ;;  %p9263_p9 = pmov %p9255_p2 }
 0x11d   : > { %s6103_s30 = sshll.u32 %s501_s1, 10 }
 0x11e   : > { %8358 = vsyncadd (%p9263_p9), [#allocation13], 4294967200  ;;  %s8815_s16 = scalar_lea.vmem [#allocation14], %s6103_s30 }
 0x11f   : > { %8360 = dma.done.wait (%p9259_p3), %s500_s24, 16384  }
 0x120   : > { %8362 = vsyncadd (%p9259_p3), %s500_s24, 4294950912  ;;  %p9264_p0 = pmov %p9255_p2 }
 0x122   : > { %8364 = dma.done.wait (%p9264_p0), [#allocation8], 24576   ;;  %p9265_p10 = pmov %p9264_p0 }
 0x123   : > { %p9266_p7 = pmov %p9264_p0 }
 0x124   : > { %8366 = vsyncadd (%p9265_p10), [#allocation8], 4294942720 }
 0x125   : > { %8368 = dma.done.wait (%p9266_p7), [#allocation13], 64   ;;  %p9267_p1 = pmov %p9264_p0 }
 0x126   : > { %s9268_s14 = sld [smem:[#allocation29_spill]] }
 0x127   : > { %8370 = vsyncadd (%p9267_p1), [#allocation13], 4294967232 }
 0x12c   : > { %p6106_p5 = scmp.ne.s32.totalorder %s9268_s14, 0 }
 0x12d   : > { %v6999_v0 = vld [vmem:[#allocation4 + $0x4] ss:$8 sps:$4 sm:$0xff] (!%p6106_p5)   ;;  %v7001_v1 = vld [vmem:[#allocation11 + $0x304] ss:$24 sps:$4 sm:$0xff] (!%p6106_p5)   ;;  %v8415_v2 = vmov (!%p6106_p5), 0   ;;  %s9269_s19 = sld [smem:[#allocation34_spill]] (!%p6106_p5)  ;;  %v605_v41 = vlaneseq (!%p6106_p5) }
 0x12e   : > { %592 = sbr.rel (%p6106_p5) target bundleno = 1085 (0x43d), region = 104  ;;  %694 = vmatprep.mubr.bf16.mxu0 (!%p6106_p5), %v8415_v2  ;;  %662 = vmatprep.subr.bf16.mxu0 (!%p6106_p5), %v6999_v0  ;;  %v7003_v3 = vld [vmem:[#allocation4] ss:$8 sps:$4 sm:$0xff] (!%p6106_p5)   ;;  %v7004_v4 = vld [vmem:[#allocation11 + $0x300] ss:$24 sps:$4 sm:$0xff] (!%p6106_p5)   ;;  %vm655_vm0 = vcmask (!%p6106_p5), 392192  }
 0x12f   : > { %2647 = vmatprep.subr.bf16.mxu1 (!%p6106_p5), %v7001_v1  ;;  %v7005_v5 = vld [vmem:[#allocation4 + $0x14] ss:$8 sps:$4 sm:$0xff] (!%p6106_p5)   ;;  %663 = vmatpush1.bf16.msra.mxu0 (!%p6106_p5), %v7003_v3  ;;  %v7007_v6 = vld [vmem:[#allocation11 + $0x334] ss:$24 sps:$4 sm:$0xff] (!%p6106_p5)   ;;  %v7010_v8 = vld [vmem:[#allocation11 + $0x330] ss:$24 sps:$4 sm:$0xff] (!%p6106_p5)  }
 0x130   : > { %2648 = vmatpush1.bf16.msra.mxu1 (!%p6106_p5), %v7004_v4  ;;  %v7009_v7 = vld [vmem:[#allocation4 + $0x10] ss:$8 sps:$4 sm:$0xff] (!%p6106_p5)   ;;  %664 = vmatprep.subr.bf16.mxu0 (!%p6106_p5), %v7005_v5  ;;  %v7011_v9 = vld [vmem:[#allocation4 + $0x24] ss:$8 sps:$4 sm:$0xff] (!%p6106_p5)   ;;  %v7015_v11 = vld [vmem:[#allocation4 + $0x20] ss:$8 sps:$4 sm:$0xff] (!%p6106_p5)  }
 0x131   : > { %2649 = vmatprep.subr.bf16.mxu1 (!%p6106_p5), %v7007_v6  ;;  %v7013_v10 = vld [vmem:[#allocation11 + $0x364] ss:$24 sps:$4 sm:$0xff] (!%p6106_p5)   ;;  %v7016_v12 = vld [vmem:[#allocation11 + $0x360] ss:$24 sps:$4 sm:$0xff] (!%p6106_p5)   ;;  %v7021_v16 = vld [vmem:[#allocation11 + $0x394] ss:$24 sps:$4 sm:$0xff] (!%p6106_p5)  }
 0x132   : > { %v7020_v14 = vld [vmem:[#allocation11 + $0x4] ss:$24 sps:$4 sm:$0xff] (!%p6106_p5)   ;;  %v7018_v15 = vld [vmem:[#allocation11] ss:$24 sps:$4 sm:$0xff] (!%p6106_p5)   ;;  %v7023_v17 = vld [vmem:[#allocation11 + $0x390] ss:$24 sps:$4 sm:$0xff] (!%p6106_p5)  }
 0x133   : > { %665 = vmatpush1.bf16.msra.mxu0 (!%p6106_p5), %v7009_v7  ;;  %s9270_s2 = smov (!%p6106_p5), %s9269_s19  ;;  %v7017_v13 = vld [vmem:[%s9269_s19] sm:$0xff] (!%p6106_p5)   ;;  %v7026_v18 = vld [vmem:[#allocation11 + $0x34] ss:$24 sps:$4 sm:$0xff] (!%p6106_p5)   ;;  %v7024_v20 = vld [vmem:[#allocation11 + $0x30] ss:$24 sps:$4 sm:$0xff] (!%p6106_p5)   ;;  %v8838_v48 = vshrl.u32 (!%p6106_p5), %v605_v41, 7 }
 0x134   : > { %2650 = vmatpush1.bf16.msra.mxu1 (!%p6106_p5), %v7010_v8  ;;  %666 = vmatprep.subr.bf16.mxu0 (!%p6106_p5), %v7011_v9  ;;  %v7027_v19 = vld [vmem:[#allocation11 + $0x3c4] ss:$24 sps:$4 sm:$0xff] (!%p6106_p5)   ;;  %v7029_v21 = vld [vmem:[#allocation11 + $0x3c0] ss:$24 sps:$4 sm:$0xff] (!%p6106_p5)   ;;  %v7034_v23 = vld [vmem:[#allocation11 + $0x3f4] ss:$24 sps:$4 sm:$0xff] (!%p6106_p5)  }
 0x135   : > { %2651 = vmatprep.subr.bf16.mxu1 %v7013_v10  ;;  %v7033_v22 = vld [vmem:[#allocation11 + $0x64] ss:$24 sps:$4 sm:$0xff]   ;;  %v7031_v25 = vld [vmem:[#allocation11 + $0x60] ss:$24 sps:$4 sm:$0xff]   ;;  %v7036_v26 = vld [vmem:[#allocation11 + $0x3f0] ss:$24 sps:$4 sm:$0xff]  }
 0x136   : > { %v7030_v24 = vld [vmem:[%s9270_s2 + $0x8] sm:$0xff]   ;;  %v7039_v27 = vld [vmem:[#allocation11 + $0x94] ss:$24 sps:$4 sm:$0xff]   ;;  %v8416_v42 = vmov 1966171168   ;;  %s9271_s0 = sld [smem:[#allocation38_spill]] }
 0x137   : > { %667 = vmatpush1.bf16.msra.mxu0 %v7015_v11  ;;  %v7040_v28 = vld [vmem:[#allocation11 + $0x424] ss:$24 sps:$4 sm:$0xff]   ;;  %v7037_v29 = vld [vmem:[#allocation11 + $0x90] ss:$24 sps:$4 sm:$0xff]   ;;  %v7042_v30 = vld [vmem:[#allocation11 + $0x420] ss:$24 sps:$4 sm:$0xff]   ;;  %v1115_v43 = vunpack.c.l.s4 %v8416_v42 }
 0x138   : > { %2652 = vmatpush1.bf16.msra.mxu1 %v7016_v12  ;;  %2606 = vmatprep.subr.bf16.mxu0 %v7020_v14  ;;  %v7045_v31 = vld [vmem:[#allocation11 + $0xc4] ss:$24 sps:$4 sm:$0xff]   ;;  %v7046_v32 = vld [vmem:[#allocation11 + $0x454] ss:$24 sps:$4 sm:$0xff]   ;;  %v7043_v33 = vld [vmem:[#allocation11 + $0xc0] ss:$24 sps:$4 sm:$0xff]  }
 0x139   : > { %2653 = vmatprep.subr.bf16.mxu1 %v7021_v16  ;;  %v7048_v34 = vld [vmem:[#allocation11 + $0x450] ss:$24 sps:$4 sm:$0xff]   ;;  %v7051_v35 = vld [vmem:[#allocation11 + $0xf4] ss:$24 sps:$4 sm:$0xff]   ;;  %v7052_v36 = vld [vmem:[#allocation11 + $0x484] ss:$24 sps:$4 sm:$0xff]   ;;  %v1116_v49 = vunpack.c.0.s8 %v1115_v43 }
 0x13a   : > { %6115 = vmatmul.mubr.msk.bf16.vlgmr.msra.gmra.mrb[0].mxu0 %vm655_vm0, %v7017_v13  ;;  %v7049_v37 = vld [vmem:[#allocation11 + $0xf0] ss:$24 sps:$4 sm:$0xff]   ;;  %v7054_v38 = vld [vmem:[#allocation11 + $0x480] ss:$24 sps:$4 sm:$0xff]   ;;  %v7057_v39 = vld [vmem:[#allocation11 + $0x124] ss:$24 sps:$4 sm:$0xff]  }
 0x13b   : > { %2607 = vmatpush1.bf16.msra.mxu0 %v7018_v15  ;;  %704 = vmatprep.mubr.bf16.mxu0 %v8415_v2  ;;  %v7058_v40 = vld [vmem:[#allocation11 + $0x4b4] ss:$24 sps:$4 sm:$0xff]   ;;  %v7055_v44 = vld [vmem:[#allocation11 + $0x120] ss:$24 sps:$4 sm:$0xff]   ;;  %v7060_v45 = vld [vmem:[#allocation11 + $0x4b0] ss:$24 sps:$4 sm:$0xff]   ;;  %v1119_v54 = vsub.s32 %v1116_v49, %v8838_v48 }
 0x13c   : > { %2654 = vmatpush1.bf16.msra.mxu1 %v7023_v17  ;;  %2608 = vmatprep.subr.bf16.mxu0 %v7026_v18  ;;  %v7063_v46 = vld [vmem:[#allocation11 + $0x154] ss:$24 sps:$4 sm:$0xff]   ;;  %v7064_v47 = vld [vmem:[#allocation11 + $0x4e4] ss:$24 sps:$4 sm:$0xff]   ;;  %v7061_v50 = vld [vmem:[#allocation11 + $0x150] ss:$24 sps:$4 sm:$0xff]  }
 0x13d   : > { %2655 = vmatprep.subr.bf16.mxu1 %v7027_v19  ;;  %v7066_v51 = vld [vmem:[#allocation11 + $0x4e0] ss:$24 sps:$4 sm:$0xff]   ;;  %v7069_v52 = vld [vmem:[#allocation11 + $0x184] ss:$24 sps:$4 sm:$0xff]   ;;  %v7070_v53 = vld [vmem:[#allocation11 + $0x514] ss:$24 sps:$4 sm:$0xff]  }
 0x13e   : > { %v7067_v55 = vld [vmem:[#allocation11 + $0x180] ss:$24 sps:$4 sm:$0xff]   ;;  %v7072_v56 = vld [vmem:[#allocation11 + $0x510] ss:$24 sps:$4 sm:$0xff]   ;;  %v7075_v57 = vld [vmem:[#allocation11 + $0x1b4] ss:$24 sps:$4 sm:$0xff]  }
 0x13f   : > { %2609 = vmatpush1.bf16.msra.mxu0 %v7024_v20  ;;  %v7076_v58 = vld [vmem:[#allocation11 + $0x544] ss:$24 sps:$4 sm:$0xff]   ;;  %v7073_v60 = vld [vmem:[#allocation11 + $0x1b0] ss:$24 sps:$4 sm:$0xff]   ;;  %v7078_v63 = vld [vmem:[#allocation11 + $0x540] ss:$24 sps:$4 sm:$0xff]  }
 0x140   : > { %2656 = vmatpush1.bf16.msra.mxu1 %v7029_v21  ;;  %2610 = vmatprep.subr.bf16.mxu0 %v7033_v22  ;;  %v791_v59 = vld [vmem:[%s9271_s0] sm:$0x3f]  ;;  %v7082_v1 = vld [vmem:[#allocation11 + $0x574] ss:$24 sps:$4 sm:$0xff]   ;;  %v7084_v7 = vld [vmem:[#allocation11 + $0x570] ss:$24 sps:$4 sm:$0xff]  }
 0x141   : > { %2657 = vmatprep.subr.bf16.mxu1 %v7034_v23  ;;  %v1120_v61 = vrot.slane %v791_v59, %v1119_v54  ;;  %v1113_v62 = vcombine.high %v791_v59, %v791_v59  ;;  %v7081_v0 = vld [vmem:[#allocation11 + $0x1e4] ss:$24 sps:$4 sm:$0xff]   ;;  %v7079_v4 = vld [vmem:[#allocation11 + $0x1e0] ss:$24 sps:$4 sm:$0xff]   ;;  %v7087_v8 = vld [vmem:[#allocation11 + $0x214] ss:$24 sps:$4 sm:$0xff]  }
 0x142   : > { %6116 = vmatmul.mubr.msk.bf16.gmra.mrb[4].mxu0 %vm655_vm0, %v7030_v24  ;;  %v7088_v9 = vld [vmem:[#allocation11 + $0x5a4] ss:$24 sps:$4 sm:$0xff]   ;;  %v7085_v11 = vld [vmem:[#allocation11 + $0x210] ss:$24 sps:$4 sm:$0xff]   ;;  %v7090_v12 = vld [vmem:[#allocation11 + $0x5a0] ss:$24 sps:$4 sm:$0xff]  }
 0x143   : > { %2611 = vmatpush1.bf16.msra.mxu0 %v7031_v25  ;;  %v1128_v2 = vcombine.high %v1120_v61, %v1120_v61  ;;  %v1127_v3 = vrot.slane %v1113_v62, %v1119_v54  ;;  %v7093_v13 = vld [vmem:[#allocation11 + $0x244] ss:$24 sps:$4 sm:$0xff]   ;;  %v7094_v14 = vld [vmem:[#allocation11 + $0x5d4] ss:$24 sps:$4 sm:$0xff]   ;;  %v7091_v15 = vld [vmem:[#allocation11 + $0x240] ss:$24 sps:$4 sm:$0xff]   ;;  %v8854_v16 = vrot.slane %v1120_v61, %v1119_v54 }
 0x144   : > { %2658 = vmatpush1.bf16.msra.mxu1 %v7036_v26  ;;  %2612 = vmatprep.subr.bf16.mxu0 %v7039_v27  ;;  %v7096_v17 = vld [vmem:[#allocation11 + $0x5d0] ss:$24 sps:$4 sm:$0xff]   ;;  %v7099_v18 = vld [vmem:[#allocation11 + $0x274] ss:$24 sps:$4 sm:$0xff]   ;;  %v7102_v19 = vld [vmem:[#allocation11 + $0x604] ss:$24 sps:$4 sm:$0xff]  }
 0x145   : > { %2659 = vmatprep.subr.bf16.mxu1 %v7040_v28  ;;  %v8844_v5 = vrot.slane %v1128_v2, %v1119_v54  ;;  %v8846_v6 = vrot.slane %v1127_v3, %v1119_v54  ;;  %v1129_v20 = vcombine.high %v1127_v3, %v1127_v3  ;;  %v7097_v21 = vld [vmem:[#allocation11 + $0x270] ss:$24 sps:$4 sm:$0xff]   ;;  %v8858_v22 = vcombine.high %v8854_v16, %v8854_v16  ;;  %v7100_v23 = vld [vmem:[#allocation11 + $0x600] ss:$24 sps:$4 sm:$0xff]   ;;  %v7105_v24 = vld [vmem:[#allocation11 + $0x2a4] ss:$24 sps:$4 sm:$0xff]  }
 0x146   : > { %v7108_v25 = vld [vmem:[#allocation11 + $0x634] ss:$24 sps:$4 sm:$0xff]   ;;  %v7103_v27 = vld [vmem:[#allocation11 + $0x2a0] ss:$24 sps:$4 sm:$0xff]   ;;  %v7106_v28 = vld [vmem:[#allocation11 + $0x630] ss:$24 sps:$4 sm:$0xff]  }
 0x147   : > { %2613 = vmatpush1.bf16.msra.mxu0 %v7037_v29  ;;  %v8850_v10 = vcombine.high %v8844_v5, %v8844_v5  ;;  %2638 = vmatprep.mubr.bf16.mxu0 %v8844_v5  ;;  %v8860_v26 = vrot.slane %v1129_v20, %v1119_v54  ;;  %v7111_v29 = vld [vmem:[#allocation11 + $0x2d4] ss:$24 sps:$4 sm:$0xff]   ;;  %v7127_v43 = vld [vmem:[#allocation11 + $0x6f0] ss:$24 sps:$4 sm:$0xff]   ;;  %v7147_v54 = vld [vmem:[#allocation11 + $0x784] ss:$24 sps:$4 sm:$0xff]  }
 0x148   : > { %2660 = vmatpush1.bf16.msra.mxu1 %v7042_v30  ;;  %2614 = vmatprep.subr.bf16.mxu0 %v7045_v31  ;;  %v7114_v30 = vld [vmem:[#allocation11 + $0x664] ss:$24 sps:$4 sm:$0xff]   ;;  %v7109_v31 = vld [vmem:[#allocation11 + $0x2d0] ss:$24 sps:$4 sm:$0xff]   ;;  %v7129_v41 = vld [vmem:[#allocation11 + $0x6f4] ss:$24 sps:$4 sm:$0xff]  }
 0x149   : > { %2661 = vmatprep.subr.bf16.mxu1 %v7046_v32  ;;  %2679 = vmatprep.mubr.bf16.mxu1 %v8850_v10  ;;  %v7112_v32 = vld [vmem:[#allocation11 + $0x660] ss:$24 sps:$4 sm:$0xff]   ;;  %v7132_v42 = vld [vmem:[#allocation11 + $0x6c] ss:$24 sps:$4 sm:$0xff]   ;;  %vm781_vm1 = vcmask 1041409   ;;  %vm783_vm2 = vcmask 1043459  }
 0x14a   : > { %v7136_v49 = vld [vmem:[#allocation11 + $0x98] ss:$24 sps:$4 sm:$0xff]   ;;  %v7156_v59 = vld [vmem:[#allocation11 + $0x12c] ss:$24 sps:$4 sm:$0xff]   ;;  %v7154_v61 = vld [vmem:[#allocation11 + $0x128] ss:$24 sps:$4 sm:$0xff]  }
 0x14b   : > { %2615 = vmatpush1.bf16.msra.mxu0 %v7043_v33  ;;  %v7117_v33 = vld [vmem:[#allocation11 + $0x694] ss:$24 sps:$4 sm:$0xff]   ;;  %v7159_v62 = vld [vmem:[#allocation11 + $0x7e4] ss:$24 sps:$4 sm:$0xff]   ;;  %v7181_v20 = vld [vmem:[#allocation11 + $0x8a0] ss:$24 sps:$4 sm:$0xff]  }
 0x14c   : > { %2662 = vmatpush1.bf16.msra.mxu1 %v7048_v34  ;;  %2616 = vmatprep.subr.bf16.mxu0 %v7051_v35  ;;  %v7120_v34 = vld [vmem:[#allocation11 + $0xc] ss:$24 sps:$4 sm:$0xff]   ;;  %v7115_v35 = vld [vmem:[#allocation11 + $0x690] ss:$24 sps:$4 sm:$0xff]   ;;  %vm785_vm3 = vcmask 1045509   ;;  %vm787_vm4 = vcmask 1047559  }
 0x14d   : > { %2663 = vmatprep.subr.bf16.mxu1 %v7052_v36  ;;  %v7118_v36 = vld [vmem:[#allocation11 + $0x8] ss:$24 sps:$4 sm:$0xff]   ;;  %v7165_v2 = vld [vmem:[#allocation11 + $0x814] ss:$24 sps:$4 sm:$0xff]  }
 0x14e   : > { %v7168_v3 = vld [vmem:[#allocation11 + $0x18c] ss:$24 sps:$4 sm:$0xff]  }
 0x14f   : > { %2617 = vmatpush1.bf16.msra.mxu0 %v7049_v37  ;;  %v7123_v37 = vld [vmem:[#allocation11 + $0x6c4] ss:$24 sps:$4 sm:$0xff]  }
 0x150   : > { %2664 = vmatpush1.bf16.msra.mxu1 %v7054_v38  ;;  %2618 = vmatprep.subr.bf16.mxu0 %v7057_v39  ;;  %v7126_v38 = vld [vmem:[#allocation11 + $0x3c] ss:$24 sps:$4 sm:$0xff]   ;;  %v7121_v39 = vld [vmem:[#allocation11 + $0x6c0] ss:$24 sps:$4 sm:$0xff]  }
 0x151   : > { %2665 = vmatprep.subr.bf16.mxu1 %v7058_v40  ;;  %v7124_v40 = vld [vmem:[#allocation11 + $0x38] ss:$24 sps:$4 sm:$0xff]  }
 0x153   : > { %2619 = vmatpush1.bf16.msra.mxu0 %v7055_v44  ;;  %v7130_v44 = vld [vmem:[#allocation11 + $0x68] ss:$24 sps:$4 sm:$0xff]  }
 0x154   : > { %2666 = vmatpush1.bf16.msra.mxu1 %v7060_v45  ;;  %2620 = vmatprep.subr.bf16.mxu0 %v7063_v46  ;;  %v7135_v45 = vld [vmem:[#allocation11 + $0x724] ss:$24 sps:$4 sm:$0xff]  }
 0x155   : > { %2667 = vmatprep.subr.bf16.mxu1 %v7064_v47  ;;  %v7138_v46 = vld [vmem:[#allocation11 + $0x9c] ss:$24 sps:$4 sm:$0xff]   ;;  %v7133_v47 = vld [vmem:[#allocation11 + $0x720] ss:$24 sps:$4 sm:$0xff]  }
 0x157   : > { %2621 = vmatpush1.bf16.msra.mxu0 %v7061_v50  ;;  %v7141_v50 = vld [vmem:[#allocation11 + $0x754] ss:$24 sps:$4 sm:$0xff]  }
 0x158   : > { %2668 = vmatpush1.bf16.msra.mxu1 %v7066_v51  ;;  %2622 = vmatprep.subr.bf16.mxu0 %v7069_v52  ;;  %v7144_v51 = vld [vmem:[#allocation11 + $0xcc] ss:$24 sps:$4 sm:$0xff]   ;;  %v7139_v52 = vld [vmem:[#allocation11 + $0x750] ss:$24 sps:$4 sm:$0xff]  }
 0x159   : > { %2669 = vmatprep.subr.bf16.mxu1 %v7070_v53  ;;  %v7142_v53 = vld [vmem:[#allocation11 + $0xc8] ss:$24 sps:$4 sm:$0xff]  }
 0x15b   : > { %2623 = vmatpush1.bf16.msra.mxu0 %v7067_v55  ;;  %v7150_v55 = vld [vmem:[#allocation11 + $0xfc] ss:$24 sps:$4 sm:$0xff]  }
 0x15c   : > { %2670 = vmatpush1.bf16.msra.mxu1 %v7072_v56  ;;  %2624 = vmatprep.subr.bf16.mxu0 %v7075_v57  ;;  %v7145_v56 = vld [vmem:[#allocation11 + $0x780] ss:$24 sps:$4 sm:$0xff]  }
 0x15d   : > { %2671 = vmatprep.subr.bf16.mxu1 %v7076_v58  ;;  %v7148_v57 = vld [vmem:[#allocation11 + $0xf8] ss:$24 sps:$4 sm:$0xff]   ;;  %v7153_v58 = vld [vmem:[#allocation11 + $0x7b4] ss:$24 sps:$4 sm:$0xff]  }
 0x15f   : > { %2625 = vmatpush1.bf16.msra.mxu0 %v7073_v60  ;;  %v7151_v60 = vld [vmem:[#allocation11 + $0x7b0] ss:$24 sps:$4 sm:$0xff]  }
 0x160   : > { %2672 = vmatpush1.bf16.msra.mxu1 %v7078_v63  ;;  %2626 = vmatprep.subr.bf16.mxu0 %v7081_v0  ;;  %v7162_v63 = vld [vmem:[#allocation11 + $0x15c] ss:$24 sps:$4 sm:$0xff]   ;;  %v7157_v0 = vld [vmem:[#allocation11 + $0x7e0] ss:$24 sps:$4 sm:$0xff]  }
 0x161   : > { %2673 = vmatprep.subr.bf16.mxu1 %v7082_v1  ;;  %v7160_v1 = vld [vmem:[#allocation11 + $0x158] ss:$24 sps:$4 sm:$0xff]  }
 0x163   : > { %2627 = vmatpush1.bf16.msra.mxu0 %v7079_v4  ;;  %v7163_v4 = vld [vmem:[#allocation11 + $0x810] ss:$24 sps:$4 sm:$0xff]  }
 0x164   : > { %2674 = vmatpush1.bf16.msra.mxu1 %v7084_v7  ;;  %2628 = vmatprep.subr.bf16.mxu0 %v7087_v8  ;;  %v7166_v7 = vld [vmem:[#allocation11 + $0x188] ss:$24 sps:$4 sm:$0xff]   ;;  %v7171_v8 = vld [vmem:[#allocation11 + $0x844] ss:$24 sps:$4 sm:$0xff]  }
 0x165   : > { %2675 = vmatprep.subr.bf16.mxu1 %v7088_v9  ;;  %v7174_v9 = vld [vmem:[#allocation11 + $0x1bc] ss:$24 sps:$4 sm:$0xff]  }
 0x167   : > { %2629 = vmatpush1.bf16.msra.mxu0 %v7085_v11  ;;  %v7169_v11 = vld [vmem:[#allocation11 + $0x840] ss:$24 sps:$4 sm:$0xff]  }
 0x168   : > { %2676 = vmatpush1.bf16.msra.mxu1 %v7090_v12  ;;  %2630 = vmatprep.subr.bf16.mxu0 %v7093_v13  ;;  %v7172_v12 = vld [vmem:[#allocation11 + $0x1b8] ss:$24 sps:$4 sm:$0xff]   ;;  %v7177_v13 = vld [vmem:[#allocation11 + $0x874] ss:$24 sps:$4 sm:$0xff]  }
 0x169   : > { %2677 = vmatprep.subr.bf16.mxu1 %v7094_v14  ;;  %v7180_v14 = vld [vmem:[#allocation11 + $0x1ec] ss:$24 sps:$4 sm:$0xff]  }
 0x16b   : > { %2631 = vmatpush1.bf16.msra.mxu0 %v7091_v15  ;;  %v7175_v15 = vld [vmem:[#allocation11 + $0x870] ss:$24 sps:$4 sm:$0xff]  }
 0x16c   : > { %2678 = vmatpush1.bf16.msra.mxu1 %v7096_v17  ;;  %2632 = vmatprep.subr.bf16.mxu0 %v7099_v18  ;;  %v7178_v17 = vld [vmem:[#allocation11 + $0x1e8] ss:$24 sps:$4 sm:$0xff]   ;;  %v7183_v18 = vld [vmem:[#allocation11 + $0x8a4] ss:$24 sps:$4 sm:$0xff]  }
 0x16d   : > { %2688 = vmatprep.subr.bf16.mxu1 %v7102_v19  ;;  %v7186_v19 = vld [vmem:[#allocation11 + $0x21c] ss:$24 sps:$4 sm:$0xff]  }
 0x16f   : > { %2680 = vmatmul.mubr.bf16.vlgmr.msra.gmra.mrb[0].mxu1 %v8858_v22  ;;  %2633 = vmatpush1.bf16.msra.mxu0 %v7097_v21  ;;  %v7184_v21 = vld [vmem:[#allocation11 + $0x218] ss:$24 sps:$4 sm:$0xff]  }
 0x170   : > { %2689 = vmatpush1.bf16.msra.mxu1 %v7100_v23  ;;  %2634 = vmatprep.subr.bf16.mxu0 %v7105_v24  ;;  %v7189_v23 = vld [vmem:[#allocation11 + $0x8d4] ss:$24 sps:$4 sm:$0xff]  }
 0x171   : > { %2690 = vmatprep.subr.bf16.mxu1 %v7108_v25  ;;  %2720 = vmatprep.mubr.bf16.mxu1 %v8860_v26  ;;  %v7192_v24 = vld [vmem:[#allocation11 + $0x24c] ss:$24 sps:$4 sm:$0xff]   ;;  %v7187_v25 = vld [vmem:[#allocation11 + $0x8d0] ss:$24 sps:$4 sm:$0xff]  }
 0x173   : > { %2635 = vmatpush1.bf16.msra.mxu0 %v7103_v27  ;;  %v7190_v27 = vld [vmem:[#allocation11 + $0x248] ss:$24 sps:$4 sm:$0xff]  }
 0x174   : > { %2691 = vmatpush1.bf16.msra.mxu1 %v7106_v28  ;;  %2636 = vmatprep.subr.bf16.mxu0 %v7111_v29  ;;  %v7196_v28 = vld [vmem:[#allocation11 + $0x27c] ss:$24 sps:$4 sm:$0xff]  }
 0x175   : > { %2692 = vmatprep.subr.bf16.mxu1 %v7114_v30  ;;  %v7199_v29 = vld [vmem:[#allocation11 + $0x14] ss:$24 sps:$4 sm:$0xff]   ;;  %v7194_v30 = vld [vmem:[#allocation11 + $0x278] ss:$24 sps:$4 sm:$0xff]  }
 0x177   : > { %2637 = vmatpush1.bf16.msra.mxu0 %v7109_v31  ;;  %v7197_v31 = vld [vmem:[#allocation11 + $0x10] ss:$24 sps:$4 sm:$0xff]  }
 0x178   : > { %2693 = vmatpush1.bf16.msra.mxu1 %v7112_v32  ;;  %2729 = vmatprep.subr.bf16.mxu0 %v7120_v34  ;;  %v7202_v32 = vld [vmem:[#allocation11 + $0x2ac] ss:$24 sps:$4 sm:$0xff]   ;;  %v7200_v34 = vld [vmem:[#allocation11 + $0x2a8] ss:$24 sps:$4 sm:$0xff]  }
 0x179   : > { %2694 = vmatprep.subr.bf16.mxu1 %v7117_v33  ;;  %v7205_v33 = vld [vmem:[#allocation11 + $0x44] ss:$24 sps:$4 sm:$0xff]  }
 0x17a   : > { %2639 = vmatmul.mubr.bf16.vlgmr.msra.gmra.mrb[8].mxu0 %v8854_v16 }
 0x17b   : > { %2730 = vmatpush1.bf16.msra.mxu0 %v7118_v36  ;;  %2761 = vmatprep.mubr.bf16.mxu0 %v8844_v5  ;;  %v7208_v36 = vld [vmem:[#allocation11 + $0x2dc] ss:$24 sps:$4 sm:$0xff]  }
 0x17c   : > { %2695 = vmatpush1.bf16.msra.mxu1 %v7115_v35  ;;  %2731 = vmatprep.subr.bf16.mxu0 %v7126_v38  ;;  %v7203_v35 = vld [vmem:[#allocation11 + $0x40] ss:$24 sps:$4 sm:$0xff]  }
 0x17d   : > { %2696 = vmatprep.subr.bf16.mxu1 %v7123_v37  ;;  %v7211_v37 = vld [vmem:[#allocation11 + $0x74] ss:$24 sps:$4 sm:$0xff]   ;;  %v7206_v38 = vld [vmem:[#allocation11 + $0x2d8] ss:$24 sps:$4 sm:$0xff]  }
 0x17f   : > { %2732 = vmatpush1.bf16.msra.mxu0 %v7124_v40  ;;  %v7214_v40 = vld [vmem:[#allocation11 + $0x30c] ss:$24 sps:$4 sm:$0xff]  }
 0x180   : > { %2697 = vmatpush1.bf16.msra.mxu1 %v7121_v39  ;;  %2733 = vmatprep.subr.bf16.mxu0 %v7132_v42  ;;  %v7209_v39 = vld [vmem:[#allocation11 + $0x70] ss:$24 sps:$4 sm:$0xff]  }
 0x181   : > { %2698 = vmatprep.subr.bf16.mxu1 %v7129_v41  ;;  %v7217_v41 = vld [vmem:[#allocation11 + $0xa4] ss:$24 sps:$4 sm:$0xff]   ;;  %v7212_v42 = vld [vmem:[#allocation11 + $0x308] ss:$24 sps:$4 sm:$0xff]  }
 0x183   : > { %2734 = vmatpush1.bf16.msra.mxu0 %v7130_v44  ;;  %v7220_v44 = vld [vmem:[#allocation11 + $0x33c] ss:$24 sps:$4 sm:$0xff]  }
 0x184   : > { %2699 = vmatpush1.bf16.msra.mxu1 %v7127_v43  ;;  %2735 = vmatprep.subr.bf16.mxu0 %v7138_v46  ;;  %v7215_v43 = vld [vmem:[#allocation11 + $0xa0] ss:$24 sps:$4 sm:$0xff]  }
 0x185   : > { %2700 = vmatprep.subr.bf16.mxu1 %v7135_v45  ;;  %v7223_v45 = vld [vmem:[#allocation11 + $0xd4] ss:$24 sps:$4 sm:$0xff]   ;;  %v7218_v46 = vld [vmem:[#allocation11 + $0x338] ss:$24 sps:$4 sm:$0xff]  }
 0x187   : > { %2736 = vmatpush1.bf16.msra.mxu0 %v7136_v49  ;;  %v7229_v49 = vld [vmem:[#allocation11 + $0x104] ss:$24 sps:$4 sm:$0xff]  }
 0x188   : > { %2701 = vmatpush1.bf16.msra.mxu1 %v7133_v47  ;;  %2737 = vmatprep.subr.bf16.mxu0 %v7144_v51  ;;  %v7226_v47 = vld [vmem:[#allocation11 + $0x36c] ss:$24 sps:$4 sm:$0xff]   ;;  %v7227_v51 = vld [vmem:[#allocation11 + $0x100] ss:$24 sps:$4 sm:$0xff]  }
 0x189   : > { %2702 = vmatprep.subr.bf16.mxu1 %v7141_v50  ;;  %v7224_v50 = vld [vmem:[#allocation11 + $0x368] ss:$24 sps:$4 sm:$0xff]  }
 0x18b   : > { %2738 = vmatpush1.bf16.msra.mxu0 %v7142_v53  ;;  %v7235_v53 = vld [vmem:[#allocation11 + $0x134] ss:$24 sps:$4 sm:$0xff]  }
 0x18c   : > { %2703 = vmatpush1.bf16.msra.mxu1 %v7139_v52  ;;  %2739 = vmatprep.subr.bf16.mxu0 %v7150_v55  ;;  %v7232_v52 = vld [vmem:[#allocation11 + $0x39c] ss:$24 sps:$4 sm:$0xff]   ;;  %v7233_v55 = vld [vmem:[#allocation11 + $0x130] ss:$24 sps:$4 sm:$0xff]  }
 0x18d   : > { %2704 = vmatprep.subr.bf16.mxu1 %v7147_v54  ;;  %v7230_v54 = vld [vmem:[#allocation11 + $0x398] ss:$24 sps:$4 sm:$0xff]  }
 0x18f   : > { %2740 = vmatpush1.bf16.msra.mxu0 %v7148_v57  ;;  %v7241_v57 = vld [vmem:[#allocation11 + $0x164] ss:$24 sps:$4 sm:$0xff]  }
 0x190   : > { %2705 = vmatpush1.bf16.msra.mxu1 %v7145_v56  ;;  %2741 = vmatprep.subr.bf16.mxu0 %v7156_v59  ;;  %v7238_v56 = vld [vmem:[#allocation11 + $0x3cc] ss:$24 sps:$4 sm:$0xff]   ;;  %v7239_v59 = vld [vmem:[#allocation11 + $0x160] ss:$24 sps:$4 sm:$0xff]  }
 0x191   : > { %2706 = vmatprep.subr.bf16.mxu1 %v7153_v58  ;;  %v7236_v58 = vld [vmem:[#allocation11 + $0x3c8] ss:$24 sps:$4 sm:$0xff]  }
 0x193   : > { %2742 = vmatpush1.bf16.msra.mxu0 %v7154_v61  ;;  %v7247_v61 = vld [vmem:[#allocation11 + $0x194] ss:$24 sps:$4 sm:$0xff]  }
 0x194   : > { %2707 = vmatpush1.bf16.msra.mxu1 %v7151_v60  ;;  %2743 = vmatprep.subr.bf16.mxu0 %v7162_v63  ;;  %v7244_v60 = vld [vmem:[#allocation11 + $0x3fc] ss:$24 sps:$4 sm:$0xff]   ;;  %v7245_v63 = vld [vmem:[#allocation11 + $0x190] ss:$24 sps:$4 sm:$0xff]  }
 0x195   : > { %2708 = vmatprep.subr.bf16.mxu1 %v7159_v62  ;;  %v7242_v62 = vld [vmem:[#allocation11 + $0x3f8] ss:$24 sps:$4 sm:$0xff]  }
 0x197   : > { %2744 = vmatpush1.bf16.msra.mxu0 %v7160_v1  ;;  %v7253_v1 = vld [vmem:[#allocation11 + $0x1c4] ss:$24 sps:$4 sm:$0xff]  }
 0x198   : > { %2709 = vmatpush1.bf16.msra.mxu1 %v7157_v0  ;;  %2745 = vmatprep.subr.bf16.mxu0 %v7168_v3  ;;  %v7250_v0 = vld [vmem:[#allocation11 + $0x42c] ss:$24 sps:$4 sm:$0xff]   ;;  %v7251_v3 = vld [vmem:[#allocation11 + $0x1c0] ss:$24 sps:$4 sm:$0xff]  }
 0x199   : > { %2710 = vmatprep.subr.bf16.mxu1 %v7165_v2  ;;  %v7248_v2 = vld [vmem:[#allocation11 + $0x428] ss:$24 sps:$4 sm:$0xff]  }
 0x19b   : > { %2746 = vmatpush1.bf16.msra.mxu0 %v7166_v7  ;;  %v7259_v7 = vld [vmem:[#allocation11 + $0x1f4] ss:$24 sps:$4 sm:$0xff]  }
 0x19c   : > { %2711 = vmatpush1.bf16.msra.mxu1 %v7163_v4  ;;  %2747 = vmatprep.subr.bf16.mxu0 %v7174_v9  ;;  %v7256_v4 = vld [vmem:[#allocation11 + $0x45c] ss:$24 sps:$4 sm:$0xff]   ;;  %v7257_v9 = vld [vmem:[#allocation11 + $0x1f0] ss:$24 sps:$4 sm:$0xff]  }
 0x19d   : > { %2712 = vmatprep.subr.bf16.mxu1 %v7171_v8  ;;  %v7254_v8 = vld [vmem:[#allocation11 + $0x458] ss:$24 sps:$4 sm:$0xff]  }
 0x19f   : > { %2748 = vmatpush1.bf16.msra.mxu0 %v7172_v12  ;;  %v7265_v12 = vld [vmem:[#allocation11 + $0x224] ss:$24 sps:$4 sm:$0xff]  }
 0x1a0   : > { %2713 = vmatpush1.bf16.msra.mxu1 %v7169_v11  ;;  %2749 = vmatprep.subr.bf16.mxu0 %v7180_v14  ;;  %v7262_v11 = vld [vmem:[#allocation11 + $0x48c] ss:$24 sps:$4 sm:$0xff]   ;;  %v7263_v14 = vld [vmem:[#allocation11 + $0x220] ss:$24 sps:$4 sm:$0xff]  }
 0x1a1   : > { %2714 = vmatprep.subr.bf16.mxu1 %v7177_v13  ;;  %v7260_v13 = vld [vmem:[#allocation11 + $0x488] ss:$24 sps:$4 sm:$0xff]  }
 0x1a3   : > { %2750 = vmatpush1.bf16.msra.mxu0 %v7178_v17  ;;  %v7271_v17 = vld [vmem:[#allocation11 + $0x254] ss:$24 sps:$4 sm:$0xff]  }
 0x1a4   : > { %2715 = vmatpush1.bf16.msra.mxu1 %v7175_v15  ;;  %2751 = vmatprep.subr.bf16.mxu0 %v7186_v19  ;;  %v7268_v15 = vld [vmem:[#allocation11 + $0x4bc] ss:$24 sps:$4 sm:$0xff]   ;;  %v7269_v19 = vld [vmem:[#allocation11 + $0x250] ss:$24 sps:$4 sm:$0xff]  }
 0x1a5   : > { %2716 = vmatprep.subr.bf16.mxu1 %v7183_v18  ;;  %v7266_v18 = vld [vmem:[#allocation11 + $0x4b8] ss:$24 sps:$4 sm:$0xff]  }
 0x1a7   : > { %2752 = vmatpush1.bf16.msra.mxu0 %v7184_v21  ;;  %v7277_v21 = vld [vmem:[#allocation11 + $0x284] ss:$24 sps:$4 sm:$0xff]  }
 0x1a8   : > { %2717 = vmatpush1.bf16.msra.mxu1 %v7181_v20  ;;  %2753 = vmatprep.subr.bf16.mxu0 %v7192_v24  ;;  %v7274_v20 = vld [vmem:[#allocation11 + $0x4ec] ss:$24 sps:$4 sm:$0xff]   ;;  %v7275_v24 = vld [vmem:[#allocation11 + $0x280] ss:$24 sps:$4 sm:$0xff]  }
 0x1a9   : > { %2718 = vmatprep.subr.bf16.mxu1 %v7189_v23  ;;  %v7272_v23 = vld [vmem:[#allocation11 + $0x4e8] ss:$24 sps:$4 sm:$0xff]  }
 0x1ab   : > { %2754 = vmatpush1.bf16.msra.mxu0 %v7190_v27  ;;  %v7283_v27 = vld [vmem:[#allocation11 + $0x2b4] ss:$24 sps:$4 sm:$0xff]  }
 0x1ac   : > { %2719 = vmatpush1.bf16.msra.mxu1 %v7187_v25  ;;  %2755 = vmatprep.subr.bf16.mxu0 %v7196_v28  ;;  %v7280_v25 = vld [vmem:[#allocation11 + $0x51c] ss:$24 sps:$4 sm:$0xff]   ;;  %v7278_v28 = vld [vmem:[#allocation11 + $0x518] ss:$24 sps:$4 sm:$0xff]  }
 0x1ad   : > { %2852 = vmatprep.subr.bf16.mxu1 %v7199_v29  ;;  %v7281_v29 = vld [vmem:[#allocation11 + $0x2b0] ss:$24 sps:$4 sm:$0xff]  }
 0x1af   : > { %2721 = vmatmul.mubr.bf16.vlgmr.msra.gmra.mrb[0].mxu1 %v8846_v6  ;;  %2756 = vmatpush1.bf16.msra.mxu0 %v7194_v30  ;;  %v7286_v30 = vld [vmem:[#allocation11 + $0x54c] ss:$24 sps:$4 sm:$0xff]  }
 0x1b0   : > { %2853 = vmatpush1.bf16.msra.mxu1 %v7197_v31  ;;  %2757 = vmatprep.subr.bf16.mxu0 %v7202_v32  ;;  %v7289_v31 = vld [vmem:[#allocation11 + $0x2e4] ss:$24 sps:$4 sm:$0xff]   ;;  %v7284_v32 = vld [vmem:[#allocation11 + $0x548] ss:$24 sps:$4 sm:$0xff]  }
 0x1b1   : > { %2854 = vmatprep.subr.bf16.mxu1 %v7205_v33  ;;  %2884 = vmatprep.mubr.bf16.mxu1 %v8844_v5  ;;  %v7221_v5 = vld [vmem:[#allocation11 + $0xd0] ss:$24 sps:$4 sm:$0xff]   ;;  %v7287_v33 = vld [vmem:[#allocation11 + $0x2e0] ss:$24 sps:$4 sm:$0xff]  }
 0x1b3   : > { %2758 = vmatpush1.bf16.msra.mxu0 %v7200_v34  ;;  %v7292_v34 = vld [vmem:[#allocation11 + $0x57c] ss:$24 sps:$4 sm:$0xff]  }
 0x1b4   : > { %2855 = vmatpush1.bf16.msra.mxu1 %v7203_v35  ;;  %2759 = vmatprep.subr.bf16.mxu0 %v7208_v36  ;;  %v7295_v35 = vld [vmem:[#allocation11 + $0x314] ss:$24 sps:$4 sm:$0xff]   ;;  %v7290_v36 = vld [vmem:[#allocation11 + $0x578] ss:$24 sps:$4 sm:$0xff]  }
 0x1b5   : > { %2856 = vmatprep.subr.bf16.mxu1 %v7211_v37  ;;  %v7293_v37 = vld [vmem:[#allocation11 + $0x310] ss:$24 sps:$4 sm:$0xff]  }
 0x1b7   : > { %2760 = vmatpush1.bf16.msra.mxu0 %v7206_v38  ;;  %v7298_v38 = vld [vmem:[#allocation11 + $0x5ac] ss:$24 sps:$4 sm:$0xff]  }
 0x1b8   : > { %2857 = vmatpush1.bf16.msra.mxu1 %v7209_v39  ;;  %2770 = vmatprep.subr.bf16.mxu0 %v7214_v40  ;;  %v7301_v39 = vld [vmem:[#allocation11 + $0x344] ss:$24 sps:$4 sm:$0xff]   ;;  %v7296_v40 = vld [vmem:[#allocation11 + $0x5a8] ss:$24 sps:$4 sm:$0xff]  }
 0x1b9   : > { %2858 = vmatprep.subr.bf16.mxu1 %v7217_v41  ;;  %v7299_v41 = vld [vmem:[#allocation11 + $0x340] ss:$24 sps:$4 sm:$0xff]  }
 0x1ba   : > { %2762 = vmatmul.mubr.bf16.vlgmr.msra.gmra.mrb[12].mxu0 %v8854_v16 }
 0x1bb   : > { %2771 = vmatpush1.bf16.msra.mxu0 %v7212_v42  ;;  %2802 = vmatprep.mubr.bf16.mxu0 %v8850_v10  ;;  %v7304_v42 = vld [vmem:[#allocation11 + $0x5dc] ss:$24 sps:$4 sm:$0xff]  }
 0x1bc   : > { %2859 = vmatpush1.bf16.msra.mxu1 %v7215_v43  ;;  %2772 = vmatprep.subr.bf16.mxu0 %v7220_v44  ;;  %v7307_v43 = vld [vmem:[#allocation11 + $0x374] ss:$24 sps:$4 sm:$0xff]   ;;  %v7302_v44 = vld [vmem:[#allocation11 + $0x5d8] ss:$24 sps:$4 sm:$0xff]  }
 0x1bd   : > { %2860 = vmatprep.subr.bf16.mxu1 %v7223_v45  ;;  %v7305_v45 = vld [vmem:[#allocation11 + $0x370] ss:$24 sps:$4 sm:$0xff]  }
 0x1bf   : > { %2773 = vmatpush1.bf16.msra.mxu0 %v7218_v46  ;;  %v7310_v46 = vld [vmem:[#allocation11 + $0x60c] ss:$24 sps:$4 sm:$0xff]  }
 0x1c0   : > { %2861 = vmatpush1.bf16.msra.mxu1 %v7221_v5  ;;  %2774 = vmatprep.subr.bf16.mxu0 %v7226_v47  ;;  %v7313_v5 = vld [vmem:[#allocation11 + $0x3a4] ss:$24 sps:$4 sm:$0xff]   ;;  %v7308_v47 = vld [vmem:[#allocation11 + $0x608] ss:$24 sps:$4 sm:$0xff]  }
 0x1c1   : > { %2862 = vmatprep.subr.bf16.mxu1 %v7229_v49  ;;  %v7316_v49 = vld [vmem:[#allocation11 + $0x63c] ss:$24 sps:$4 sm:$0xff]  }
 0x1c3   : > { %2775 = vmatpush1.bf16.msra.mxu0 %v7224_v50  ;;  %v7319_v50 = vld [vmem:[#allocation11 + $0x3d4] ss:$24 sps:$4 sm:$0xff]  }
 0x1c4   : > { %2863 = vmatpush1.bf16.msra.mxu1 %v7227_v51  ;;  %2776 = vmatprep.subr.bf16.mxu0 %v7232_v52  ;;  %v7314_v51 = vld [vmem:[#allocation11 + $0x638] ss:$24 sps:$4 sm:$0xff]   ;;  %v7322_v52 = vld [vmem:[#allocation11 + $0x66c] ss:$24 sps:$4 sm:$0xff]  }
 0x1c5   : > { %2864 = vmatprep.subr.bf16.mxu1 %v7235_v53  ;;  %v7325_v53 = vld [vmem:[#allocation11 + $0x404] ss:$24 sps:$4 sm:$0xff]  }
 0x1c7   : > { %2777 = vmatpush1.bf16.msra.mxu0 %v7230_v54  ;;  %v7320_v54 = vld [vmem:[#allocation11 + $0x668] ss:$24 sps:$4 sm:$0xff]  }
 0x1c8   : > { %2865 = vmatpush1.bf16.msra.mxu1 %v7233_v55  ;;  %2778 = vmatprep.subr.bf16.mxu0 %v7238_v56  ;;  %v7323_v55 = vld [vmem:[#allocation11 + $0x400] ss:$24 sps:$4 sm:$0xff]   ;;  %v7328_v56 = vld [vmem:[#allocation11 + $0x69c] ss:$24 sps:$4 sm:$0xff]  }
 0x1c9   : > { %2866 = vmatprep.subr.bf16.mxu1 %v7241_v57  ;;  %v7331_v57 = vld [vmem:[#allocation11 + $0x434] ss:$24 sps:$4 sm:$0xff]  }
 0x1cb   : > { %2779 = vmatpush1.bf16.msra.mxu0 %v7236_v58  ;;  %v7326_v58 = vld [vmem:[#allocation11 + $0x698] ss:$24 sps:$4 sm:$0xff]  }
 0x1cc   : > { %2867 = vmatpush1.bf16.msra.mxu1 %v7239_v59  ;;  %2780 = vmatprep.subr.bf16.mxu0 %v7244_v60  ;;  %v7329_v59 = vld [vmem:[#allocation11 + $0x430] ss:$24 sps:$4 sm:$0xff]   ;;  %v7334_v60 = vld [vmem:[#allocation11 + $0x6cc] ss:$24 sps:$4 sm:$0xff]  }
 0x1cd   : > { %2868 = vmatprep.subr.bf16.mxu1 %v7247_v61  ;;  %v7337_v61 = vld [vmem:[#allocation11 + $0x464] ss:$24 sps:$4 sm:$0xff]  }
 0x1cf   : > { %2781 = vmatpush1.bf16.msra.mxu0 %v7242_v62  ;;  %v7332_v62 = vld [vmem:[#allocation11 + $0x6c8] ss:$24 sps:$4 sm:$0xff]  }
 0x1d0   : > { %2869 = vmatpush1.bf16.msra.mxu1 %v7245_v63  ;;  %2782 = vmatprep.subr.bf16.mxu0 %v7250_v0  ;;  %v7335_v63 = vld [vmem:[#allocation11 + $0x460] ss:$24 sps:$4 sm:$0xff]   ;;  %v8875_v0 = vsub.s32 0, %v8838_v48 }
 0x1d1   : > { %2870 = vmatprep.subr.bf16.mxu1 %v7253_v1  ;;  %v603_v1 = vld [vmem:[#allocation7] sm:$0x3] }
 0x1d3   : > { %2783 = vmatpush1.bf16.msra.mxu0 %v7248_v2  ;;  %v8878_v2 = vsub.s32 1, %v8838_v48 }
 0x1d4   : > { %2871 = vmatpush1.bf16.msra.mxu1 %v7251_v3  ;;  %2784 = vmatprep.subr.bf16.mxu0 %v7256_v4  ;;  %v7340_v3 = vld [vmem:[#allocation11 + $0x6fc] ss:$24 sps:$4 sm:$0xff]  }
 0x1d5   : > { %2872 = vmatprep.subr.bf16.mxu1 %v7259_v7  ;;  %v7343_v4 = vld [vmem:[#allocation11 + $0x494] ss:$24 sps:$4 sm:$0xff]   ;;  %v608_v7 = vrot.slane %v603_v1, %v8875_v0 }
 0x1d7   : > { %2785 = vmatpush1.bf16.msra.mxu0 %v7254_v8  ;;  %v7338_v8 = vld [vmem:[#allocation11 + $0x6f8] ss:$24 sps:$4 sm:$0xff]  }
 0x1d8   : > { %2873 = vmatpush1.bf16.msra.mxu1 %v7257_v9  ;;  %2786 = vmatprep.subr.bf16.mxu0 %v7262_v11  ;;  %v612_v9 = vrot.slane %v603_v1, %v8878_v2  ;;  %v7341_v11 = vld [vmem:[#allocation11 + $0x490] ss:$24 sps:$4 sm:$0xff]  }
 0x1d9   : > { %2874 = vmatprep.subr.bf16.mxu1 %v7265_v12  ;;  %v7346_v12 = vld [vmem:[#allocation11 + $0x72c] ss:$24 sps:$4 sm:$0xff]  }
 0x1db   : > { %2787 = vmatpush1.bf16.msra.mxu0 %v7260_v13  ;;  %v7349_v13 = vld [vmem:[#allocation11 + $0x4c4] ss:$24 sps:$4 sm:$0xff]  }
 0x1dc   : > { %2875 = vmatpush1.bf16.msra.mxu1 %v7263_v14  ;;  %2788 = vmatprep.subr.bf16.mxu0 %v7268_v15 }
 0x1dd   : > { %2876 = vmatprep.subr.bf16.mxu1 %v7271_v17 }
 0x1df   : > { %2789 = vmatpush1.bf16.msra.mxu0 %v7266_v18  ;;  %v7344_v18 = vld [vmem:[#allocation11 + $0x728] ss:$24 sps:$4 sm:$0xff]  }
 0x1e0   : > { %2877 = vmatpush1.bf16.msra.mxu1 %v7269_v19  ;;  %2790 = vmatprep.subr.bf16.mxu0 %v7274_v20 }
 0x1e1   : > { %2878 = vmatprep.subr.bf16.mxu1 %v7277_v21  ;;  %v7347_v21 = vld [vmem:[#allocation11 + $0x4c0] ss:$24 sps:$4 sm:$0xff]  }
 0x1e3   : > { %2791 = vmatpush1.bf16.msra.mxu0 %v7272_v23 }
 0x1e4   : > { %2879 = vmatpush1.bf16.msra.mxu1 %v7275_v24  ;;  %2792 = vmatprep.subr.bf16.mxu0 %v7280_v25 }
 0x1e5   : > { %2880 = vmatprep.subr.bf16.mxu1 %v7283_v27  ;;  %v7352_v27 = vld [vmem:[#allocation11 + $0x75c] ss:$24 sps:$4 sm:$0xff]  }
 0x1e7   : > { %2793 = vmatpush1.bf16.msra.mxu0 %v7278_v28  ;;  %v7355_v28 = vld [vmem:[#allocation11 + $0x4f4] ss:$24 sps:$4 sm:$0xff]  }
 0x1e8   : > { %2881 = vmatpush1.bf16.msra.mxu1 %v7281_v29  ;;  %2794 = vmatprep.subr.bf16.mxu0 %v7286_v30 }
 0x1e9   : > { %2882 = vmatprep.subr.bf16.mxu1 %v7289_v31  ;;  %v7350_v31 = vld [vmem:[#allocation11 + $0x758] ss:$24 sps:$4 sm:$0xff]  }
 0x1eb   : > { %2795 = vmatpush1.bf16.msra.mxu0 %v7284_v32 }
 0x1ec   : > { %2883 = vmatpush1.bf16.msra.mxu1 %v7287_v33  ;;  %2796 = vmatprep.subr.bf16.mxu0 %v7292_v34  ;;  %v7353_v34 = vld [vmem:[#allocation11 + $0x4f0] ss:$24 sps:$4 sm:$0xff]  }
 0x1ed   : > { %2893 = vmatprep.subr.bf16.mxu1 %v7295_v35 }
 0x1ef   : > { %2885 = vmatmul.mubr.bf16.vlgmr.msra.gmra.mrb[4].mxu1 %v8854_v16  ;;  %2797 = vmatpush1.bf16.msra.mxu0 %v7290_v36  ;;  %v7311_v16 = vld [vmem:[#allocation11 + $0x3a0] ss:$24 sps:$4 sm:$0xff]   ;;  %v7358_v36 = vld [vmem:[#allocation11 + $0x78c] ss:$24 sps:$4 sm:$0xff]  }
 0x1f0   : > { %2894 = vmatpush1.bf16.msra.mxu1 %v7293_v37  ;;  %2798 = vmatprep.subr.bf16.mxu0 %v7298_v38  ;;  %v7361_v37 = vld [vmem:[#allocation11 + $0x524] ss:$24 sps:$4 sm:$0xff]  }
 0x1f1   : > { %2895 = vmatprep.subr.bf16.mxu1 %v7301_v39  ;;  %2925 = vmatprep.mubr.bf16.mxu1 %v8850_v10  ;;  %v7317_v10 = vld [vmem:[#allocation11 + $0x3d0] ss:$24 sps:$4 sm:$0xff]  }
 0x1f3   : > { %2799 = vmatpush1.bf16.msra.mxu0 %v7296_v40  ;;  %v7356_v40 = vld [vmem:[#allocation11 + $0x788] ss:$24 sps:$4 sm:$0xff]  }
 0x1f4   : > { %2896 = vmatpush1.bf16.msra.mxu1 %v7299_v41  ;;  %2800 = vmatprep.subr.bf16.mxu0 %v7304_v42 }
 0x1f5   : > { %2897 = vmatprep.subr.bf16.mxu1 %v7307_v43 }
 0x1f7   : > { %2801 = vmatpush1.bf16.msra.mxu0 %v7302_v44  ;;  %v7359_v44 = vld [vmem:[#allocation11 + $0x520] ss:$24 sps:$4 sm:$0xff]  }
 0x1f8   : > { %2898 = vmatpush1.bf16.msra.mxu1 %v7305_v45  ;;  %2811 = vmatprep.subr.bf16.mxu0 %v7310_v46 }
 0x1f9   : > { %2899 = vmatprep.subr.bf16.mxu1 %v7313_v5 }
 0x1fa   : > { %2803 = vmatmul.mubr.bf16.vlgmr.msra.gmra.mrb[12].mxu0 %v8858_v22 }
 0x1fb   : > { %2812 = vmatpush1.bf16.msra.mxu0 %v7308_v47  ;;  %2843 = vmatprep.mubr.bf16.mxu0 %v8860_v26  ;;  %v7364_v47 = vld [vmem:[#allocation11 + $0x7bc] ss:$24 sps:$4 sm:$0xff]  }
 0x1fc   : > { %2900 = vmatpush1.bf16.msra.mxu1 %v7311_v16  ;;  %2813 = vmatprep.subr.bf16.mxu0 %v7316_v49  ;;  %v7367_v16 = vld [vmem:[#allocation11 + $0x554] ss:$24 sps:$4 sm:$0xff]  }
 0x1fd   : > { %2901 = vmatprep.subr.bf16.mxu1 %v7319_v50 }
 0x1ff   : > { %2814 = vmatpush1.bf16.msra.mxu0 %v7314_v51 }
 0x200   : > { %2902 = vmatpush1.bf16.msra.mxu1 %v7317_v10  ;;  %2815 = vmatprep.subr.bf16.mxu0 %v7322_v52 }
 0x201   : > { %2903 = vmatprep.subr.bf16.mxu1 %v7325_v53 }
 0x203   : > { %2816 = vmatpush1.bf16.msra.mxu0 %v7320_v54 }
 0x204   : > { %2904 = vmatpush1.bf16.msra.mxu1 %v7323_v55  ;;  %2817 = vmatprep.subr.bf16.mxu0 %v7328_v56  ;;  %v7362_v55 = vld [vmem:[#allocation11 + $0x7b8] ss:$24 sps:$4 sm:$0xff]  }
 0x205   : > { %2905 = vmatprep.subr.bf16.mxu1 %v7331_v57  ;;  %v7365_v56 = vld [vmem:[#allocation11 + $0x550] ss:$24 sps:$4 sm:$0xff]  }
 0x207   : > { %2818 = vmatpush1.bf16.msra.mxu0 %v7326_v58 }
 0x208   : > { %2906 = vmatpush1.bf16.msra.mxu1 %v7329_v59  ;;  %2819 = vmatprep.subr.bf16.mxu0 %v7334_v60 }
 0x209   : > { %2907 = vmatprep.subr.bf16.mxu1 %v7337_v61  ;;  %v7370_v61 = vld [vmem:[#allocation11 + $0x7ec] ss:$24 sps:$4 sm:$0xff]  }
 0x20b   : > { %2820 = vmatpush1.bf16.msra.mxu0 %v7332_v62  ;;  %v7373_v62 = vld [vmem:[#allocation11 + $0x584] ss:$24 sps:$4 sm:$0xff]  }
 0x20c   : > { %2908 = vmatpush1.bf16.msra.mxu1 %v7335_v63  ;;  %2821 = vmatprep.subr.bf16.mxu0 %v7340_v3 }
 0x20d   : > { %2909 = vmatprep.subr.bf16.mxu1 %v7343_v4  ;;  %v696_v14 = vpop.f32.mrb[0].mxu0 }
 0x20e   : > { %v697_v15 = vadd.f32 %v696_v14, %v608_v7  ;;  %v698_v17 = vpop.f32.mrb[1].mxu0  ;;  %v7376_v14 = vld [vmem:[#allocation11 + $0x81c] ss:$24 sps:$4 sm:$0xff]  }
 0x20f   : > { %v699_v19 = vadd.f32 %v698_v17, %v612_v9  ;;  %v700_v20 = vpop.f32.mrb[2].mxu0  ;;  %2822 = vmatpush1.bf16.msra.mxu0 %v7338_v8  ;;  %v7371_v8 = vld [vmem:[#allocation11 + $0x580] ss:$24 sps:$4 sm:$0xff]  }
 0x210   : > { %2910 = vmatpush1.bf16.msra.mxu1 %v7341_v11  ;;  %v715_v23 = vmax.f32 %v697_v15, 0.0  ;;  %v701_v24 = vadd.f32 %v700_v20, %v608_v7  ;;  %v702_v25 = vpop.f32.mrb[3].mxu0  ;;  %2823 = vmatprep.subr.bf16.mxu0 %v7346_v12  ;;  %v7379_v15 = vld [vmem:[#allocation11 + $0x5b4] ss:$24 sps:$4 sm:$0xff]  }
 0x211   : > { %2911 = vmatprep.subr.bf16.mxu1 %v7349_v13  ;;  %v703_v29 = vadd.f32 %v702_v25, %v612_v9  ;;  %v716_v32 = vmax.f32 %v699_v19, 0.0 }
 0x212   : > { %v717_v30 = vmax.f32 %v701_v24, 0.0 }
 0x213   : > { %v718_v33 = vmax.f32 %v703_v29, 0.0  ;;  %2824 = vmatpush1.bf16.msra.mxu0 %v7344_v18  ;;  %v7382_v29 = vld [vmem:[#allocation11 + $0x84c] ss:$24 sps:$4 sm:$0xff]  }
 0x214   : > { %2912 = vmatpush1.bf16.msra.mxu1 %v7347_v21  ;;  %v723_v35 = vadd.f32 %v717_v30, %v715_v23  ;;  %2825 = vmatprep.subr.bf16.mxu0 %v7352_v27  ;;  %v7374_v21 = vld [vmem:[#allocation11 + $0x818] ss:$24 sps:$4 sm:$0xff]   ;;  %v7385_v30 = vld [vmem:[#allocation11 + $0x5e4] ss:$24 sps:$4 sm:$0xff]  }
 0x215   : > { %2913 = vmatprep.subr.bf16.mxu1 %v7355_v28  ;;  %v730_v38 = vadd.f32 %v718_v33, %v716_v32  ;;  %v706_v39 = vpop.f32.mrb[4].mxu0  ;;  %v7377_v23 = vld [vmem:[#allocation11 + $0x5b0] ss:$24 sps:$4 sm:$0xff]  }
 0x216   : > { %v724_v41 = vrot.slane %v723_v35, 4  ;;  %v707_v42 = vadd.f32 %v706_v39, %v608_v7  ;;  %v708_v43 = vpop.f32.mrb[5].mxu0 }
 0x217   : > { %v731_v45 = vrot.slane %v730_v38, 4  ;;  %v709_v46 = vadd.f32 %v708_v43, %v612_v9  ;;  %v710_v5 = vpop.f32.mrb[6].mxu0  ;;  %2826 = vmatpush1.bf16.msra.mxu0 %v7350_v31 }
 0x218   : > { %2914 = vmatpush1.bf16.msra.mxu1 %v7353_v34  ;;  %v725_v49 = vadd.f32 %v724_v41, %v723_v35  ;;  %v719_v50 = vmax.f32 %v707_v42, 0.0  ;;  %v711_v51 = vadd.f32 %v710_v5, %v608_v7  ;;  %v712_v10 = vpop.f32.mrb[7].mxu0  ;;  %2827 = vmatprep.subr.bf16.mxu0 %v7358_v36  ;;  %v7368_v7 = vld [vmem:[#allocation11 + $0x7e8] ss:$24 sps:$4 sm:$0xff]   ;;  %v8417_v36 = vmov 1983009808  }
 0x219   : > { %2915 = vmatprep.subr.bf16.mxu1 %v7361_v37  ;;  %v732_v52 = vadd.f32 %v731_v45, %v730_v38  ;;  %v720_v53 = vmax.f32 %v709_v46, 0.0  ;;  %v713_v54 = vadd.f32 %v712_v10, %v612_v9  ;;  %v7380_v34 = vld [vmem:[#allocation11 + $0x848] ss:$24 sps:$4 sm:$0xff]   ;;  %v762_v37 = vunpack.c.l.s4 %v8417_v36  ;;  %v7391_v41 = vld [vmem:[#allocation11 + $0x614] ss:$24 sps:$4 sm:$0xff]  }
 0x21a   : > { %v726_v57 = vrot.slane %v725_v49, 2  ;;  %v721_v58 = vmax.f32 %v711_v51, 0.0  ;;  %v7383_v35 = vld [vmem:[#allocation11 + $0x5e0] ss:$24 sps:$4 sm:$0xff]   ;;  %v7389_v45 = vld [vmem:[#allocation11 + $0x610] ss:$24 sps:$4 sm:$0xff]  }
 0x21b   : > { %v733_v59 = vrot.slane %v732_v52, 2  ;;  %v722_v60 = vmax.f32 %v713_v54, 0.0  ;;  %2828 = vmatpush1.bf16.msra.mxu0 %v7356_v40  ;;  %v7388_v40 = vld [vmem:[#allocation11 + $0x87c] ss:$24 sps:$4 sm:$0xff]   ;;  %v763_v46 = vunpack.c.0.s8 %v762_v37  ;;  %v7392_v10 = vld [vmem:[#allocation11 + $0x8a8] ss:$24 sps:$4 sm:$0xff]  }
 0x21c   : > { %2916 = vmatpush1.bf16.msra.mxu1 %v7359_v44  ;;  %v727_v63 = vadd.f32 %v726_v57, %v725_v49  ;;  %v737_v1 = vadd.f32 %v721_v58, %v719_v50  ;;  %2829 = vmatprep.subr.bf16.mxu0 %v7364_v47  ;;  %v7386_v44 = vld [vmem:[#allocation11 + $0x878] ss:$24 sps:$4 sm:$0xff]   ;;  %v7394_v47 = vld [vmem:[#allocation11 + $0x8ac] ss:$24 sps:$4 sm:$0xff]   ;;  %v7400_v54 = vld [vmem:[#allocation11 + $0x8dc] ss:$24 sps:$4 sm:$0xff]  }
 0x21d   : > { %2917 = vmatprep.subr.bf16.mxu1 %v7367_v16  ;;  %v734_v3 = vadd.f32 %v733_v59, %v732_v52  ;;  %v744_v4 = vadd.f32 %v722_v60, %v720_v53  ;;  %v7397_v16 = vld [vmem:[#allocation11 + $0x644] ss:$24 sps:$4 sm:$0xff]   ;;  %v8883_v51 = vsub.s32 %v763_v46, %v8838_v48  ;;  %v7395_v52 = vld [vmem:[#allocation11 + $0x640] ss:$24 sps:$4 sm:$0xff]   ;;  %v7401_v58 = vld [vmem:[#allocation11 + $0x670] ss:$24 sps:$4 sm:$0xff]  }
 0x21e   : > { %v728_v11 = vrot.slane %v727_v63, 1  ;;  %v738_v9 = vrot.slane %v737_v1, 4  ;;  %v7406_v59 = vld [vmem:[#allocation11 + $0x6a4] ss:$24 sps:$4 sm:$0xff]  }
 0x21f   : > { %v735_v12 = vrot.slane %v734_v3, 1  ;;  %v745_v13 = vrot.slane %v744_v4, 4  ;;  %2830 = vmatpush1.bf16.msra.mxu0 %v7362_v55  ;;  %v7403_v55 = vld [vmem:[#allocation11 + $0x674] ss:$24 sps:$4 sm:$0xff]  }
 0x220   : > { %2918 = vmatpush1.bf16.msra.mxu1 %v7365_v56  ;;  %v729_v17 = vadd.f32 %v728_v11, %v727_v63  ;;  %v739_v18 = vadd.f32 %v738_v9, %v737_v1  ;;  %2831 = vmatprep.subr.bf16.mxu0 %v7370_v61  ;;  %v7427_v61 = vld [vmem:[#allocation15 + $0x4] ss:$16 sps:$4 sm:$0xff]   ;;  %v7431_v9 = vld [vmem:[#allocation15 + $0x20] ss:$16 sps:$4 sm:$0xff]  }
 0x221   : > { %2919 = vmatprep.subr.bf16.mxu1 %v7373_v62  ;;  %v736_v19 = vadd.f32 %v735_v12, %v734_v3  ;;  %v746_v20 = vadd.f32 %v745_v13, %v744_v4  ;;  %v7409_v3 = vld [vmem:[#allocation11 + $0x6d4] ss:$24 sps:$4 sm:$0xff]   ;;  %v7412_v11 = vld [vmem:[#allocation11 + $0x704] ss:$24 sps:$4 sm:$0xff]   ;;  %v7410_v13 = vld [vmem:[#allocation11 + $0x700] ss:$24 sps:$4 sm:$0xff]  }
 0x222   : > { %v752_v24 = vmul.f32 0.0625, %v729_v17  ;;  %v740_v25 = vrot.slane %v739_v18, 2  ;;  %v7425_v4 = vld [vmem:[#allocation15] ss:$16 sps:$4 sm:$0xff]   ;;  %v7439_v12 = vld [vmem:[#allocation15 + $0x44] ss:$16 sps:$4 sm:$0xff]  }
 0x223   : > { %v753_v27 = vmul.f32 0.0625, %v736_v19  ;;  %v747_v28 = vrot.slane %v746_v20, 2  ;;  %2832 = vmatpush1.bf16.msra.mxu0 %v7368_v7  ;;  %v7433_v7 = vld [vmem:[#allocation15 + $0x24] ss:$16 sps:$4 sm:$0xff]   ;;  %v7461_v36 = vld [vmem:[#allocation15 + $0xc0] ss:$16 sps:$4 sm:$0xff]  }
 0x224   : > { %2920 = vmatpush1.bf16.msra.mxu1 %v7371_v8  ;;  %v741_v31 = vadd.f32 %v740_v25, %v739_v18  ;;  %2833 = vmatprep.subr.bf16.mxu0 %v7376_v14  ;;  %v7407_v8 = vld [vmem:[#allocation11 + $0x6d0] ss:$24 sps:$4 sm:$0xff]   ;;  %v7415_v14 = vld [vmem:[#allocation11 + $0x734] ss:$24 sps:$4 sm:$0xff]   ;;  %v7418_v19 = vld [vmem:[#allocation11 + $0x764] ss:$24 sps:$4 sm:$0xff]  }
 0x225   : > { %2921 = vmatprep.subr.bf16.mxu1 %v7379_v15  ;;  %v760_v32 = vcombine.low %v752_v24, %v753_v27  ;;  %v748_v33 = vadd.f32 %v747_v28, %v746_v20  ;;  %v7437_v15 = vld [vmem:[#allocation15 + $0x40] ss:$16 sps:$4 sm:$0xff]   ;;  %v7445_v17 = vld [vmem:[#allocation15 + $0x64] ss:$16 sps:$4 sm:$0xff]  }
 0x226   : > { %v742_v38 = vrot.slane %v741_v31, 1  ;;  %v7413_v18 = vld [vmem:[#allocation11 + $0x730] ss:$24 sps:$4 sm:$0xff]   ;;  %v7421_v24 = vld [vmem:[#allocation11 + $0x794] ss:$24 sps:$4 sm:$0xff]  }
 0x227   : > { %v749_v39 = vrot.slane %v748_v33, 1  ;;  %2834 = vmatpush1.bf16.msra.mxu0 %v7374_v21  ;;  %v767_v56 = vrot.slane %v760_v32, %v8883_v51  ;;  %v7443_v20 = vld [vmem:[#allocation15 + $0x60] ss:$16 sps:$4 sm:$0xff]   ;;  %v7451_v21 = vld [vmem:[#allocation15 + $0x84] ss:$16 sps:$4 sm:$0xff]  }
 0x228   : > { %2922 = vmatpush1.bf16.msra.mxu1 %v7377_v23  ;;  %v743_v42 = vadd.f32 %v742_v38, %v741_v31  ;;  %2835 = vmatprep.subr.bf16.mxu0 %v7382_v29  ;;  %v7416_v23 = vld [vmem:[#allocation11 + $0x760] ss:$24 sps:$4 sm:$0xff]   ;;  %v7419_v28 = vld [vmem:[#allocation11 + $0x790] ss:$24 sps:$4 sm:$0xff]   ;;  %v7424_v29 = vld [vmem:[#allocation11 + $0x7c4] ss:$24 sps:$4 sm:$0xff]  }
 0x229   : > { %2923 = vmatprep.subr.bf16.mxu1 %v7385_v30  ;;  %v750_v43 = vadd.f32 %v749_v39, %v748_v33  ;;  %v7449_v25 = vld [vmem:[#allocation15 + $0x80] ss:$16 sps:$4 sm:$0xff]   ;;  %v7457_v27 = vld [vmem:[#allocation15 + $0xa4] ss:$16 sps:$4 sm:$0xff]  }
 0x22a   : > { %v754_v5 = vmul.f32 0.0625, %v743_v42  ;;  %v7455_v30 = vld [vmem:[#allocation15 + $0xa0] ss:$16 sps:$4 sm:$0xff]   ;;  %v7463_v31 = vld [vmem:[#allocation15 + $0xc4] ss:$16 sps:$4 sm:$0xff]  }
 0x22b   : > { %v755_v49 = vmul.f32 0.0625, %v750_v43  ;;  %2836 = vmatpush1.bf16.msra.mxu0 %v7380_v34  ;;  %v7430_v38 = vld [vmem:[#allocation11 + $0x7f4] ss:$24 sps:$4 sm:$0xff]  }
 0x22c   : > { %2924 = vmatpush1.bf16.msra.mxu1 %v7383_v35  ;;  %2837 = vmatprep.subr.bf16.mxu0 %v7388_v40  ;;  %v7422_v35 = vld [vmem:[#allocation11 + $0x7c0] ss:$24 sps:$4 sm:$0xff]   ;;  %v7428_v40 = vld [vmem:[#allocation11 + $0x7f0] ss:$24 sps:$4 sm:$0xff]  }
 0x22d   : > { %2934 = vmatprep.subr.bf16.mxu1 %v7391_v41  ;;  %v768_v50 = vcombine.low %v754_v5, %v755_v49  ;;  %v7469_v39 = vld [vmem:[#allocation15 + $0xe4] ss:$16 sps:$4 sm:$0xff]   ;;  %v7467_v42 = vld [vmem:[#allocation15 + $0xe0] ss:$16 sps:$4 sm:$0xff]  }
 0x22e   : > { %v7436_v41 = vld [vmem:[#allocation11 + $0x824] ss:$24 sps:$4 sm:$0xff]  }
 0x22f   : > { %2926 = vmatmul.mubr.bf16.vlgmr.msra.gmra.mrb[4].mxu1 %v8858_v22  ;;  %2838 = vmatpush1.bf16.msra.mxu0 %v7386_v44  ;;  %v775_v53 = vrot.slane %v768_v50, %v8883_v51  ;;  %v7398_v22 = vld [vmem:[#allocation11 + $0x8d8] ss:$24 sps:$4 sm:$0xff]   ;;  %v7448_v49 = vld [vmem:[#allocation11 + $0x884] ss:$24 sps:$4 sm:$0xff]  }
 0x230   : > { %2935 = vmatpush1.bf16.msra.mxu1 %v7389_v45  ;;  %2839 = vmatprep.subr.bf16.mxu0 %v7394_v47  ;;  %v7475_v43 = vld [vmem:[#allocation15 + $0x104] ss:$16 sps:$4 sm:$0xff]   ;;  %v7473_v46 = vld [vmem:[#allocation15 + $0x100] ss:$16 sps:$4 sm:$0xff]  }
 0x231   : > { %2936 = vmatprep.subr.bf16.mxu1 %v7397_v16  ;;  %2966 = vmatprep.mubr.bf16.mxu1 %v8860_v26  ;;  %v780_v57 = vrot.slane %v775_v53, 7  ;;  %v7404_v26 = vld [vmem:[#allocation11 + $0x6a0] ss:$24 sps:$4 sm:$0xff]   ;;  %v7442_v45 = vld [vmem:[#allocation11 + $0x854] ss:$24 sps:$4 sm:$0xff]  }
 0x232   : > { %v7434_v44 = vld [vmem:[#allocation11 + $0x820] ss:$24 sps:$4 sm:$0xff]   ;;  %v7440_v47 = vld [vmem:[#allocation11 + $0x850] ss:$24 sps:$4 sm:$0xff]   ;;  %v7454_v53 = vld [vmem:[#allocation11 + $0x8b4] ss:$24 sps:$4 sm:$0xff]  }
 0x233   : > { %2840 = vmatpush1.bf16.msra.mxu0 %v7392_v10  ;;  %v782_v60 = vsel %vm781_vm1, %v780_v57, %v767_v56  ;;  %v7481_v5 = vld [vmem:[#allocation15 + $0x124] ss:$16 sps:$4 sm:$0xff]   ;;  %v7479_v16 = vld [vmem:[#allocation15 + $0x120] ss:$16 sps:$4 sm:$0xff]  }
 0x234   : > { %2937 = vmatpush1.bf16.msra.mxu1 %v7395_v52  ;;  %2841 = vmatprep.subr.bf16.mxu0 %v7400_v54  ;;  %v784_v62 = vsel %vm783_vm2, %v780_v57, %v782_v60  ;;  %v7487_v50 = vld [vmem:[#allocation15 + $0x144] ss:$16 sps:$4 sm:$0xff]   ;;  %v7485_v52 = vld [vmem:[#allocation15 + $0x140] ss:$16 sps:$4 sm:$0xff]   ;;  %v7466_v60 = vld [vmem:[#allocation15 + $0xc] ss:$16 sps:$4 sm:$0xff]  }
 0x235   : > { %2938 = vmatprep.subr.bf16.mxu1 %v7403_v55  ;;  %v786_v63 = vsel %vm785_vm3, %v780_v57, %v784_v62  ;;  %v7446_v10 = vld [vmem:[#allocation11 + $0x880] ss:$24 sps:$4 sm:$0xff]   ;;  %v7452_v55 = vld [vmem:[#allocation11 + $0x8b0] ss:$24 sps:$4 sm:$0xff]  }
 0x236   : > { %v788_v1 = vsel %vm787_vm4, %v780_v57, %v786_v63  ;;  %v7493_v54 = vld [vmem:[#allocation15 + $0x164] ss:$16 sps:$4 sm:$0xff]   ;;  %v7491_v56 = vld [vmem:[#allocation15 + $0x160] ss:$16 sps:$4 sm:$0xff]   ;;  %v7464_v62 = vld [vmem:[#allocation15 + $0x8] ss:$16 sps:$4 sm:$0xff]  }
 0x237   : > { %2842 = vmatpush1.bf16.msra.mxu0 %v7398_v22  ;;  %790 = vst [vmem:[#allocation2] sm:$0xf] %v788_v1  ;;  %v7460_v57 = vld [vmem:[#allocation11 + $0x8e4] ss:$24 sps:$4 sm:$0xff]  }
 0x238   : > { %2939 = vmatpush1.bf16.msra.mxu1 %v7401_v58  ;;  %4161 = vmatprep.subr.bf16.mxu0 %v7427_v61  ;;  %v7499_v22 = vld [vmem:[#allocation15 + $0x184] ss:$16 sps:$4 sm:$0xff]   ;;  %v7503_v63 = vld [vmem:[#allocation15 + $0x1a0] ss:$16 sps:$4 sm:$0xff]   ;;  %v7472_v1 = vld [vmem:[#allocation15 + $0x2c] ss:$16 sps:$4 sm:$0xff]  }
 0x239   : > { %2940 = vmatprep.subr.bf16.mxu1 %v7406_v59  ;;  %v7458_v58 = vld [vmem:[#allocation11 + $0x8e0] ss:$24 sps:$4 sm:$0xff]  }
 0x23a   : > { %2844 = vmatmul.mubr.bf16.vlgmr.msra.gmra.mrb[12].mxu0 %v8846_v6  ;;  %v7497_v59 = vld [vmem:[#allocation15 + $0x180] ss:$16 sps:$4 sm:$0xff]   ;;  %v7505_v61 = vld [vmem:[#allocation15 + $0x1a4] ss:$16 sps:$4 sm:$0xff]  }
 0x23b   : > { %4162 = vmatpush1.bf16.msra.mxu0 %v7425_v4  ;;  %v7509_v4 = vld [vmem:[#allocation15 + $0x1c0] ss:$16 sps:$4 sm:$0xff]  }
 0x23c   : > { %2941 = vmatpush1.bf16.msra.mxu1 %v7404_v26  ;;  %4163 = vmatprep.subr.bf16.mxu0 %v7433_v7  ;;  %v7511_v26 = vld [vmem:[#allocation15 + $0x1c4] ss:$16 sps:$4 sm:$0xff]   ;;  %v7478_v7 = vld [vmem:[#allocation15 + $0x4c] ss:$16 sps:$4 sm:$0xff]  }
 0x23d   : > { %2942 = vmatprep.subr.bf16.mxu1 %v7409_v3  ;;  %v7470_v3 = vld [vmem:[#allocation15 + $0x28] ss:$16 sps:$4 sm:$0xff]  }
 0x23f   : > { %4164 = vmatpush1.bf16.msra.mxu0 %v7431_v9  ;;  %v7515_v9 = vld [vmem:[#allocation15 + $0x1e0] ss:$16 sps:$4 sm:$0xff]  }
 0x240   : > { %2943 = vmatpush1.bf16.msra.mxu1 %v7407_v8  ;;  %4165 = vmatprep.subr.bf16.mxu0 %v7439_v12  ;;  %v7517_v8 = vld [vmem:[#allocation15 + $0x1e4] ss:$16 sps:$4 sm:$0xff]   ;;  %v7484_v12 = vld [vmem:[#allocation15 + $0x6c] ss:$16 sps:$4 sm:$0xff]  }
 0x241   : > { %2944 = vmatprep.subr.bf16.mxu1 %v7412_v11  ;;  %v7476_v11 = vld [vmem:[#allocation15 + $0x48] ss:$16 sps:$4 sm:$0xff]  }
 0x243   : > { %4166 = vmatpush1.bf16.msra.mxu0 %v7437_v15  ;;  %v8895_v15 = vld [vmem:[#allocation12] sm:$0x3f] }
 0x244   : > { %2945 = vmatpush1.bf16.msra.mxu1 %v7410_v13  ;;  %4167 = vmatprep.subr.bf16.mxu0 %v7445_v17  ;;  %v7541_v13 = vld [vmem:[#allocation15 + $0x204] ss:$16 sps:$4 sm:$0xff]   ;;  %v7488_v17 = vld [vmem:[#allocation15 + $0x88] ss:$16 sps:$4 sm:$0xff]  }
 0x245   : > { %2946 = vmatprep.subr.bf16.mxu1 %v7415_v14  ;;  %v7482_v14 = vld [vmem:[#allocation15 + $0x68] ss:$16 sps:$4 sm:$0xff]  }
 0x247   : > { %4168 = vmatpush1.bf16.msra.mxu0 %v7443_v20  ;;  %v1089_v20 = vrot.slane %v8895_v15, %v8878_v2 }
 0x248   : > { %2947 = vmatpush1.bf16.msra.mxu1 %v7413_v18  ;;  %4169 = vmatprep.subr.bf16.mxu0 %v7451_v21  ;;  %v1085_v18 = vrot.slane %v8895_v15, %v8875_v0  ;;  %v7494_v21 = vld [vmem:[#allocation15 + $0xa8] ss:$16 sps:$4 sm:$0xff]  }
 0x249   : > { %2948 = vmatprep.subr.bf16.mxu1 %v7418_v19  ;;  %v7496_v19 = vld [vmem:[#allocation15 + $0xac] ss:$16 sps:$4 sm:$0xff]  }
 0x24b   : > { %4170 = vmatpush1.bf16.msra.mxu0 %v7449_v25 }
 0x24c   : > { %2949 = vmatpush1.bf16.msra.mxu1 %v7416_v23  ;;  %4171 = vmatprep.subr.bf16.mxu0 %v7457_v27 }
 0x24d   : > { %2950 = vmatprep.subr.bf16.mxu1 %v7421_v24  ;;  %v8890_v32 = vpop.f32.mrb[8].mxu0  ;;  %v7502_v24 = vld [vmem:[#allocation15 + $0xcc] ss:$16 sps:$4 sm:$0xff]  }
 0x24e   : > { %v8892_v33 = vpop.f32.mrb[9].mxu0  ;;  %v2641_v23 = vadd.f32 %v8890_v32, %v1085_v18  ;;  %v7514_v32 = vld [vmem:[#allocation15 + $0x10c] ss:$16 sps:$4 sm:$0xff]   ;;  %v7554_v18 = vld [vmem:[#allocation15 + $0x248] ss:$16 sps:$4 sm:$0xff]  }
 0x24f   : > { %v2644_v34 = vpop.f32.mrb[10].mxu0  ;;  %4172 = vmatpush1.bf16.msra.mxu0 %v7455_v30  ;;  %v2643_v25 = vadd.f32 %v8892_v33, %v1089_v20  ;;  %v7520_v33 = vld [vmem:[#allocation15 + $0x12c] ss:$16 sps:$4 sm:$0xff]   ;;  %v7593_v20 = vld [vmem:[#allocation15 + $0x320] ss:$16 sps:$4 sm:$0xff]  }
 0x250   : > { %2951 = vmatpush1.bf16.msra.mxu1 %v7419_v28  ;;  %v2645_v37 = vpop.f32.mrb[11].mxu0  ;;  %4173 = vmatprep.subr.bf16.mxu0 %v7463_v31  ;;  %v7500_v34 = vld [vmem:[#allocation15 + $0xc8] ss:$16 sps:$4 sm:$0xff]  }
 0x251   : > { %2952 = vmatprep.subr.bf16.mxu1 %v7424_v29  ;;  %v7506_v37 = vld [vmem:[#allocation15 + $0xe8] ss:$16 sps:$4 sm:$0xff]  }
 0x253   : > { %4174 = vmatpush1.bf16.msra.mxu0 %v7461_v36  ;;  %v7508_v36 = vld [vmem:[#allocation15 + $0xec] ss:$16 sps:$4 sm:$0xff]  }
 0x254   : > { %2953 = vmatpush1.bf16.msra.mxu1 %v7422_v35  ;;  %4175 = vmatprep.subr.bf16.mxu0 %v7469_v39 }
 0x255   : > { %2954 = vmatprep.subr.bf16.mxu1 %v7430_v38  ;;  %v7512_v38 = vld [vmem:[#allocation15 + $0x108] ss:$16 sps:$4 sm:$0xff]  }
 0x257   : > { %4176 = vmatpush1.bf16.msra.mxu0 %v7467_v42 }
 0x258   : > { %2955 = vmatpush1.bf16.msra.mxu1 %v7428_v40  ;;  %4177 = vmatprep.subr.bf16.mxu0 %v7475_v43  ;;  %v7523_v43 = vld [vmem:[#allocation15 + $0x14c] ss:$16 sps:$4 sm:$0xff]  }
 0x259   : > { %2956 = vmatprep.subr.bf16.mxu1 %v7436_v41  ;;  %v7518_v41 = vld [vmem:[#allocation15 + $0x128] ss:$16 sps:$4 sm:$0xff]  }
 0x25b   : > { %4178 = vmatpush1.bf16.msra.mxu0 %v7473_v46  ;;  %v7547_v46 = vld [vmem:[#allocation15 + $0x224] ss:$16 sps:$4 sm:$0xff]  }
 0x25c   : > { %2957 = vmatpush1.bf16.msra.mxu1 %v7434_v44  ;;  %4179 = vmatprep.subr.bf16.mxu0 %v7481_v5  ;;  %v7539_v44 = vld [vmem:[#allocation15 + $0x200] ss:$16 sps:$4 sm:$0xff]   ;;  %v7521_v5 = vld [vmem:[#allocation15 + $0x148] ss:$16 sps:$4 sm:$0xff]  }
 0x25d   : > { %2958 = vmatprep.subr.bf16.mxu1 %v7442_v45 }
 0x25f   : > { %4180 = vmatpush1.bf16.msra.mxu0 %v7479_v16  ;;  %v7545_v16 = vld [vmem:[#allocation15 + $0x220] ss:$16 sps:$4 sm:$0xff]  }
 0x260   : > { %2959 = vmatpush1.bf16.msra.mxu1 %v7440_v47  ;;  %4181 = vmatprep.subr.bf16.mxu0 %v7487_v50  ;;  %v7526_v47 = vld [vmem:[#allocation15 + $0x16c] ss:$16 sps:$4 sm:$0xff]   ;;  %v7524_v50 = vld [vmem:[#allocation15 + $0x168] ss:$16 sps:$4 sm:$0xff]  }
 0x261   : > { %2960 = vmatprep.subr.bf16.mxu1 %v7448_v49  ;;  %v7553_v49 = vld [vmem:[#allocation15 + $0x244] ss:$16 sps:$4 sm:$0xff]  }
 0x263   : > { %4182 = vmatpush1.bf16.msra.mxu0 %v7485_v52  ;;  %v7551_v52 = vld [vmem:[#allocation15 + $0x240] ss:$16 sps:$4 sm:$0xff]  }
 0x264   : > { %2961 = vmatpush1.bf16.msra.mxu1 %v7446_v10  ;;  %4183 = vmatprep.subr.bf16.mxu0 %v7493_v54  ;;  %v7529_v10 = vld [vmem:[#allocation15 + $0x18c] ss:$16 sps:$4 sm:$0xff]   ;;  %v7527_v54 = vld [vmem:[#allocation15 + $0x188] ss:$16 sps:$4 sm:$0xff]  }
 0x265   : > { %2962 = vmatprep.subr.bf16.mxu1 %v7454_v53  ;;  %v7559_v53 = vld [vmem:[#allocation15 + $0x264] ss:$16 sps:$4 sm:$0xff]  }
 0x267   : > { %4184 = vmatpush1.bf16.msra.mxu0 %v7491_v56  ;;  %v7557_v56 = vld [vmem:[#allocation15 + $0x260] ss:$16 sps:$4 sm:$0xff]  }
 0x268   : > { %2963 = vmatpush1.bf16.msra.mxu1 %v7452_v55  ;;  %4185 = vmatprep.subr.bf16.mxu0 %v7499_v22  ;;  %v7532_v55 = vld [vmem:[#allocation15 + $0x1ac] ss:$16 sps:$4 sm:$0xff]   ;;  %v7530_v22 = vld [vmem:[#allocation15 + $0x1a8] ss:$16 sps:$4 sm:$0xff]  }
 0x269   : > { %2964 = vmatprep.subr.bf16.mxu1 %v7460_v57  ;;  %v7565_v57 = vld [vmem:[#allocation15 + $0x284] ss:$16 sps:$4 sm:$0xff]  }
 0x26b   : > { %4186 = vmatpush1.bf16.msra.mxu0 %v7497_v59  ;;  %v7563_v59 = vld [vmem:[#allocation15 + $0x280] ss:$16 sps:$4 sm:$0xff]  }
 0x26c   : > { %2965 = vmatpush1.bf16.msra.mxu1 %v7458_v58  ;;  %4187 = vmatprep.subr.bf16.mxu0 %v7505_v61  ;;  %v7535_v58 = vld [vmem:[#allocation15 + $0x1cc] ss:$16 sps:$4 sm:$0xff]   ;;  %v7533_v61 = vld [vmem:[#allocation15 + $0x1c8] ss:$16 sps:$4 sm:$0xff]  }
 0x26d   : > { %4284 = vmatprep.subr.bf16.mxu1 %v7466_v60  ;;  %v7571_v60 = vld [vmem:[#allocation15 + $0x2a4] ss:$16 sps:$4 sm:$0xff]  }
 0x26f   : > { %2967 = vmatmul.mubr.bf16.vlgmr.msra.gmra.mrb[4].mxu1 %v8846_v6  ;;  %4188 = vmatpush1.bf16.msra.mxu0 %v7503_v63  ;;  %v7490_v6 = vld [vmem:[#allocation15 + $0x8c] ss:$16 sps:$4 sm:$0xff]   ;;  %v7569_v63 = vld [vmem:[#allocation15 + $0x2a0] ss:$16 sps:$4 sm:$0xff]  }
 0x270   : > { %4285 = vmatpush1.bf16.msra.mxu1 %v7464_v62  ;;  %4189 = vmatprep.subr.bf16.mxu0 %v7511_v26  ;;  %v7538_v62 = vld [vmem:[#allocation15 + $0x1ec] ss:$16 sps:$4 sm:$0xff]   ;;  %v7536_v26 = vld [vmem:[#allocation15 + $0x1e8] ss:$16 sps:$4 sm:$0xff]  }
 0x271   : > { %4286 = vmatprep.subr.bf16.mxu1 %v7472_v1  ;;  %v7577_v1 = vld [vmem:[#allocation15 + $0x2c4] ss:$16 sps:$4 sm:$0xff]  }
 0x273   : > { %4190 = vmatpush1.bf16.msra.mxu0 %v7509_v4  ;;  %v7575_v4 = vld [vmem:[#allocation15 + $0x2c0] ss:$16 sps:$4 sm:$0xff]  }
 0x274   : > { %4287 = vmatpush1.bf16.msra.mxu1 %v7470_v3  ;;  %4191 = vmatprep.subr.bf16.mxu0 %v7517_v8  ;;  %v7544_v3 = vld [vmem:[#allocation15 + $0x20c] ss:$16 sps:$4 sm:$0xff]   ;;  %v7542_v8 = vld [vmem:[#allocation15 + $0x208] ss:$16 sps:$4 sm:$0xff]  }
 0x275   : > { %4288 = vmatprep.subr.bf16.mxu1 %v7478_v7  ;;  %v7583_v7 = vld [vmem:[#allocation15 + $0x2e4] ss:$16 sps:$4 sm:$0xff]  }
 0x277   : > { %4192 = vmatpush1.bf16.msra.mxu0 %v7515_v9  ;;  %v7581_v9 = vld [vmem:[#allocation15 + $0x2e0] ss:$16 sps:$4 sm:$0xff]  }
 0x278   : > { %4289 = vmatpush1.bf16.msra.mxu1 %v7476_v11  ;;  %4202 = vmatprep.subr.bf16.mxu0 %v7541_v13  ;;  %v7550_v11 = vld [vmem:[#allocation15 + $0x22c] ss:$16 sps:$4 sm:$0xff]   ;;  %v7548_v13 = vld [vmem:[#allocation15 + $0x228] ss:$16 sps:$4 sm:$0xff]  }
 0x279   : > { %4290 = vmatprep.subr.bf16.mxu1 %v7484_v12  ;;  %v7589_v12 = vld [vmem:[#allocation15 + $0x304] ss:$16 sps:$4 sm:$0xff]  }
 0x27c   : > { %4291 = vmatpush1.bf16.msra.mxu1 %v7482_v14  ;;  %v7556_v14 = vld [vmem:[#allocation15 + $0x24c] ss:$16 sps:$4 sm:$0xff]  }
 0x27d   : > { %4292 = vmatprep.subr.bf16.mxu1 %v7490_v6  ;;  %v7587_v6 = vld [vmem:[#allocation15 + $0x300] ss:$16 sps:$4 sm:$0xff]  }
 0x280   : > { %4293 = vmatpush1.bf16.msra.mxu1 %v7488_v17  ;;  %v7595_v17 = vld [vmem:[#allocation15 + $0x324] ss:$16 sps:$4 sm:$0xff]  }
 0x281   : > { %4294 = vmatprep.subr.bf16.mxu1 %v7496_v19  ;;  %v7562_v19 = vld [vmem:[#allocation15 + $0x26c] ss:$16 sps:$4 sm:$0xff]  }
 0x282   : > { %v2722_v27 = vpop.f32.mrb[0].mxu1 }
 0x283   : > { %v6800_v28 = vadd.f32 %v2722_v27, %v2641_v23  ;;  %v2724_v29 = vpop.f32.mrb[1].mxu1  ;;  %v7560_v23 = vld [vmem:[#allocation15 + $0x268] ss:$16 sps:$4 sm:$0xff]   ;;  %v7607_v27 = vld [vmem:[#allocation15 + $0x364] ss:$16 sps:$4 sm:$0xff]  }
 0x284   : > { %v6802_v30 = vadd.f32 %v2724_v29, %v2643_v25  ;;  %v2726_v31 = vpop.f32.mrb[2].mxu1  ;;  %4295 = vmatpush1.bf16.msra.mxu1 %v7494_v21  ;;  %v7601_v21 = vld [vmem:[#allocation15 + $0x344] ss:$16 sps:$4 sm:$0xff]   ;;  %v7599_v25 = vld [vmem:[#allocation15 + $0x340] ss:$16 sps:$4 sm:$0xff]  }
 0x285   : > { %7731 = vtanh.f32 %v6800_v28  ;;  %v2727_v35 = vpop.f32.mrb[3].mxu1  ;;  %4296 = vmatprep.subr.bf16.mxu1 %v7502_v24  ;;  %v7568_v24 = vld [vmem:[#allocation15 + $0x28c] ss:$16 sps:$4 sm:$0xff]   ;;  %v7566_v28 = vld [vmem:[#allocation15 + $0x288] ss:$16 sps:$4 sm:$0xff]  }
 0x286   : > { %7733 = vtanh.f32 %v6802_v30  ;;  %v7574_v29 = vld [vmem:[#allocation15 + $0x2ac] ss:$16 sps:$4 sm:$0xff]   ;;  %v7605_v30 = vld [vmem:[#allocation15 + $0x360] ss:$16 sps:$4 sm:$0xff]   ;;  %v7613_v31 = vld [vmem:[#allocation15 + $0x384] ss:$16 sps:$4 sm:$0xff]  }
 0x287   : > { %v7580_v35 = vld [vmem:[#allocation15 + $0x2cc] ss:$16 sps:$4 sm:$0xff]  }
 0x288   : > { %4297 = vmatpush1.bf16.msra.mxu1 %v7500_v34  ;;  %v7572_v34 = vld [vmem:[#allocation15 + $0x2a8] ss:$16 sps:$4 sm:$0xff]  }
 0x289   : > { %4298 = vmatprep.subr.bf16.mxu1 %v7508_v36  ;;  %v7611_v36 = vld [vmem:[#allocation15 + $0x380] ss:$16 sps:$4 sm:$0xff]  }
 0x28c   : > { %4299 = vmatpush1.bf16.msra.mxu1 %v7506_v37  ;;  %v7619_v37 = vld [vmem:[#allocation15 + $0x3a4] ss:$16 sps:$4 sm:$0xff]  }
 0x28d   : > { %4300 = vmatprep.subr.bf16.mxu1 %v7514_v32  ;;  %v7578_v32 = vld [vmem:[#allocation15 + $0x2c8] ss:$16 sps:$4 sm:$0xff]  }
 0x28f   : > { %v7732_v39 = vpop.eup %7731 }
 0x290   : > { %v7734_v40 = vpop.eup %7733  ;;  %4301 = vmatpush1.bf16.msra.mxu1 %v7512_v38  ;;  %v2981_v45 = vpack.c.bf16 %v7732_v39, %v7732_v39  ;;  %v7586_v38 = vld [vmem:[#allocation15 + $0x2ec] ss:$16 sps:$4 sm:$0xff]   ;;  %v7625_v39 = vld [vmem:[#allocation15 + $0x3c4] ss:$16 sps:$4 sm:$0xff]  }
 0x291   : > { %v2982_v42 = vpack.c.bf16 %v7734_v40, %v7734_v40  ;;  %4302 = vmatprep.subr.bf16.mxu1 %v7520_v33  ;;  %v7617_v33 = vld [vmem:[#allocation15 + $0x3a0] ss:$16 sps:$4 sm:$0xff]   ;;  %v7584_v40 = vld [vmem:[#allocation15 + $0x2e8] ss:$16 sps:$4 sm:$0xff]  }
 0x293   : > { %4193 = vmatprep.mubr.bf16.mxu0 %v2982_v42  ;;  %4316 = vmatprep.mubr.bf16.mxu1 %v2982_v42  ;;  %v7623_v42 = vld [vmem:[#allocation15 + $0x3c0] ss:$16 sps:$4 sm:$0xff]  }
 0x294   : > { %4194 = vmatmul.mubr.bf16.vlgmr.msra.gmra.mrb[16].mxu0 %v2981_v45  ;;  %4303 = vmatpush1.bf16.msra.mxu1 %v7518_v41  ;;  %v7592_v41 = vld [vmem:[#allocation15 + $0x30c] ss:$16 sps:$4 sm:$0xff]  }
 0x295   : > { %4304 = vmatprep.subr.bf16.mxu1 %v7523_v43  ;;  %4203 = vmatpush1.bf16.msra.mxu0 %v7539_v44  ;;  %v7631_v43 = vld [vmem:[#allocation15 + $0x3e4] ss:$16 sps:$4 sm:$0xff]   ;;  %v7590_v44 = vld [vmem:[#allocation15 + $0x308] ss:$16 sps:$4 sm:$0xff]  }
 0x296   : > { %4204 = vmatprep.subr.bf16.mxu0 %v7547_v46  ;;  %v7629_v46 = vld [vmem:[#allocation15 + $0x3e0] ss:$16 sps:$4 sm:$0xff]  }
 0x298   : > { %4305 = vmatpush1.bf16.msra.mxu1 %v7521_v5  ;;  %v7637_v5 = vld [vmem:[#allocation15 + $0x404] ss:$16 sps:$4 sm:$0xff]  }
 0x299   : > { %4306 = vmatprep.subr.bf16.mxu1 %v7526_v47  ;;  %4205 = vmatpush1.bf16.msra.mxu0 %v7545_v16  ;;  %v7596_v47 = vld [vmem:[#allocation15 + $0x328] ss:$16 sps:$4 sm:$0xff]   ;;  %v7604_v16 = vld [vmem:[#allocation15 + $0x34c] ss:$16 sps:$4 sm:$0xff]  }
 0x29a   : > { %4206 = vmatprep.subr.bf16.mxu0 %v7553_v49  ;;  %v7602_v49 = vld [vmem:[#allocation15 + $0x348] ss:$16 sps:$4 sm:$0xff]  }
 0x29c   : > { %4307 = vmatpush1.bf16.msra.mxu1 %v7524_v50  ;;  %v7610_v50 = vld [vmem:[#allocation15 + $0x36c] ss:$16 sps:$4 sm:$0xff]  }
 0x29d   : > { %4308 = vmatprep.subr.bf16.mxu1 %v7529_v10  ;;  %4207 = vmatpush1.bf16.msra.mxu0 %v7551_v52  ;;  %v7608_v10 = vld [vmem:[#allocation15 + $0x368] ss:$16 sps:$4 sm:$0xff]   ;;  %v7616_v52 = vld [vmem:[#allocation15 + $0x38c] ss:$16 sps:$4 sm:$0xff]  }
 0x29e   : > { %4208 = vmatprep.subr.bf16.mxu0 %v7559_v53  ;;  %v7614_v53 = vld [vmem:[#allocation15 + $0x388] ss:$16 sps:$4 sm:$0xff]  }
 0x2a0   : > { %4309 = vmatpush1.bf16.msra.mxu1 %v7527_v54  ;;  %v7622_v54 = vld [vmem:[#allocation15 + $0x3ac] ss:$16 sps:$4 sm:$0xff]  }
 0x2a1   : > { %4310 = vmatprep.subr.bf16.mxu1 %v7532_v55  ;;  %4209 = vmatpush1.bf16.msra.mxu0 %v7557_v56  ;;  %v7620_v55 = vld [vmem:[#allocation15 + $0x3a8] ss:$16 sps:$4 sm:$0xff]   ;;  %v7628_v56 = vld [vmem:[#allocation15 + $0x3cc] ss:$16 sps:$4 sm:$0xff]  }
 0x2a2   : > { %4210 = vmatprep.subr.bf16.mxu0 %v7565_v57  ;;  %v7626_v57 = vld [vmem:[#allocation15 + $0x3c8] ss:$16 sps:$4 sm:$0xff]  }
 0x2a4   : > { %4311 = vmatpush1.bf16.msra.mxu1 %v7530_v22  ;;  %v7634_v22 = vld [vmem:[#allocation15 + $0x3ec] ss:$16 sps:$4 sm:$0xff]  }
 0x2a5   : > { %4312 = vmatprep.subr.bf16.mxu1 %v7535_v58  ;;  %4211 = vmatpush1.bf16.msra.mxu0 %v7563_v59  ;;  %v7632_v58 = vld [vmem:[#allocation15 + $0x3e8] ss:$16 sps:$4 sm:$0xff]   ;;  %v7640_v59 = vld [vmem:[#allocation15 + $0x40c] ss:$16 sps:$4 sm:$0xff]  }
 0x2a6   : > { %4212 = vmatprep.subr.bf16.mxu0 %v7571_v60  ;;  %v1092_v60 = vsub.s32 2, %v8838_v48 }
 0x2a8   : > { %4313 = vmatpush1.bf16.msra.mxu1 %v7533_v61  ;;  %v1096_v61 = vsub.s32 3, %v8838_v48 }
 0x2a9   : > { %4314 = vmatprep.subr.bf16.mxu1 %v7538_v62  ;;  %4213 = vmatpush1.bf16.msra.mxu0 %v7569_v63  ;;  %v1093_v62 = vrot.slane %v8895_v15, %v1092_v60 }
 0x2aa   : > { %4214 = vmatprep.subr.bf16.mxu0 %v7577_v1  ;;  %v1097_v63 = vrot.slane %v8895_v15, %v1096_v61 }
 0x2ac   : > { %4315 = vmatpush1.bf16.msra.mxu1 %v7536_v26 }
 0x2ad   : > { %4325 = vmatprep.subr.bf16.mxu1 %v7544_v3  ;;  %4215 = vmatpush1.bf16.msra.mxu0 %v7575_v4 }
 0x2ae   : > { %4216 = vmatprep.subr.bf16.mxu0 %v7583_v7 }
 0x2af   : > { %4317 = vmatmul.mubr.bf16.vlgmr.msra.gmra.mrb[8].mxu1 %v2981_v45  ;;  %v7598_v45 = vld [vmem:[#allocation15 + $0x32c] ss:$16 sps:$4 sm:$0xff]  }
 0x2b0   : > { %4326 = vmatpush1.bf16.msra.mxu1 %v7542_v8 }
 0x2b1   : > { %4327 = vmatprep.subr.bf16.mxu1 %v7550_v11  ;;  %4217 = vmatpush1.bf16.msra.mxu0 %v7581_v9 }
 0x2b2   : > { %4218 = vmatprep.subr.bf16.mxu0 %v7589_v12 }
 0x2b4   : > { %4328 = vmatpush1.bf16.msra.mxu1 %v7548_v13  ;;  %v7635_v13 = vld [vmem:[#allocation15 + $0x400] ss:$16 sps:$4 sm:$0xff]  }
 0x2b5   : > { %4329 = vmatprep.subr.bf16.mxu1 %v7556_v14  ;;  %4219 = vmatpush1.bf16.msra.mxu0 %v7587_v6  ;;  %v7638_v14 = vld [vmem:[#allocation15 + $0x408] ss:$16 sps:$4 sm:$0xff]  }
 0x2b6   : > { %4220 = vmatprep.subr.bf16.mxu0 %v7595_v17  ;;  %v7643_v17 = vld [vmem:[#allocation15 + $0x424] ss:$16 sps:$4 sm:$0xff]  }
 0x2b8   : > { %4330 = vmatpush1.bf16.msra.mxu1 %v7554_v18  ;;  %v7646_v18 = vld [vmem:[#allocation15 + $0x42c] ss:$16 sps:$4 sm:$0xff]  }
 0x2b9   : > { %4331 = vmatprep.subr.bf16.mxu1 %v7562_v19  ;;  %4221 = vmatpush1.bf16.msra.mxu0 %v7593_v20  ;;  %v7641_v19 = vld [vmem:[#allocation15 + $0x420] ss:$16 sps:$4 sm:$0xff]   ;;  %v7644_v20 = vld [vmem:[#allocation15 + $0x428] ss:$16 sps:$4 sm:$0xff]  }
 0x2ba   : > { %4222 = vmatprep.subr.bf16.mxu0 %v7601_v21  ;;  %v7649_v21 = vld [vmem:[#allocation15 + $0x444] ss:$16 sps:$4 sm:$0xff]  }
 0x2bc   : > { %4332 = vmatpush1.bf16.msra.mxu1 %v7560_v23  ;;  %v7652_v23 = vld [vmem:[#allocation15 + $0x44c] ss:$16 sps:$4 sm:$0xff]  }
 0x2bd   : > { %4333 = vmatprep.subr.bf16.mxu1 %v7568_v24  ;;  %4223 = vmatpush1.bf16.msra.mxu0 %v7599_v25  ;;  %v7647_v24 = vld [vmem:[#allocation15 + $0x440] ss:$16 sps:$4 sm:$0xff]   ;;  %v7650_v25 = vld [vmem:[#allocation15 + $0x448] ss:$16 sps:$4 sm:$0xff]  }
 0x2be   : > { %4224 = vmatprep.subr.bf16.mxu0 %v7607_v27  ;;  %v7655_v27 = vld [vmem:[#allocation15 + $0x464] ss:$16 sps:$4 sm:$0xff]  }
 0x2c0   : > { %4334 = vmatpush1.bf16.msra.mxu1 %v7566_v28  ;;  %v7658_v28 = vld [vmem:[#allocation15 + $0x46c] ss:$16 sps:$4 sm:$0xff]  }
 0x2c1   : > { %4335 = vmatprep.subr.bf16.mxu1 %v7574_v29  ;;  %4225 = vmatpush1.bf16.msra.mxu0 %v7605_v30  ;;  %v7653_v29 = vld [vmem:[#allocation15 + $0x460] ss:$16 sps:$4 sm:$0xff]   ;;  %v7656_v30 = vld [vmem:[#allocation15 + $0x468] ss:$16 sps:$4 sm:$0xff]  }
 0x2c2   : > { %4226 = vmatprep.subr.bf16.mxu0 %v7613_v31  ;;  %v7661_v31 = vld [vmem:[#allocation15 + $0x484] ss:$16 sps:$4 sm:$0xff]  }
 0x2c4   : > { %4336 = vmatpush1.bf16.msra.mxu1 %v7572_v34  ;;  %v7664_v34 = vld [vmem:[#allocation15 + $0x48c] ss:$16 sps:$4 sm:$0xff]  }
 0x2c5   : > { %4337 = vmatprep.subr.bf16.mxu1 %v7580_v35  ;;  %4227 = vmatpush1.bf16.msra.mxu0 %v7611_v36  ;;  %v7659_v35 = vld [vmem:[#allocation15 + $0x480] ss:$16 sps:$4 sm:$0xff]   ;;  %v7662_v36 = vld [vmem:[#allocation15 + $0x488] ss:$16 sps:$4 sm:$0xff]  }
 0x2c6   : > { %4228 = vmatprep.subr.bf16.mxu0 %v7619_v37  ;;  %v7667_v37 = vld [vmem:[#allocation15 + $0x4a4] ss:$16 sps:$4 sm:$0xff]  }
 0x2c8   : > { %4338 = vmatpush1.bf16.msra.mxu1 %v7578_v32  ;;  %v7670_v32 = vld [vmem:[#allocation15 + $0x4ac] ss:$16 sps:$4 sm:$0xff]  }
 0x2c9   : > { %4339 = vmatprep.subr.bf16.mxu1 %v7586_v38  ;;  %4229 = vmatpush1.bf16.msra.mxu0 %v7617_v33  ;;  %v7665_v38 = vld [vmem:[#allocation15 + $0x4a0] ss:$16 sps:$4 sm:$0xff]   ;;  %v7668_v33 = vld [vmem:[#allocation15 + $0x4a8] ss:$16 sps:$4 sm:$0xff]  }
 0x2ca   : > { %4230 = vmatprep.subr.bf16.mxu0 %v7625_v39  ;;  %v7673_v39 = vld [vmem:[#allocation15 + $0x4c4] ss:$16 sps:$4 sm:$0xff]  }
 0x2cc   : > { %4340 = vmatpush1.bf16.msra.mxu1 %v7584_v40  ;;  %v7676_v40 = vld [vmem:[#allocation15 + $0x4cc] ss:$16 sps:$4 sm:$0xff]  }
 0x2cd   : > { %4341 = vmatprep.subr.bf16.mxu1 %v7592_v41  ;;  %4231 = vmatpush1.bf16.msra.mxu0 %v7623_v42  ;;  %v7671_v41 = vld [vmem:[#allocation15 + $0x4c0] ss:$16 sps:$4 sm:$0xff]   ;;  %v7674_v42 = vld [vmem:[#allocation15 + $0x4c8] ss:$16 sps:$4 sm:$0xff]  }
 0x2ce   : > { %4232 = vmatprep.subr.bf16.mxu0 %v7631_v43  ;;  %v7679_v43 = vld [vmem:[#allocation15 + $0x4e4] ss:$16 sps:$4 sm:$0xff]  }
 0x2d0   : > { %4342 = vmatpush1.bf16.msra.mxu1 %v7590_v44  ;;  %v7682_v44 = vld [vmem:[#allocation15 + $0x4ec] ss:$16 sps:$4 sm:$0xff]  }
 0x2d1   : > { %4343 = vmatprep.subr.bf16.mxu1 %v7598_v45  ;;  %4233 = vmatpush1.bf16.msra.mxu0 %v7629_v46  ;;  %v7677_v45 = vld [vmem:[#allocation15 + $0x4e0] ss:$16 sps:$4 sm:$0xff]   ;;  %v7680_v46 = vld [vmem:[#allocation15 + $0x4e8] ss:$16 sps:$4 sm:$0xff]  }
 0x2d2   : > { %4243 = vmatprep.subr.bf16.mxu0 %v7637_v5  ;;  %v7685_v5 = vld [vmem:[#allocation15 + $0x504] ss:$16 sps:$4 sm:$0xff]  }
 0x2d4   : > { %4344 = vmatpush1.bf16.msra.mxu1 %v7596_v47  ;;  %v7688_v47 = vld [vmem:[#allocation15 + $0x50c] ss:$16 sps:$4 sm:$0xff]  }
 0x2d5   : > { %4345 = vmatprep.subr.bf16.mxu1 %v7604_v16  ;;  %v1104_v16 = vsub.s32 5, %v8838_v48 }
 0x2d8   : > { %4346 = vmatpush1.bf16.msra.mxu1 %v7602_v49  ;;  %v7683_v49 = vld [vmem:[#allocation15 + $0x500] ss:$16 sps:$4 sm:$0xff]  }
 0x2d9   : > { %4347 = vmatprep.subr.bf16.mxu1 %v7610_v50  ;;  %v7686_v50 = vld [vmem:[#allocation15 + $0x508] ss:$16 sps:$4 sm:$0xff]  }
 0x2dc   : > { %4348 = vmatpush1.bf16.msra.mxu1 %v7608_v10  ;;  %v7691_v10 = vld [vmem:[#allocation15 + $0x524] ss:$16 sps:$4 sm:$0xff]  }
 0x2dd   : > { %4349 = vmatprep.subr.bf16.mxu1 %v7616_v52  ;;  %v7694_v52 = vld [vmem:[#allocation15 + $0x52c] ss:$16 sps:$4 sm:$0xff]  }
 0x2e0   : > { %4350 = vmatpush1.bf16.msra.mxu1 %v7614_v53  ;;  %v1105_v53 = vrot.slane %v8895_v15, %v1104_v16 }
 0x2e1   : > { %4351 = vmatprep.subr.bf16.mxu1 %v7622_v54  ;;  %v7689_v54 = vld [vmem:[#allocation15 + $0x520] ss:$16 sps:$4 sm:$0xff]  }
 0x2e4   : > { %4352 = vmatpush1.bf16.msra.mxu1 %v7620_v55  ;;  %v7692_v55 = vld [vmem:[#allocation15 + $0x528] ss:$16 sps:$4 sm:$0xff]  }
 0x2e5   : > { %4353 = vmatprep.subr.bf16.mxu1 %v7628_v56 }
 0x2e8   : > { %4354 = vmatpush1.bf16.msra.mxu1 %v7626_v57  ;;  %v7697_v57 = vld [vmem:[#allocation15 + $0x544] ss:$16 sps:$4 sm:$0xff]  }
 0x2e9   : > { %4355 = vmatprep.subr.bf16.mxu1 %v7634_v22  ;;  %v7700_v22 = vld [vmem:[#allocation15 + $0x54c] ss:$16 sps:$4 sm:$0xff]  }
 0x2ec   : > { %4356 = vmatpush1.bf16.msra.mxu1 %v7632_v58 }
 0x2ed   : > { %4366 = vmatprep.subr.bf16.mxu1 %v7640_v59 }
 0x30d   : > { %v2845_v1 = vpop.f32.mrb[12].mxu0 }
 0x30e   : > { %v6803_v26 = vadd.f32 %v2845_v1, %v1093_v62  ;;  %v2847_v3 = vpop.f32.mrb[13].mxu0 }
 0x30f   : > { %v6804_v4 = vadd.f32 %v2847_v3, %v1097_v63  ;;  %v2849_v7 = vpop.f32.mrb[14].mxu0  ;;  %v1100_v63 = vsub.s32 4, %v8838_v48  ;;  %v7698_v3 = vld [vmem:[#allocation15 + $0x548] ss:$16 sps:$4 sm:$0xff]  }
 0x310   : > { %7735 = vtanh.f32 %v6803_v26  ;;  %v2850_v8 = vpop.f32.mrb[15].mxu0  ;;  %v7695_v26 = vld [vmem:[#allocation15 + $0x540] ss:$16 sps:$4 sm:$0xff]   ;;  %v7706_v7 = vld [vmem:[#allocation15 + $0x56c] ss:$16 sps:$4 sm:$0xff]  }
 0x311   : > { %7737 = vtanh.f32 %v6804_v4  ;;  %v7703_v4 = vld [vmem:[#allocation15 + $0x564] ss:$16 sps:$4 sm:$0xff]   ;;  %v1101_v8 = vrot.slane %v8895_v15, %v1100_v63 }
 0x31a   : > { %v7736_v11 = vpop.eup %7735 }
 0x31b   : > { %v7738_v9 = vpop.eup %7737  ;;  %v2983_v6 = vpack.c.bf16 %v7736_v11, %v7736_v11  ;;  %v7701_v11 = vld [vmem:[#allocation15 + $0x560] ss:$16 sps:$4 sm:$0xff]  }
 0x31c   : > { %v2984_v12 = vpack.c.bf16 %v7738_v9, %v7738_v9  ;;  %v7704_v9 = vld [vmem:[#allocation15 + $0x568] ss:$16 sps:$4 sm:$0xff]  }
 0x31e   : > { %4234 = vmatprep.mubr.bf16.mxu0 %v2984_v12  ;;  %4357 = vmatprep.mubr.bf16.mxu1 %v2984_v12  ;;  %v7709_v12 = vld [vmem:[#allocation15 + $0x584] ss:$16 sps:$4 sm:$0xff]  }
 0x31f   : > { %4235 = vmatmul.mubr.bf16.vlgmr.msra.gmra.mrb[16].mxu0 %v2983_v6  ;;  %4358 = vmatmul.mubr.bf16.vlgmr.msra.gmra.mrb[8].mxu1 %v2983_v6  ;;  %v7707_v6 = vld [vmem:[#allocation15 + $0x580] ss:$16 sps:$4 sm:$0xff]  }
 0x320   : > { %4244 = vmatpush1.bf16.msra.mxu0 %v7635_v13  ;;  %4367 = vmatpush1.bf16.msra.mxu1 %v7638_v14  ;;  %v7712_v13 = vld [vmem:[#allocation15 + $0x58c] ss:$16 sps:$4 sm:$0xff]  }
 0x321   : > { %4245 = vmatprep.subr.bf16.mxu0 %v7643_v17  ;;  %4368 = vmatprep.subr.bf16.mxu1 %v7646_v18  ;;  %v7710_v17 = vld [vmem:[#allocation15 + $0x588] ss:$16 sps:$4 sm:$0xff]   ;;  %v7715_v18 = vld [vmem:[#allocation15 + $0x5a4] ss:$16 sps:$4 sm:$0xff]  }
 0x324   : > { %4246 = vmatpush1.bf16.msra.mxu0 %v7641_v19  ;;  %4369 = vmatpush1.bf16.msra.mxu1 %v7644_v20  ;;  %v7718_v19 = vld [vmem:[#allocation15 + $0x5ac] ss:$16 sps:$4 sm:$0xff]  }
 0x325   : > { %4247 = vmatprep.subr.bf16.mxu0 %v7649_v21  ;;  %4370 = vmatprep.subr.bf16.mxu1 %v7652_v23  ;;  %v7713_v21 = vld [vmem:[#allocation15 + $0x5a0] ss:$16 sps:$4 sm:$0xff]   ;;  %v7716_v23 = vld [vmem:[#allocation15 + $0x5a8] ss:$16 sps:$4 sm:$0xff]  }
 0x328   : > { %4248 = vmatpush1.bf16.msra.mxu0 %v7647_v24  ;;  %4371 = vmatpush1.bf16.msra.mxu1 %v7650_v25  ;;  %v7721_v24 = vld [vmem:[#allocation15 + $0x5c4] ss:$16 sps:$4 sm:$0xff]   ;;  %v7724_v25 = vld [vmem:[#allocation15 + $0x5cc] ss:$16 sps:$4 sm:$0xff]  }
 0x329   : > { %4249 = vmatprep.subr.bf16.mxu0 %v7655_v27  ;;  %4372 = vmatprep.subr.bf16.mxu1 %v7658_v28  ;;  %v7719_v27 = vld [vmem:[#allocation15 + $0x5c0] ss:$16 sps:$4 sm:$0xff]   ;;  %v7722_v28 = vld [vmem:[#allocation15 + $0x5c8] ss:$16 sps:$4 sm:$0xff]  }
 0x32c   : > { %4250 = vmatpush1.bf16.msra.mxu0 %v7653_v29  ;;  %4373 = vmatpush1.bf16.msra.mxu1 %v7656_v30  ;;  %v7727_v29 = vld [vmem:[#allocation15 + $0x5e4] ss:$16 sps:$4 sm:$0xff]   ;;  %v7730_v30 = vld [vmem:[#allocation15 + $0x5ec] ss:$16 sps:$4 sm:$0xff]  }
 0x32d   : > { %4251 = vmatprep.subr.bf16.mxu0 %v7661_v31  ;;  %4374 = vmatprep.subr.bf16.mxu1 %v7664_v34  ;;  %v7725_v31 = vld [vmem:[#allocation15 + $0x5e0] ss:$16 sps:$4 sm:$0xff]   ;;  %v7728_v34 = vld [vmem:[#allocation15 + $0x5e8] ss:$16 sps:$4 sm:$0xff]  }
 0x330   : > { %4252 = vmatpush1.bf16.msra.mxu0 %v7659_v35  ;;  %4375 = vmatpush1.bf16.msra.mxu1 %v7662_v36 }
 0x331   : > { %4253 = vmatprep.subr.bf16.mxu0 %v7667_v37  ;;  %4376 = vmatprep.subr.bf16.mxu1 %v7670_v32  ;;  %v3179_v37 = vld [vmem:[#allocation16] sm:$0xf] }
 0x332   : > { %v3184_v32 = vrot.slane %v3179_v37, %v8875_v0 }
 0x334   : > { %4254 = vmatpush1.bf16.msra.mxu0 %v7665_v38  ;;  %4377 = vmatpush1.bf16.msra.mxu1 %v7668_v33  ;;  %v3192_v38 = vrot.slane %v3179_v37, %v1092_v60  ;;  %v3188_v33 = vrot.slane %v3179_v37, %v8878_v2 }
 0x335   : > { %4255 = vmatprep.subr.bf16.mxu0 %v7673_v39  ;;  %4378 = vmatprep.subr.bf16.mxu1 %v7676_v40  ;;  %v3196_v39 = vrot.slane %v3179_v37, %v1096_v61 }
 0x338   : > { %4256 = vmatpush1.bf16.msra.mxu0 %v7671_v41  ;;  %4379 = vmatpush1.bf16.msra.mxu1 %v7674_v42 }
 0x339   : > { %4257 = vmatprep.subr.bf16.mxu0 %v7679_v43  ;;  %4380 = vmatprep.subr.bf16.mxu1 %v7682_v44 }
 0x33c   : > { %4258 = vmatpush1.bf16.msra.mxu0 %v7677_v45  ;;  %4381 = vmatpush1.bf16.msra.mxu1 %v7680_v46 }
 0x33d   : > { %4259 = vmatprep.subr.bf16.mxu0 %v7685_v5  ;;  %4382 = vmatprep.subr.bf16.mxu1 %v7688_v47 }
 0x340   : > { %4260 = vmatpush1.bf16.msra.mxu0 %v7683_v49  ;;  %4383 = vmatpush1.bf16.msra.mxu1 %v7686_v50 }
 0x341   : > { %4261 = vmatprep.subr.bf16.mxu0 %v7691_v10  ;;  %4384 = vmatprep.subr.bf16.mxu1 %v7694_v52 }
 0x342   : > { %v2968_v56 = vpop.f32.mrb[4].mxu1 }
 0x343   : > { %v2970_v58 = vpop.f32.mrb[5].mxu1  ;;  %v6805_v14 = vadd.f32 %v2968_v56, %v1101_v8 }
 0x344   : > { %v6806_v59 = vadd.f32 %v2970_v58, %v1105_v53  ;;  %v2972_v62 = vpop.f32.mrb[6].mxu1  ;;  %4262 = vmatpush1.bf16.msra.mxu0 %v7689_v54  ;;  %4385 = vmatpush1.bf16.msra.mxu1 %v7692_v55 }
 0x345   : > { %v2973_v1 = vpop.f32.mrb[7].mxu1  ;;  %4263 = vmatprep.subr.bf16.mxu0 %v7697_v57  ;;  %4386 = vmatprep.subr.bf16.mxu1 %v7700_v22 }
 0x346   : > { %7739 = vtanh.f32 %v6806_v59 }
 0x347   : > { %7741 = vtanh.f32 %v6805_v14 }
 0x348   : > { %4264 = vmatpush1.bf16.msra.mxu0 %v7695_v26  ;;  %4387 = vmatpush1.bf16.msra.mxu1 %v7698_v3 }
 0x349   : > { %4265 = vmatprep.subr.bf16.mxu0 %v7703_v4  ;;  %4388 = vmatprep.subr.bf16.mxu1 %v7706_v7 }
 0x34c   : > { %4266 = vmatpush1.bf16.msra.mxu0 %v7701_v11  ;;  %4389 = vmatpush1.bf16.msra.mxu1 %v7704_v9 }
 0x34d   : > { %4267 = vmatprep.subr.bf16.mxu0 %v7709_v12  ;;  %4390 = vmatprep.subr.bf16.mxu1 %v7712_v13 }
 0x350   : > { %v7740_v20 = vpop.eup %7739  ;;  %4268 = vmatpush1.bf16.msra.mxu0 %v7707_v6  ;;  %4391 = vmatpush1.bf16.msra.mxu1 %v7710_v17 }
 0x351   : > { %v2986_v15 = vpack.c.bf16 %v7740_v20, %v7740_v20  ;;  %4269 = vmatprep.subr.bf16.mxu0 %v7715_v18  ;;  %4392 = vmatprep.subr.bf16.mxu1 %v7718_v19  ;;  %v7742_v35 = vpop.eup %7741 }
 0x352   : > { %v2985_v36 = vpack.c.bf16 %v7742_v35, %v7742_v35 }
 0x353   : > { %4275 = vmatprep.mubr.bf16.mxu0 %v2986_v15  ;;  %4398 = vmatprep.mubr.bf16.mxu1 %v2986_v15 }
 0x354   : > { %4270 = vmatpush1.bf16.msra.mxu0 %v7713_v21  ;;  %4393 = vmatpush1.bf16.msra.mxu1 %v7716_v23 }
 0x355   : > { %4271 = vmatprep.subr.bf16.mxu0 %v7721_v24  ;;  %4394 = vmatprep.subr.bf16.mxu1 %v7724_v25 }
 0x358   : > { %4272 = vmatpush1.bf16.msra.mxu0 %v7719_v27  ;;  %4395 = vmatpush1.bf16.msra.mxu1 %v7722_v28 }
 0x359   : > { %4273 = vmatprep.subr.bf16.mxu0 %v7727_v29  ;;  %4396 = vmatprep.subr.bf16.mxu1 %v7730_v30 }
 0x35c   : > { %4274 = vmatpush1.bf16.msra.mxu0 %v7725_v31  ;;  %4397 = vmatpush1.bf16.msra.mxu1 %v7728_v34 }
 0x35f   : > { %4276 = vmatmul.mubr.bf16.vlgmr.msra.gmra.mrb[16].mxu0 %v2985_v36  ;;  %4399 = vmatmul.mubr.bf16.vlgmr.msra.gmra.mrb[8].mxu1 %v2985_v36 }
 0x432   : > { %v4277_v40 = vpop.f32.mrb[16].mxu0  ;;  %v4400_v41 = vpop.f32.mrb[8].mxu1 }
 0x433   : > { %v6807_v42 = vadd.f32 %v4277_v40, %v3184_v32  ;;  %v6809_v43 = vadd.f32 %v4400_v41, %v3192_v38  ;;  %v4279_v44 = vpop.f32.mrb[17].mxu0  ;;  %v4402_v45 = vpop.f32.mrb[9].mxu1 }
 0x434   : > { %v6808_v46 = vadd.f32 %v4279_v44, %v3188_v33  ;;  %v6810_v5 = vadd.f32 %v4402_v45, %v3196_v39  ;;  %v4281_v47 = vpop.f32.mrb[18].mxu0  ;;  %v4404_v16 = vpop.f32.mrb[10].mxu1 }
 0x435   : > { %v4282_v49 = vpop.f32.mrb[19].mxu0  ;;  %v4405_v0 = vpop.f32.mrb[11].mxu1 }
 0x436   : > { %v4411_v50 = vcombine.low %v6807_v42, %v6808_v46  ;;  %v4412_v10 = vcombine.low %v6809_v43, %v6810_v5 }
 0x438   : > { %v4419_v60 = vrot.slane %v4411_v50, %v8883_v51  ;;  %v4426_v2 = vrot.slane %v4412_v10, %v8883_v51 }
 0x43a   : > { %v4427_v48 = vcombine.low %v4419_v60, %v4426_v2 }
 0x43c   : > { %4429 = vst [vmem:[#allocation3] sm:$0xff] %v4427_v48 }
 0x43d PF: > { %v7743_v61 = vld [vmem:[%s8799_s25 + $0x4] ss:$16 sps:$4 sm:$0xff]   ;;  %v7745_v52 = vld [vmem:[%s8799_s25] ss:$16 sps:$4 sm:$0xff]   ;;  %v7790_v1 = vld [vmem:[%s8799_s25 + $0xc] ss:$16 sps:$4 sm:$0xff]  }
 0x43e   : > { %4850 = vmatprep.subr.bf16.mxu0 %v7743_v61  ;;  %v7746_v53 = vld [vmem:[%s8799_s25 + $0x24] ss:$16 sps:$4 sm:$0xff]   ;;  %v7748_v51 = vld [vmem:[%s8799_s25 + $0x20] ss:$16 sps:$4 sm:$0xff]   ;;  %v7793_v3 = vld [vmem:[%s8799_s25 + $0x8] ss:$16 sps:$4 sm:$0xff]   ;;  %4891 = vmatprep.subr.bf16.mxu1 %v7790_v1 }
 0x43f   : > { %4851 = vmatpush1.bf16.msra.mxu0 %v7745_v52  ;;  %v7749_v54 = vld [vmem:[%s8799_s25 + $0x44] ss:$16 sps:$4 sm:$0xff]   ;;  %v7751_v55 = vld [vmem:[%s8799_s25 + $0x40] ss:$16 sps:$4 sm:$0xff]   ;;  %4892 = vmatpush1.bf16.msra.mxu1 %v7793_v3  ;;  %v7794_v11 = vld [vmem:[%s8799_s25 + $0x2c] ss:$16 sps:$4 sm:$0xff]  }
 0x440   : > { %4852 = vmatprep.subr.bf16.mxu0 %v7746_v53  ;;  %v7752_v56 = vld [vmem:[%s8799_s25 + $0x64] ss:$16 sps:$4 sm:$0xff]   ;;  %v7754_v57 = vld [vmem:[%s8799_s25 + $0x60] ss:$16 sps:$4 sm:$0xff]   ;;  %v7796_v9 = vld [vmem:[%s8799_s25 + $0x28] ss:$16 sps:$4 sm:$0xff]   ;;  %4893 = vmatprep.subr.bf16.mxu1 %v7794_v11 }
 0x441   : > { %v7755_v22 = vld [vmem:[%s8799_s25 + $0x84] ss:$16 sps:$4 sm:$0xff]   ;;  %v7757_v58 = vld [vmem:[%s8799_s25 + $0x80] ss:$16 sps:$4 sm:$0xff]   ;;  %v7797_v13 = vld [vmem:[%s8799_s25 + $0x4c] ss:$16 sps:$4 sm:$0xff]  }
 0x442   : > { %v7758_v59 = vld [vmem:[%s8799_s25 + $0xa4] ss:$16 sps:$4 sm:$0xff]   ;;  %v7760_v62 = vld [vmem:[%s8799_s25 + $0xa0] ss:$16 sps:$4 sm:$0xff]   ;;  %v7799_v17 = vld [vmem:[%s8799_s25 + $0x48] ss:$16 sps:$4 sm:$0xff]  }
 0x443   : > { %4853 = vmatpush1.bf16.msra.mxu0 %v7748_v51  ;;  %v7761_v63 = vld [vmem:[%s8799_s25 + $0xc4] ss:$16 sps:$4 sm:$0xff]   ;;  %v7763_v26 = vld [vmem:[%s8799_s25 + $0xc0] ss:$16 sps:$4 sm:$0xff]   ;;  %4894 = vmatpush1.bf16.msra.mxu1 %v7796_v9  ;;  %v7800_v18 = vld [vmem:[%s8799_s25 + $0x6c] ss:$16 sps:$4 sm:$0xff]  }
 0x444   : > { %4854 = vmatprep.subr.bf16.mxu0 %v7749_v54  ;;  %v8939_v4 = vld.sshfl [vmem:[#allocation2] sm:$0x33 pattern:$0x76325410]  ;;  %4895 = vmatprep.subr.bf16.mxu1 %v7797_v13  ;;  %v7802_v15 = vld [vmem:[%s8799_s25 + $0x68] ss:$16 sps:$4 sm:$0xff]  }
 0x445   : > { %v7764_v7 = vld [vmem:[%s8799_s25 + $0xe4] ss:$16 sps:$4 sm:$0xff]   ;;  %v4439_v8 = vcombine.high %v8939_v4, %v8939_v4  ;;  %v7766_v14 = vld [vmem:[%s8799_s25 + $0xe0] ss:$16 sps:$4 sm:$0xff]   ;;  %v7803_v21 = vld [vmem:[%s8799_s25 + $0x8c] ss:$16 sps:$4 sm:$0xff]   ;;  %v4442_v0 = vpack.c.bf16 %v8939_v4, %v8939_v4 }
 0x446   : > { %v7767_v6 = vld [vmem:[%s8799_s25 + $0x104] ss:$16 sps:$4 sm:$0xff]   ;;  %v7769_v19 = vld [vmem:[%s8799_s25 + $0x100] ss:$16 sps:$4 sm:$0xff]   ;;  %v7805_v25 = vld [vmem:[%s8799_s25 + $0x88] ss:$16 sps:$4 sm:$0xff]  }
 0x447   : > { %4855 = vmatpush1.bf16.msra.mxu0 %v7751_v55  ;;  %v4443_v12 = vpack.c.bf16 %v4439_v8, %v4439_v8  ;;  %v7770_v20 = vld [vmem:[%s8799_s25 + $0x124] ss:$16 sps:$4 sm:$0xff]   ;;  %4896 = vmatpush1.bf16.msra.mxu1 %v7799_v17  ;;  %v7772_v23 = vld [vmem:[%s8799_s25 + $0x120] ss:$16 sps:$4 sm:$0xff]   ;;  %v7806_v27 = vld [vmem:[%s8799_s25 + $0xac] ss:$16 sps:$4 sm:$0xff]  }
 0x448   : > { %4856 = vmatprep.subr.bf16.mxu0 %v7752_v56  ;;  %4897 = vmatprep.subr.bf16.mxu1 %v7800_v18  ;;  %v7773_v24 = vld [vmem:[%s8799_s25 + $0x144] ss:$16 sps:$4 sm:$0xff]   ;;  %v7775_v28 = vld [vmem:[%s8799_s25 + $0x140] ss:$16 sps:$4 sm:$0xff]   ;;  %v7808_v30 = vld [vmem:[%s8799_s25 + $0xa8] ss:$16 sps:$4 sm:$0xff]  }
 0x449   : > { %4882 = vmatprep.mubr.bf16.mxu0 %v4443_v12  ;;  %4923 = vmatprep.mubr.bf16.mxu1 %v4443_v12  ;;  %v7776_v29 = vld [vmem:[%s8799_s25 + $0x164] ss:$16 sps:$4 sm:$0xff]   ;;  %v7809_v31 = vld [vmem:[%s8799_s25 + $0xcc] ss:$16 sps:$4 sm:$0xff]   ;;  %v7778_v34 = vld [vmem:[%s8799_s25 + $0x160] ss:$16 sps:$4 sm:$0xff]  }
 0x44a   : > { %v7779_v35 = vld [vmem:[%s8799_s25 + $0x184] ss:$16 sps:$4 sm:$0xff]   ;;  %v7811_v36 = vld [vmem:[%s8799_s25 + $0xc8] ss:$16 sps:$4 sm:$0xff]   ;;  %v7812_v37 = vld [vmem:[%s8799_s25 + $0xec] ss:$16 sps:$4 sm:$0xff]  }
 0x44b   : > { %4857 = vmatpush1.bf16.msra.mxu0 %v7754_v57  ;;  %4898 = vmatpush1.bf16.msra.mxu1 %v7802_v15  ;;  %v7781_v32 = vld [vmem:[%s8799_s25 + $0x180] ss:$16 sps:$4 sm:$0xff]   ;;  %v7782_v38 = vld [vmem:[%s8799_s25 + $0x1a4] ss:$16 sps:$4 sm:$0xff]   ;;  %v7814_v33 = vld [vmem:[%s8799_s25 + $0xe8] ss:$16 sps:$4 sm:$0xff]  }
 0x44c   : > { %4858 = vmatprep.subr.bf16.mxu0 %v7755_v22  ;;  %4899 = vmatprep.subr.bf16.mxu1 %v7803_v21  ;;  %v7815_v39 = vld [vmem:[%s8799_s25 + $0x10c] ss:$16 sps:$4 sm:$0xff]   ;;  %v7784_v40 = vld [vmem:[%s8799_s25 + $0x1a0] ss:$16 sps:$4 sm:$0xff]   ;;  %v7785_v41 = vld [vmem:[%s8799_s25 + $0x1c4] ss:$16 sps:$4 sm:$0xff]  }
 0x44d   : > { %v7817_v42 = vld [vmem:[%s8799_s25 + $0x108] ss:$16 sps:$4 sm:$0xff]   ;;  %v7818_v43 = vld [vmem:[%s8799_s25 + $0x12c] ss:$16 sps:$4 sm:$0xff]   ;;  %v7787_v44 = vld [vmem:[%s8799_s25 + $0x1c0] ss:$16 sps:$4 sm:$0xff]  }
 0x44e   : > { %v7788_v45 = vld [vmem:[%s8799_s25 + $0x1e4] ss:$16 sps:$4 sm:$0xff]   ;;  %v7820_v46 = vld [vmem:[%s8799_s25 + $0x128] ss:$16 sps:$4 sm:$0xff]   ;;  %v7821_v5 = vld [vmem:[%s8799_s25 + $0x14c] ss:$16 sps:$4 sm:$0xff]  }
 0x44f   : > { %4859 = vmatpush1.bf16.msra.mxu0 %v7757_v58  ;;  %4900 = vmatpush1.bf16.msra.mxu1 %v7805_v25  ;;  %v7792_v47 = vld [vmem:[%s8799_s25 + $0x1e0] ss:$16 sps:$4 sm:$0xff]   ;;  %v7823_v49 = vld [vmem:[%s8799_s25 + $0x148] ss:$16 sps:$4 sm:$0xff]   ;;  %v7824_v50 = vld [vmem:[%s8799_s25 + $0x16c] ss:$16 sps:$4 sm:$0xff]  }
 0x450   : > { %4860 = vmatprep.subr.bf16.mxu0 %v7758_v59  ;;  %4901 = vmatprep.subr.bf16.mxu1 %v7806_v27  ;;  %v7841_v16 = vld [vmem:[%s8815_s16 + $0x4] ss:$16 sps:$4 sm:$0xff]   ;;  %v7839_v10 = vld [vmem:[%s8815_s16] ss:$16 sps:$4 sm:$0xff]   ;;  %v7826_v2 = vld [vmem:[%s8799_s25 + $0x168] ss:$16 sps:$4 sm:$0xff]  }
 0x451   : > { %v7847_v60 = vld [vmem:[%s8815_s16 + $0x24] ss:$16 sps:$4 sm:$0xff]   ;;  %v7827_v48 = vld [vmem:[%s8799_s25 + $0x18c] ss:$16 sps:$4 sm:$0xff]   ;;  %v7829_v53 = vld [vmem:[%s8799_s25 + $0x188] ss:$16 sps:$4 sm:$0xff]  }
 0x452   : > { %v7845_v61 = vld [vmem:[%s8815_s16 + $0x20] ss:$16 sps:$4 sm:$0xff]   ;;  %v7853_v52 = vld [vmem:[%s8815_s16 + $0x44] ss:$16 sps:$4 sm:$0xff]   ;;  %v7832_v56 = vld [vmem:[%s8799_s25 + $0x1a8] ss:$16 sps:$4 sm:$0xff]  }
 0x453   : > { %4861 = vmatpush1.bf16.msra.mxu0 %v7760_v62  ;;  %4902 = vmatpush1.bf16.msra.mxu1 %v7808_v30  ;;  %v7830_v51 = vld [vmem:[%s8799_s25 + $0x1ac] ss:$16 sps:$4 sm:$0xff]   ;;  %v7859_v55 = vld [vmem:[%s8815_s16 + $0x64] ss:$16 sps:$4 sm:$0xff]   ;;  %v7835_v59 = vld [vmem:[%s8799_s25 + $0x1c8] ss:$16 sps:$4 sm:$0xff]  }
 0x454   : > { %4862 = vmatprep.subr.bf16.mxu0 %v7761_v63  ;;  %4903 = vmatprep.subr.bf16.mxu1 %v7809_v31  ;;  %v7851_v54 = vld [vmem:[%s8815_s16 + $0x40] ss:$16 sps:$4 sm:$0xff]   ;;  %v7865_v58 = vld [vmem:[%s8815_s16 + $0x84] ss:$16 sps:$4 sm:$0xff]   ;;  %v7838_v63 = vld [vmem:[%s8799_s25 + $0x1e8] ss:$16 sps:$4 sm:$0xff]  }
 0x455   : > { %v7833_v57 = vld [vmem:[%s8799_s25 + $0x1cc] ss:$16 sps:$4 sm:$0xff]   ;;  %v7871_v3 = vld [vmem:[%s8815_s16 + $0xa4] ss:$16 sps:$4 sm:$0xff]   ;;  %v7842_v8 = vld [vmem:[%s8815_s16 + $0x8] ss:$16 sps:$4 sm:$0xff]  }
 0x456   : > { %v7857_v22 = vld [vmem:[%s8815_s16 + $0x60] ss:$16 sps:$4 sm:$0xff]   ;;  %v7850_v11 = vld [vmem:[%s8815_s16 + $0x2c] ss:$16 sps:$4 sm:$0xff]   ;;  %v7883_v12 = vld [vmem:[%s8815_s16 + $0xe4] ss:$16 sps:$4 sm:$0xff]  }
 0x457   : > { %4863 = vmatpush1.bf16.msra.mxu0 %v7763_v26  ;;  %4904 = vmatpush1.bf16.msra.mxu1 %v7811_v36  ;;  %v7836_v62 = vld [vmem:[%s8799_s25 + $0x1ec] ss:$16 sps:$4 sm:$0xff]   ;;  %v7848_v13 = vld [vmem:[%s8815_s16 + $0x28] ss:$16 sps:$4 sm:$0xff]   ;;  %v7889_v17 = vld [vmem:[%s8815_s16 + $0x104] ss:$16 sps:$4 sm:$0xff]  }
 0x458   : > { %4864 = vmatprep.subr.bf16.mxu0 %v7764_v7  ;;  %4905 = vmatprep.subr.bf16.mxu1 %v7812_v37  ;;  %v7863_v1 = vld [vmem:[%s8815_s16 + $0x80] ss:$16 sps:$4 sm:$0xff]   ;;  %v7844_v26 = vld [vmem:[%s8815_s16 + $0xc] ss:$16 sps:$4 sm:$0xff]   ;;  %v7877_v7 = vld [vmem:[%s8815_s16 + $0xc4] ss:$16 sps:$4 sm:$0xff]  }
 0x459   : > { %v7869_v4 = vld [vmem:[%s8815_s16 + $0xa0] ss:$16 sps:$4 sm:$0xff]   ;;  %v7854_v18 = vld [vmem:[%s8815_s16 + $0x48] ss:$16 sps:$4 sm:$0xff]   ;;  %v7895_v15 = vld [vmem:[%s8815_s16 + $0x124] ss:$16 sps:$4 sm:$0xff]  }
 0x45a   : > { %v7875_v9 = vld [vmem:[%s8815_s16 + $0xc0] ss:$16 sps:$4 sm:$0xff]   ;;  %v7860_v21 = vld [vmem:[%s8815_s16 + $0x68] ss:$16 sps:$4 sm:$0xff]   ;;  %v7901_v25 = vld [vmem:[%s8815_s16 + $0x144] ss:$16 sps:$4 sm:$0xff]  }
 0x45b   : > { %4865 = vmatpush1.bf16.msra.mxu0 %v7766_v14  ;;  %4906 = vmatpush1.bf16.msra.mxu1 %v7814_v33  ;;  %v7856_v14 = vld [vmem:[%s8815_s16 + $0x4c] ss:$16 sps:$4 sm:$0xff]   ;;  %v7866_v27 = vld [vmem:[%s8815_s16 + $0x88] ss:$16 sps:$4 sm:$0xff]   ;;  %v7907_v30 = vld [vmem:[%s8815_s16 + $0x164] ss:$16 sps:$4 sm:$0xff]  }
 0x45c   : > { %4866 = vmatprep.subr.bf16.mxu0 %v7767_v6  ;;  %4907 = vmatprep.subr.bf16.mxu1 %v7815_v39  ;;  %v7881_v6 = vld [vmem:[%s8815_s16 + $0xe0] ss:$16 sps:$4 sm:$0xff]   ;;  %v7872_v31 = vld [vmem:[%s8815_s16 + $0xa8] ss:$16 sps:$4 sm:$0xff]   ;;  %v7913_v36 = vld [vmem:[%s8815_s16 + $0x184] ss:$16 sps:$4 sm:$0xff]  }
 0x45d   : > { %v7878_v37 = vld [vmem:[%s8815_s16 + $0xc8] ss:$16 sps:$4 sm:$0xff]   ;;  %v7919_v33 = vld [vmem:[%s8815_s16 + $0x1a4] ss:$16 sps:$4 sm:$0xff]   ;;  %s9272_s18 = sld [smem:[#allocation29_spill]] }
 0x45e   : > { %v7884_v39 = vld [vmem:[%s8815_s16 + $0xe8] ss:$16 sps:$4 sm:$0xff]  }
 0x45f   : > { %4867 = vmatpush1.bf16.msra.mxu0 %v7769_v19  ;;  %4908 = vmatpush1.bf16.msra.mxu1 %v7817_v42  ;;  %v7862_v19 = vld [vmem:[%s8815_s16 + $0x6c] ss:$16 sps:$4 sm:$0xff]   ;;  %v7890_v42 = vld [vmem:[%s8815_s16 + $0x108] ss:$16 sps:$4 sm:$0xff]  }
 0x460   : > { %4868 = vmatprep.subr.bf16.mxu0 %v7770_v20  ;;  %4909 = vmatprep.subr.bf16.mxu1 %v7818_v43  ;;  %v7887_v20 = vld [vmem:[%s8815_s16 + $0x100] ss:$16 sps:$4 sm:$0xff]   ;;  %v7898_v43 = vld [vmem:[%s8815_s16 + $0x12c] ss:$16 sps:$4 sm:$0xff]  }
 0x463   : > { %4869 = vmatpush1.bf16.msra.mxu0 %v7772_v23  ;;  %4910 = vmatpush1.bf16.msra.mxu1 %v7820_v46  ;;  %v7868_v23 = vld [vmem:[%s8815_s16 + $0x8c] ss:$16 sps:$4 sm:$0xff]   ;;  %v7902_v46 = vld [vmem:[%s8815_s16 + $0x148] ss:$16 sps:$4 sm:$0xff]   ;;  %p6790_p12 = scmp.ne.s32.totalorder %s9272_s18, 3 }
 0x464   : > { %4870 = vmatprep.subr.bf16.mxu0 %v7773_v24  ;;  %4911 = vmatprep.subr.bf16.mxu1 %v7821_v5  ;;  %v7893_v24 = vld [vmem:[%s8815_s16 + $0x120] ss:$16 sps:$4 sm:$0xff]   ;;  %v7910_v5 = vld [vmem:[%s8815_s16 + $0x16c] ss:$16 sps:$4 sm:$0xff]  }
 0x467   : > { %4871 = vmatpush1.bf16.msra.mxu0 %v7775_v28  ;;  %4912 = vmatpush1.bf16.msra.mxu1 %v7823_v49  ;;  %v7874_v28 = vld [vmem:[%s8815_s16 + $0xac] ss:$16 sps:$4 sm:$0xff]   ;;  %v7914_v49 = vld [vmem:[%s8815_s16 + $0x188] ss:$16 sps:$4 sm:$0xff]  }
 0x468   : > { %4872 = vmatprep.subr.bf16.mxu0 %v7776_v29  ;;  %4913 = vmatprep.subr.bf16.mxu1 %v7824_v50  ;;  %v7899_v29 = vld [vmem:[%s8815_s16 + $0x140] ss:$16 sps:$4 sm:$0xff]   ;;  %v7920_v50 = vld [vmem:[%s8815_s16 + $0x1a8] ss:$16 sps:$4 sm:$0xff]  }
 0x46b   : > { %4873 = vmatpush1.bf16.msra.mxu0 %v7778_v34  ;;  %4914 = vmatpush1.bf16.msra.mxu1 %v7826_v2  ;;  %v7880_v34 = vld [vmem:[%s8815_s16 + $0xcc] ss:$16 sps:$4 sm:$0xff]   ;;  %v7923_v2 = vld [vmem:[%s8815_s16 + $0x1c0] ss:$16 sps:$4 sm:$0xff]  }
 0x46c   : > { %4874 = vmatprep.subr.bf16.mxu0 %v7779_v35  ;;  %4915 = vmatprep.subr.bf16.mxu1 %v7827_v48  ;;  %v7905_v35 = vld [vmem:[%s8815_s16 + $0x160] ss:$16 sps:$4 sm:$0xff]   ;;  %v7926_v48 = vld [vmem:[%s8815_s16 + $0x1c8] ss:$16 sps:$4 sm:$0xff]  }
 0x46f   : > { %4875 = vmatpush1.bf16.msra.mxu0 %v7781_v32  ;;  %4916 = vmatpush1.bf16.msra.mxu1 %v7829_v53  ;;  %v7886_v32 = vld [vmem:[%s8815_s16 + $0xec] ss:$16 sps:$4 sm:$0xff]   ;;  %v7929_v53 = vld [vmem:[%s8815_s16 + $0x1e0] ss:$16 sps:$4 sm:$0xff]  }
 0x470   : > { %4876 = vmatprep.subr.bf16.mxu0 %v7782_v38  ;;  %4917 = vmatprep.subr.bf16.mxu1 %v7830_v51  ;;  %v7911_v38 = vld [vmem:[%s8815_s16 + $0x180] ss:$16 sps:$4 sm:$0xff]   ;;  %v7932_v51 = vld [vmem:[%s8815_s16 + $0x1e8] ss:$16 sps:$4 sm:$0xff]  }
 0x473   : > { %4877 = vmatpush1.bf16.msra.mxu0 %v7784_v40  ;;  %4918 = vmatpush1.bf16.msra.mxu1 %v7832_v56  ;;  %v7892_v40 = vld [vmem:[%s8815_s16 + $0x10c] ss:$16 sps:$4 sm:$0xff]   ;;  %v4510_v56 = vlaneseq }
 0x474   : > { %4878 = vmatprep.subr.bf16.mxu0 %v7785_v41  ;;  %4919 = vmatprep.subr.bf16.mxu1 %v7833_v57  ;;  %v7917_v41 = vld [vmem:[%s8815_s16 + $0x1a0] ss:$16 sps:$4 sm:$0xff]  }
 0x475   : > { %v9059_v57 = vshrl.u32 %v4510_v56, 7  ;;  %v7997_v56 = vld [vmem:[%s8815_s16 + $0x344] ss:$16 sps:$4 sm:$0xff]  }
 0x477   : > { %4879 = vmatpush1.bf16.msra.mxu0 %v7787_v44  ;;  %4920 = vmatpush1.bf16.msra.mxu1 %v7835_v59  ;;  %v7896_v44 = vld [vmem:[%s8815_s16 + $0x128] ss:$16 sps:$4 sm:$0xff]   ;;  %v4516_v59 = vsub.s32 1, %v9059_v57 }
 0x478   : > { %4880 = vmatprep.subr.bf16.mxu0 %v7788_v45  ;;  %4921 = vmatprep.subr.bf16.mxu1 %v7836_v62  ;;  %v7904_v45 = vld [vmem:[%s8815_s16 + $0x14c] ss:$16 sps:$4 sm:$0xff]  }
 0x47b   : > { %4881 = vmatpush1.bf16.msra.mxu0 %v7792_v47  ;;  %4922 = vmatpush1.bf16.msra.mxu1 %v7838_v63  ;;  %v7908_v47 = vld [vmem:[%s8815_s16 + $0x168] ss:$16 sps:$4 sm:$0xff]  }
 0x47c   : > { %5709 = vmatprep.subr.bf16.mxu0 %v7841_v16  ;;  %5791 = vmatprep.subr.bf16.mxu1 %v7844_v26  ;;  %v7916_v16 = vld [vmem:[%s8815_s16 + $0x18c] ss:$16 sps:$4 sm:$0xff]  }
 0x47e   : > { %4883 = vmatmul.mubr.bf16.vlgmr.msra.gmra.mrb[0].mxu0 %v4442_v0  ;;  %4924 = vmatmul.mubr.bf16.vlgmr.msra.gmra.mrb[0].mxu1 %v4442_v0  ;;  %v7922_v0 = vld [vmem:[%s8815_s16 + $0x1ac] ss:$16 sps:$4 sm:$0xff]  }
 0x47f   : > { %5710 = vmatpush1.bf16.msra.mxu0 %v7839_v10  ;;  %5792 = vmatpush1.bf16.msra.mxu1 %v7842_v8  ;;  %v7925_v10 = vld [vmem:[%s8815_s16 + $0x1c4] ss:$16 sps:$4 sm:$0xff]  }
 0x480   : > { %5711 = vmatprep.subr.bf16.mxu0 %v7847_v60  ;;  %5793 = vmatprep.subr.bf16.mxu1 %v7850_v11  ;;  %v7928_v60 = vld [vmem:[%s8815_s16 + $0x1cc] ss:$16 sps:$4 sm:$0xff]  }
 0x483   : > { %5712 = vmatpush1.bf16.msra.mxu0 %v7845_v61  ;;  %5794 = vmatpush1.bf16.msra.mxu1 %v7848_v13  ;;  %v7931_v61 = vld [vmem:[%s8815_s16 + $0x1e4] ss:$16 sps:$4 sm:$0xff]   ;;  %v7935_v13 = vld [vmem:[%s8815_s16 + $0x200] ss:$16 sps:$4 sm:$0xff]  }
 0x484   : > { %5713 = vmatprep.subr.bf16.mxu0 %v7853_v52  ;;  %5795 = vmatprep.subr.bf16.mxu1 %v7856_v14  ;;  %v7934_v52 = vld [vmem:[%s8815_s16 + $0x1ec] ss:$16 sps:$4 sm:$0xff]   ;;  %v7938_v14 = vld [vmem:[%s8815_s16 + $0x208] ss:$16 sps:$4 sm:$0xff]  }
 0x487   : > { %5714 = vmatpush1.bf16.msra.mxu0 %v7851_v54  ;;  %5796 = vmatpush1.bf16.msra.mxu1 %v7854_v18  ;;  %v7937_v54 = vld [vmem:[%s8815_s16 + $0x204] ss:$16 sps:$4 sm:$0xff]   ;;  %v7946_v18 = vld [vmem:[%s8815_s16 + $0x22c] ss:$16 sps:$4 sm:$0xff]  }
 0x488   : > { %5715 = vmatprep.subr.bf16.mxu0 %v7859_v55  ;;  %5797 = vmatprep.subr.bf16.mxu1 %v7862_v19  ;;  %v7940_v55 = vld [vmem:[%s8815_s16 + $0x20c] ss:$16 sps:$4 sm:$0xff]   ;;  %v7941_v19 = vld [vmem:[%s8815_s16 + $0x220] ss:$16 sps:$4 sm:$0xff]  }
 0x48b   : > { %5716 = vmatpush1.bf16.msra.mxu0 %v7857_v22  ;;  %5798 = vmatpush1.bf16.msra.mxu1 %v7860_v21  ;;  %v4512_v22 = vsub.s32 0, %v9059_v57  ;;  %v7952_v21 = vld [vmem:[%s8815_s16 + $0x24c] ss:$16 sps:$4 sm:$0xff]  }
 0x48c   : > { %5717 = vmatprep.subr.bf16.mxu0 %v7865_v58  ;;  %5799 = vmatprep.subr.bf16.mxu1 %v7868_v23  ;;  %v9063_v58 = vld [vmem:[%s8805_s3] sm:$0xf] }
 0x48d   : > { %v4513_v62 = vrot.slane %v9063_v58, %v4512_v22  ;;  %v4517_v63 = vrot.slane %v9063_v58, %v4516_v59  ;;  %v7947_v23 = vld [vmem:[%s8815_s16 + $0x240] ss:$16 sps:$4 sm:$0xff]   ;;  %v8000_v22 = vld [vmem:[%s8815_s16 + $0x34c] ss:$16 sps:$4 sm:$0xff]  }
 0x48e   : > { %v7995_v59 = vld [vmem:[%s8815_s16 + $0x340] ss:$16 sps:$4 sm:$0xff]  }
 0x48f   : > { %5718 = vmatpush1.bf16.msra.mxu0 %v7863_v1  ;;  %5800 = vmatpush1.bf16.msra.mxu1 %v7866_v27  ;;  %v7958_v27 = vld [vmem:[%s8815_s16 + $0x26c] ss:$16 sps:$4 sm:$0xff]  }
 0x490   : > { %5719 = vmatprep.subr.bf16.mxu0 %v7871_v3  ;;  %5801 = vmatprep.subr.bf16.mxu1 %v7874_v28  ;;  %v4524_v28 = vsub.s32 3, %v9059_v57 }
 0x493   : > { %5720 = vmatpush1.bf16.msra.mxu0 %v7869_v4  ;;  %5802 = vmatpush1.bf16.msra.mxu1 %v7872_v31  ;;  %v7961_v31 = vld [vmem:[%s8815_s16 + $0x284] ss:$16 sps:$4 sm:$0xff]  }
 0x494   : > { %5721 = vmatprep.subr.bf16.mxu0 %v7877_v7  ;;  %5803 = vmatprep.subr.bf16.mxu1 %v7880_v34  ;;  %v7964_v34 = vld [vmem:[%s8815_s16 + $0x28c] ss:$16 sps:$4 sm:$0xff]  }
 0x497   : > { %5722 = vmatpush1.bf16.msra.mxu0 %v7875_v9  ;;  %5804 = vmatpush1.bf16.msra.mxu1 %v7878_v37  ;;  %v7962_v37 = vld [vmem:[%s8815_s16 + $0x288] ss:$16 sps:$4 sm:$0xff]  }
 0x498   : > { %5723 = vmatprep.subr.bf16.mxu0 %v7883_v12  ;;  %5805 = vmatprep.subr.bf16.mxu1 %v7886_v32 }
 0x49b   : > { %5724 = vmatpush1.bf16.msra.mxu0 %v7881_v6  ;;  %5806 = vmatpush1.bf16.msra.mxu1 %v7884_v39 }
 0x49c   : > { %5725 = vmatprep.subr.bf16.mxu0 %v7889_v17  ;;  %5807 = vmatprep.subr.bf16.mxu1 %v7892_v40  ;;  %v7943_v17 = vld [vmem:[%s8815_s16 + $0x224] ss:$16 sps:$4 sm:$0xff]  }
 0x49f   : > { %5726 = vmatpush1.bf16.msra.mxu0 %v7887_v20  ;;  %5808 = vmatpush1.bf16.msra.mxu1 %v7890_v42  ;;  %v7944_v20 = vld [vmem:[%s8815_s16 + $0x228] ss:$16 sps:$4 sm:$0xff]  }
 0x4a0   : > { %5727 = vmatprep.subr.bf16.mxu0 %v7895_v15  ;;  %5809 = vmatprep.subr.bf16.mxu1 %v7898_v43  ;;  %v7949_v15 = vld [vmem:[%s8815_s16 + $0x244] ss:$16 sps:$4 sm:$0xff]   ;;  %v7965_v43 = vld [vmem:[%s8815_s16 + $0x2a0] ss:$16 sps:$4 sm:$0xff]  }
 0x4a3   : > { %5728 = vmatpush1.bf16.msra.mxu0 %v7893_v24  ;;  %5810 = vmatpush1.bf16.msra.mxu1 %v7896_v44  ;;  %v7950_v24 = vld [vmem:[%s8815_s16 + $0x248] ss:$16 sps:$4 sm:$0xff]  }
 0x4a4   : > { %5729 = vmatprep.subr.bf16.mxu0 %v7901_v25  ;;  %5811 = vmatprep.subr.bf16.mxu1 %v7904_v45  ;;  %v7955_v25 = vld [vmem:[%s8815_s16 + $0x264] ss:$16 sps:$4 sm:$0xff]   ;;  %v7968_v44 = vld [vmem:[%s8815_s16 + $0x2a8] ss:$16 sps:$4 sm:$0xff]  }
 0x4a7   : > { %5730 = vmatpush1.bf16.msra.mxu0 %v7899_v29  ;;  %5812 = vmatpush1.bf16.msra.mxu1 %v7902_v46  ;;  %v7953_v29 = vld [vmem:[%s8815_s16 + $0x260] ss:$16 sps:$4 sm:$0xff]   ;;  %v7973_v46 = vld [vmem:[%s8815_s16 + $0x2c4] ss:$16 sps:$4 sm:$0xff]  }
 0x4a8   : > { %5731 = vmatprep.subr.bf16.mxu0 %v7907_v30  ;;  %5813 = vmatprep.subr.bf16.mxu1 %v7910_v5  ;;  %v7956_v30 = vld [vmem:[%s8815_s16 + $0x268] ss:$16 sps:$4 sm:$0xff]   ;;  %v7976_v5 = vld [vmem:[%s8815_s16 + $0x2cc] ss:$16 sps:$4 sm:$0xff]  }
 0x4ab   : > { %5732 = vmatpush1.bf16.msra.mxu0 %v7905_v35  ;;  %5814 = vmatpush1.bf16.msra.mxu1 %v7908_v47  ;;  %v4525_v35 = vrot.slane %v9063_v58, %v4524_v28 }
 0x4ac   : > { %5733 = vmatprep.subr.bf16.mxu0 %v7913_v36  ;;  %5815 = vmatprep.subr.bf16.mxu1 %v7916_v16  ;;  %v7959_v36 = vld [vmem:[%s8815_s16 + $0x280] ss:$16 sps:$4 sm:$0xff]  }
 0x4ad   : > { %v7971_v16 = vld [vmem:[%s8815_s16 + $0x2c0] ss:$16 sps:$4 sm:$0xff]  }
 0x4af   : > { %5734 = vmatpush1.bf16.msra.mxu0 %v7911_v38  ;;  %5816 = vmatpush1.bf16.msra.mxu1 %v7914_v49  ;;  %v7967_v38 = vld [vmem:[%s8815_s16 + $0x2a4] ss:$16 sps:$4 sm:$0xff]   ;;  %v7974_v49 = vld [vmem:[%s8815_s16 + $0x2c8] ss:$16 sps:$4 sm:$0xff]  }
 0x4b0   : > { %5735 = vmatprep.subr.bf16.mxu0 %v7919_v33  ;;  %5817 = vmatprep.subr.bf16.mxu1 %v7922_v0  ;;  %v7970_v33 = vld [vmem:[%s8815_s16 + $0x2ac] ss:$16 sps:$4 sm:$0xff]   ;;  %v7979_v0 = vld [vmem:[%s8815_s16 + $0x2e4] ss:$16 sps:$4 sm:$0xff]  }
 0x4b3   : > { %5736 = vmatpush1.bf16.msra.mxu0 %v7917_v41  ;;  %5818 = vmatpush1.bf16.msra.mxu1 %v7920_v50  ;;  %v7982_v50 = vld [vmem:[%s8815_s16 + $0x2ec] ss:$16 sps:$4 sm:$0xff]  }
 0x4b4   : > { %5737 = vmatprep.subr.bf16.mxu0 %v7925_v10  ;;  %5819 = vmatprep.subr.bf16.mxu1 %v7928_v60  ;;  %v7977_v10 = vld [vmem:[%s8815_s16 + $0x2e0] ss:$16 sps:$4 sm:$0xff]   ;;  %v7980_v60 = vld [vmem:[%s8815_s16 + $0x2e8] ss:$16 sps:$4 sm:$0xff]  }
 0x4b7   : > { %5738 = vmatpush1.bf16.msra.mxu0 %v7923_v2  ;;  %5820 = vmatpush1.bf16.msra.mxu1 %v7926_v48  ;;  %v7985_v2 = vld [vmem:[%s8815_s16 + $0x304] ss:$16 sps:$4 sm:$0xff]   ;;  %v7988_v48 = vld [vmem:[%s8815_s16 + $0x30c] ss:$16 sps:$4 sm:$0xff]  }
 0x4b8   : > { %5739 = vmatprep.subr.bf16.mxu0 %v7931_v61  ;;  %5821 = vmatprep.subr.bf16.mxu1 %v7934_v52  ;;  %v7983_v61 = vld [vmem:[%s8815_s16 + $0x300] ss:$16 sps:$4 sm:$0xff]   ;;  %v7986_v52 = vld [vmem:[%s8815_s16 + $0x308] ss:$16 sps:$4 sm:$0xff]  }
 0x4bb   : > { %5740 = vmatpush1.bf16.msra.mxu0 %v7929_v53  ;;  %5822 = vmatpush1.bf16.msra.mxu1 %v7932_v51  ;;  %v7991_v53 = vld [vmem:[%s8815_s16 + $0x324] ss:$16 sps:$4 sm:$0xff]   ;;  %v7994_v51 = vld [vmem:[%s8815_s16 + $0x32c] ss:$16 sps:$4 sm:$0xff]  }
 0x4bc   : > { %5750 = vmatprep.subr.bf16.mxu0 %v7937_v54  ;;  %5832 = vmatprep.subr.bf16.mxu1 %v7940_v55  ;;  %v7989_v54 = vld [vmem:[%s8815_s16 + $0x320] ss:$16 sps:$4 sm:$0xff]   ;;  %v7992_v55 = vld [vmem:[%s8815_s16 + $0x328] ss:$16 sps:$4 sm:$0xff]  }
 0x551   : > { %v4884_v1 = vpop.f32.mrb[0].mxu0  ;;  %v9088_v32 = vpop.f32.mrb[0].mxu1 }
 0x552   : > { %v4885_v26 = vadd.f32 %v4884_v1, %v4513_v62  ;;  %v4886_v3 = vpop.f32.mrb[1].mxu0  ;;  %v4927_v39 = vpop.f32.mrb[1].mxu1  ;;  %v7998_v62 = vld [vmem:[%s8815_s16 + $0x348] ss:$16 sps:$4 sm:$0xff]   ;;  %v8006_v1 = vld [vmem:[%s8815_s16 + $0x36c] ss:$16 sps:$4 sm:$0xff]  }
 0x553   : > { %v4887_v4 = vadd.f32 %v4886_v3, %v4517_v63  ;;  %v4888_v7 = vpop.f32.mrb[2].mxu0  ;;  %v4928_v40 = vadd.f32 %v4927_v39, %v4525_v35  ;;  %v4929_v41 = vpop.f32.mrb[2].mxu1  ;;  %v8003_v63 = vld [vmem:[%s8815_s16 + $0x364] ss:$16 sps:$4 sm:$0xff]   ;;  %v8004_v3 = vld [vmem:[%s8815_s16 + $0x368] ss:$16 sps:$4 sm:$0xff]  }
 0x554   : > { %v4932_v8 = vmax.f32 %v4885_v26, 0.0  ;;  %v4889_v11 = vpop.f32.mrb[3].mxu0  ;;  %v4930_v42 = vpop.f32.mrb[3].mxu1  ;;  %v8001_v26 = vld [vmem:[%s8815_s16 + $0x360] ss:$16 sps:$4 sm:$0xff]  }
 0x555   : > { %v4933_v9 = vmax.f32 %v4887_v4, 0.0  ;;  %v4935_v45 = vmax.f32 %v4928_v40, 0.0  ;;  %v8009_v4 = vld [vmem:[%s8815_s16 + $0x384] ss:$16 sps:$4 sm:$0xff]   ;;  %v8012_v7 = vld [vmem:[%s8815_s16 + $0x38c] ss:$16 sps:$4 sm:$0xff]  }
 0x556   : > { %v4937_v6 = vpack.c.bf16 %v4932_v8, %v4932_v8  ;;  %v8007_v8 = vld [vmem:[%s8815_s16 + $0x380] ss:$16 sps:$4 sm:$0xff]   ;;  %v8010_v11 = vld [vmem:[%s8815_s16 + $0x388] ss:$16 sps:$4 sm:$0xff]  }
 0x557   : > { %v4938_v12 = vpack.c.bf16 %v4933_v9, %v4933_v9  ;;  %v4940_v47 = vpack.c.bf16 %v4935_v45, %v4935_v45  ;;  %v4520_v9 = vsub.s32 2, %v9059_v57  ;;  %v4936_v45 = vld [vmem:[#allocation3] sm:$0xff] }
 0x559   : > { %5741 = vmatprep.mubr.bf16.mxu0 %v4938_v12  ;;  %5823 = vmatprep.mubr.bf16.mxu1 %v4938_v12  ;;  %v8015_v12 = vld [vmem:[%s8815_s16 + $0x3a4] ss:$16 sps:$4 sm:$0xff]  }
 0x55a   : > { %5742 = vmatmul.mubr.bf16.vlgmr.msra.gmra.mrb[4].mxu0 %v4937_v6  ;;  %5824 = vmatmul.mubr.bf16.vlgmr.msra.gmra.mrb[4].mxu1 %v4937_v6  ;;  %v8016_v6 = vld [vmem:[%s8815_s16 + $0x3a8] ss:$16 sps:$4 sm:$0xff]  }
 0x55b   : > { %5751 = vmatpush1.bf16.msra.mxu0 %v7935_v13  ;;  %5833 = vmatpush1.bf16.msra.mxu1 %v7938_v14  ;;  %v8018_v13 = vld [vmem:[%s8815_s16 + $0x3ac] ss:$16 sps:$4 sm:$0xff]   ;;  %v8013_v14 = vld [vmem:[%s8815_s16 + $0x3a0] ss:$16 sps:$4 sm:$0xff]  }
 0x55c   : > { %5752 = vmatprep.subr.bf16.mxu0 %v7943_v17  ;;  %5834 = vmatprep.subr.bf16.mxu1 %v7946_v18  ;;  %v4521_v17 = vrot.slane %v9063_v58, %v4520_v9  ;;  %v8021_v18 = vld [vmem:[%s8815_s16 + $0x3c4] ss:$16 sps:$4 sm:$0xff]   ;;  %v8028_v58 = vld [vmem:[%s8815_s16 + $0x3e8] ss:$16 sps:$4 sm:$0xff]  }
 0x55d   : > { %5782 = vmatprep.mubr.bf16.mxu0 %v4940_v47  ;;  %5864 = vmatprep.mubr.bf16.mxu1 %v4940_v47 }
 0x55f   : > { %5753 = vmatpush1.bf16.msra.mxu0 %v7941_v19  ;;  %5835 = vmatpush1.bf16.msra.mxu1 %v7944_v20  ;;  %v8024_v19 = vld [vmem:[%s8815_s16 + $0x3cc] ss:$16 sps:$4 sm:$0xff]   ;;  %v8019_v20 = vld [vmem:[%s8815_s16 + $0x3c0] ss:$16 sps:$4 sm:$0xff]  }
 0x560   : > { %5754 = vmatprep.subr.bf16.mxu0 %v7949_v15  ;;  %5836 = vmatprep.subr.bf16.mxu1 %v7952_v21  ;;  %v8022_v15 = vld [vmem:[%s8815_s16 + $0x3c8] ss:$16 sps:$4 sm:$0xff]   ;;  %v4926_v21 = vadd.f32 %v9088_v32, %v4521_v17 }
 0x563   : > { %5755 = vmatpush1.bf16.msra.mxu0 %v7947_v23  ;;  %5837 = vmatpush1.bf16.msra.mxu1 %v7950_v24  ;;  %v8027_v23 = vld [vmem:[%s8815_s16 + $0x3e4] ss:$16 sps:$4 sm:$0xff]   ;;  %v8030_v24 = vld [vmem:[%s8815_s16 + $0x3ec] ss:$16 sps:$4 sm:$0xff]  }
 0x564   : > { %5756 = vmatprep.subr.bf16.mxu0 %v7955_v25  ;;  %5838 = vmatprep.subr.bf16.mxu1 %v7958_v27  ;;  %v8025_v25 = vld [vmem:[%s8815_s16 + $0x3e0] ss:$16 sps:$4 sm:$0xff]   ;;  %v4934_v27 = vmax.f32 %v4926_v21, 0.0 }
 0x566   : > { %v4939_v28 = vpack.c.bf16 %v4934_v27, %v4934_v27 }
 0x567   : > { %5757 = vmatpush1.bf16.msra.mxu0 %v7953_v29  ;;  %5839 = vmatpush1.bf16.msra.mxu1 %v7956_v30  ;;  %v8418_v29 = vmov 1983009808  }
 0x568   : > { %5758 = vmatprep.subr.bf16.mxu0 %v7961_v31  ;;  %5840 = vmatprep.subr.bf16.mxu1 %v7964_v34  ;;  %v5880_v30 = vunpack.c.l.s4 %v8418_v29 }
 0x56a   : > { %v5881_v31 = vunpack.c.0.s8 %v5880_v30 }
 0x56b   : > { %5759 = vmatpush1.bf16.msra.mxu0 %v7959_v36  ;;  %5841 = vmatpush1.bf16.msra.mxu1 %v7962_v37 }
 0x56c   : > { %5760 = vmatprep.subr.bf16.mxu0 %v7967_v38  ;;  %5842 = vmatprep.subr.bf16.mxu1 %v7970_v33  ;;  %v5884_v36 = vsub.s32 %v5881_v31, %v9059_v57 }
 0x56f   : > { %5761 = vmatpush1.bf16.msra.mxu0 %v7965_v43  ;;  %5843 = vmatpush1.bf16.msra.mxu1 %v7968_v44 }
 0x570   : > { %5762 = vmatprep.subr.bf16.mxu0 %v7973_v46  ;;  %5844 = vmatprep.subr.bf16.mxu1 %v7976_v5 }
 0x573   : > { %5763 = vmatpush1.bf16.msra.mxu0 %v7971_v16  ;;  %5845 = vmatpush1.bf16.msra.mxu1 %v7974_v49 }
 0x574   : > { %5764 = vmatprep.subr.bf16.mxu0 %v7979_v0  ;;  %5846 = vmatprep.subr.bf16.mxu1 %v7982_v50 }
 0x577   : > { %5765 = vmatpush1.bf16.msra.mxu0 %v7977_v10  ;;  %5847 = vmatpush1.bf16.msra.mxu1 %v7980_v60 }
 0x578   : > { %5766 = vmatprep.subr.bf16.mxu0 %v7985_v2  ;;  %5848 = vmatprep.subr.bf16.mxu1 %v7988_v48 }
 0x57b   : > { %5767 = vmatpush1.bf16.msra.mxu0 %v7983_v61  ;;  %5849 = vmatpush1.bf16.msra.mxu1 %v7986_v52 }
 0x57c   : > { %5768 = vmatprep.subr.bf16.mxu0 %v7991_v53  ;;  %5850 = vmatprep.subr.bf16.mxu1 %v7994_v51 }
 0x57f   : > { %5769 = vmatpush1.bf16.msra.mxu0 %v7989_v54  ;;  %5851 = vmatpush1.bf16.msra.mxu1 %v7992_v55 }
 0x580   : > { %5770 = vmatprep.subr.bf16.mxu0 %v7997_v56  ;;  %5852 = vmatprep.subr.bf16.mxu1 %v8000_v22 }
 0x583   : > { %5771 = vmatpush1.bf16.msra.mxu0 %v7995_v59  ;;  %5853 = vmatpush1.bf16.msra.mxu1 %v7998_v62 }
 0x584   : > { %5772 = vmatprep.subr.bf16.mxu0 %v8003_v63  ;;  %5854 = vmatprep.subr.bf16.mxu1 %v8006_v1 }
 0x587   : > { %5773 = vmatpush1.bf16.msra.mxu0 %v8001_v26  ;;  %5855 = vmatpush1.bf16.msra.mxu1 %v8004_v3 }
 0x588   : > { %5774 = vmatprep.subr.bf16.mxu0 %v8009_v4  ;;  %5856 = vmatprep.subr.bf16.mxu1 %v8012_v7 }
 0x58b   : > { %5775 = vmatpush1.bf16.msra.mxu0 %v8007_v8  ;;  %5857 = vmatpush1.bf16.msra.mxu1 %v8010_v11 }
 0x58c   : > { %5776 = vmatprep.subr.bf16.mxu0 %v8015_v12  ;;  %5858 = vmatprep.subr.bf16.mxu1 %v8018_v13 }
 0x58f   : > { %5777 = vmatpush1.bf16.msra.mxu0 %v8013_v14  ;;  %5859 = vmatpush1.bf16.msra.mxu1 %v8016_v6 }
 0x590   : > { %5778 = vmatprep.subr.bf16.mxu0 %v8021_v18  ;;  %5860 = vmatprep.subr.bf16.mxu1 %v8024_v19 }
 0x593   : > { %5779 = vmatpush1.bf16.msra.mxu0 %v8019_v20  ;;  %5861 = vmatpush1.bf16.msra.mxu1 %v8022_v15 }
 0x594   : > { %5780 = vmatprep.subr.bf16.mxu0 %v8027_v23  ;;  %5862 = vmatprep.subr.bf16.mxu1 %v8030_v24 }
 0x597   : > { %5781 = vmatpush1.bf16.msra.mxu0 %v8025_v25  ;;  %5863 = vmatpush1.bf16.msra.mxu1 %v8028_v58 }
 0x59a   : > { %5783 = vmatmul.mubr.bf16.vlgmr.msra.gmra.mrb[4].mxu0 %v4939_v28  ;;  %5865 = vmatmul.mubr.bf16.vlgmr.msra.gmra.mrb[4].mxu1 %v4939_v28 }
 0x66d   : > { %v5784_v34 = vpop.f32.mrb[4].mxu0  ;;  %v5866_v35 = vpop.f32.mrb[4].mxu1 }
 0x66e   : > { %v5786_v37 = vpop.f32.mrb[5].mxu0  ;;  %v5868_v32 = vpop.f32.mrb[5].mxu1 }
 0x66f   : > { %v5877_v38 = vcombine.low %v5784_v34, %v5786_v37  ;;  %v5878_v33 = vcombine.low %v5866_v35, %v5868_v32  ;;  %v5788_v39 = vpop.f32.mrb[6].mxu0  ;;  %v5870_v40 = vpop.f32.mrb[6].mxu1 }
 0x670   : > { %v5789_v41 = vpop.f32.mrb[7].mxu0  ;;  %v5871_v42 = vpop.f32.mrb[7].mxu1 }
 0x671   : > { %v5885_v43 = vrot.slane %v5877_v38, %v5884_v36  ;;  %v5892_v44 = vrot.slane %v5878_v33, %v5884_v36  ;;  %5900 = sbr.rel (%p6790_p12) target bundleno = 1664 (0x680), region = 108 }
 0x673   : > { %v5893_v46 = vcombine.low %v5885_v43, %v5892_v44 }
 0x675   : > { %v5895_v5 = vadd.f32 %v5893_v46, %v4936_v45 }
 0x677   : > { %5896 = vst [vmem:[#allocation3] sm:$0xff] %v5895_v5 }
 0x67e   : > { %v5901_v47 = vld [vmem:[#allocation3] sm:$0xff] }
 0x67f   : > { %5902 = vst [vmem:[#allocation17] sm:$0xff] %v5901_v47 }
 0x680 PF: > { %p6931_p13 = scmp.eq.s32.totalorder %s8511_s23, 3  ;;  %s8419_s17 = smov [#allocation17]  }
 0x681   : > { %s5913_s20 = sshll.u32 %s8419_s17, 4  ;;  %s5914_s20 = int_to_ptr.vmem [resolvable:$true] %s5913_s20 }
 0x682   : > { %s8289_s28 = scalar_lea.vmem %s5914_s20, 128  ;;  %p8296_p8 = scmp.lt.s32.totalorder %s5914_s20, %s5914_s20 }
 0x683   : > { %p8290_p2 = scmp.ne.s32.totalorder %s5914_s20, %s8289_s28  ;;  %p8297_p4 = scmp.lt.s32.totalorder %s8289_s28, %s8289_s28 }
 0x685   : > { %p8291_p6 = pnand %p8290_p2, %p6931_p13  ;;  %p8298_p11 = por %p8297_p4, %p8296_p8 }
 0x687   : > { %p8292_p3 = pneg %p8291_p6 }
 0x689   : > { %p8299_p9 = pnand %p8298_p11, %p8292_p3 }
 0x68b   : > { %8302 = shalt.err (!%p8299_p9)
}
 0x68c   : > { %s9273_s22 = sld [smem:[#allocation39_spill]] }
 0x692   : > { %s9274_s24 = smov %s9273_s22  ;;  %s8303_s25 = scalar_lea.hbm %s9273_s22, 128 }
 0x693   : > { %p8304_p0 = scmp.ne.s32.totalorder %s9274_s24, %s8303_s25  ;;  %p8309_p1 = scmp.lt.u32.totalorder %s8303_s25, %s9274_s24 }
 0x695   : > { %p8305_p10 = pnand %p8304_p0, %p6931_p13 }
 0x697   : > { %p8306_p7 = pneg %p8305_p10 }
 0x699   : > { %p8311_p5 = pnand %p8309_p1, %p8306_p7 }
 0x69b   : > { %8314 = shalt.err (!%p8311_p5)
}
 0x69c   : > { %6886 = dma.vmem_to_hbm [thread:$0]  (%p6931_p13), %s5914_s20, 128, %s9274_s24, [#allocation6]  }
 0x69d   : > { %8372 = dma.done.wait (%p6931_p13), [#allocation6], 128  }
 0x69e   : > { %8374 = vsyncadd (%p6931_p13), [#allocation6], 4294967168 }
 0x69f PF: > { %s9275_s27 = sld [smem:[#allocation30_spill]]  ;;  %s9276_s17 = sld [smem:[#allocation27_spill]] }
 0x6a0   : > { %s9277_s18 = sld [smem:[#allocation28_spill]]  ;;  %s9278_s19 = sld [smem:[#allocation33_spill]] }
 0x6a1   : > { %s9279_s15 = sld [smem:[#allocation31_spill]]  ;;  %s9280_s20 = smov %s8393_s21 }
 0x6a5   : > { %s25_s22 = sadd.s32 1, %s9275_s27  }
 0x6a6   : > { %p22_p12 = scmp.ge.s32.totalorder %s25_s22, 6  }
 0x6a7   : > { %s9281_s21 = smov %s9279_s15 }
 0x6a8   :  { %24 = sbr.rel (!%p22_p12) target bundleno = 13 (0xd), region = 157 }
 0x6af   :  { %5926 = vsyncpa [#allocation5], 1 }
 0x6b0   :  { %5928 = vsyncpa [#allocation5 + $0x1], 1 }
 0x6b1   :  { %5929 = vsyncpa [#allocation8], 1 }
 0x6b2   :  { %5930 = vsyncpa [#allocation13], 1 }
 0x6b3   :  { %5931 = vsyncpa [#allocation6], 1 }
 0x6b4   :  { %5933 = vsyncpa [#allocation6 + $0x1], 1 }

</bundles_post_ra>
